<compile_context>
chip_gen: v7x
topology: tpu7x:2x2x1
jax: 0.10.0
libtpu: 0.0.40
codegen_flags: <defaults>
</compile_context>

<pallas_src>
import numpy as np
import jax
import jax.numpy as jnp
from jax import lax
from jax.experimental import pallas as pl
from jax.experimental.pallas import tpu as pltpu

# ---- small config consistent with the torch module --------------------------
MODES = 8          # configuration['Modes']
WIDTH = 32         # configuration['Width']
T_IN = 10          # configuration['T_in']
N_OUTPUT = 10      # configuration['Step']  (n_output)
N_HIDDEN = 16      # configuration['Hidden Size']
N_CELLS = 2        # configuration['Cells']
H = 16             # small spatial size (stands in for the 448x640 camera frame)
W = 16
HW = H * W
P = 2 * MODES * MODES        # number of retained (kx, ky) Fourier modes
C_OUT_PAD = 16               # padded epilogue channel count (multiple of 8)

assert 2 * MODES <= H and MODES <= W // 2
assert (2 * WIDTH) % 8 == 0


# =============================== kernel ======================================
def _gelu(v):
    # tanh-approximate GeLU: tanh runs on the EUP slot, far fewer VALU ops than
    # the erf polynomial; |err| vs exact GeLU < 1e-3, well inside tolerance.
    k = 0.7978845608028654  # sqrt(2/pi)
    return 0.5 * v * (1.0 + jnp.tanh(k * (v + 0.044715 * (v * v * v))))


def _make_frnn_kernel(batch_block):
    def frnn_kernel(*refs):
        (xg_ref, hg_ref,
         wix_ref, bix_ref, wih_ref, bih_ref,
         a2r_ref, a2i_ref, b2r_ref, b2i_ref) = refs[:10]
        cell_refs = refs[10:10 + 5 * N_CELLS]
        wox_ref, box_ref, woh_ref, boh_ref = refs[10 + 5 * N_CELLS:14 + 5 * N_CELLS]
        y_ref, hout_ref = refs[14 + 5 * N_CELLS:16 + 5 * N_CELLS]
        xpk_ref = refs[16 + 5 * N_CELLS]                 # VMEM scratch (2*width, P) f32

        def mm(a, b):
            # default matmul precision (single bf16 MXU pass), f32 accumulation
            return jnp.dot(a, b, preferred_element_type=jnp.float32)

        n_groups = (2 * WIDTH) // 8

        for bb in range(batch_block):
            x = xg_ref[bb]                               # (T_in+2, HW)
            h = hg_ref[bb]                               # (n_hidden, HW)

            # linear_in_x / linear_in_h (channel mixing; N = HW is lane-dense)
            x = mm(wix_ref[...], x) + bix_ref[...]       # (width, HW)
            h = mm(wih_ref[...], h) + bih_ref[...]       # (width, HW)

            for c in range(N_CELLS):
                wh, whb, wx, wxb, wsp = cell_refs[5 * c:5 * (c + 1)]

                # h path: 1x1 conv + GeLU
                h_gate = _gelu(mm(wh[...], h) + whb[...])

                # x path: spectral conv.  Forward truncated DFT written straight
                # into the packed [Re ; Im] sublane layout (no repack).
                xb16 = x.astype(jnp.bfloat16)
                xpk_ref[:WIDTH, :] = jnp.dot(xb16, a2r_ref[...],
                                             preferred_element_type=jnp.float32)
                xpk_ref[WIDTH:, :] = jnp.dot(xb16, a2i_ref[...],
                                             preferred_element_type=jnp.float32)

                # per-mode complex channel mixing (packed real form):
                #   o[j, p] = sum_k xpk[k, p] * wsp[k, j, p]
                # fori_loop over 8-row groups, 2 split accumulators, f32 weights,
                # one aligned (8, P) load + in-register row broadcast per group.
                def mix_group(g, accs, _wsp=wsp):
                    a0, a1 = accs
                    base = pl.multiple_of(g * 8, 8)
                    rows = xpk_ref[pl.ds(base, 8), :]        # (8, P) aligned load
                    for j in range(8):
                        w_kj = _wsp[base + j]                # (2*width, P) f32 slab
                        xb = rows[j:j + 1, :]                # (1, P) in-register row
                        if j % 2 == 0:
                            a0 = a0 + xb * w_kj
                        else:
                            a1 = a1 + xb * w_kj
                    return a0, a1

                zero = jnp.zeros((2 * WIDTH, P), jnp.float32)
                acc0, acc1 = lax.fori_loop(0, n_groups, mix_group, (zero, zero))
                o = acc0 + acc1                              # (2*width, P)

                # inverse truncated DFT straight from the packed halves
                x1 = (jnp.dot(o[:WIDTH, :].astype(jnp.bfloat16), b2r_ref[...],
                              preferred_element_type=jnp.float32)
                      + jnp.dot(o[WIDTH:, :].astype(jnp.bfloat16), b2i_ref[...],
                                preferred_element_type=jnp.float32))   # (width, HW)

                # x path: 1x1 conv, sum, GeLU
                x2 = mm(wx[...], x) + wxb[...]
                xs = _gelu(x1 + x2)

                hh = h_gate + xs
                x = jnp.tanh(hh)                             # cell output -> next x
                h = hh                                       # next hidden (clone/detach no-op)

            # epilogue matmuls with 16-row padded weights -> unmasked stores
            y_ref[bb] = mm(wox_ref[...], x) + box_ref[...]       # (16, HW)
            hout_ref[bb] = mm(woh_ref[...], h) + boh_ref[...]    # (16, HW)

    return frnn_kernel


# =========================== host-side helpers ================================
def build_dft_mats(h, w, m1, m2):
    """Exact truncated rfft2 / irfft2 as dense real matrices, Re/Im split.

    Forward A_re/A_im: (HW, P), normalized by 1/(H*W) (folded over from the
    inverse) so mode magnitudes stay O(1) under bf16.  Inverse B_re/B_im:
    (P, HW) with the Hermitian-doubling coefficient (no Nyquist column kept,
    MODES <= W//2).  Mode flattening p = kx_idx*m2 + ky with kx_idx over
    [0..m1-1, h-m1..h-1]."""
    kx = np.concatenate([np.arange(m1), np.arange(h - m1, h)]).astype(np.float64)
    ky = np.arange(m2, dtype=np.float64)
    hs = np.arange(h, dtype=np.float64)
    ws = np.arange(w, dtype=np.float64)
    th = 2.0 * np.pi * (kx[:, None, None, None] * hs[None, None, :, None] / h
                        + ky[None, :, None, None] * ws[None, None, None, :] / w)
    p = 2 * m1 * m2
    ar = (np.cos(th) / (h * w)).reshape(p, h * w)
    ai = (-np.sin(th) / (h * w)).reshape(p, h * w)
    coef = np.where(ky == 0, 1.0, 2.0)[None, :, None, None]
    br = (coef * np.cos(th)).reshape(p, h * w)
    bi = (coef * -np.sin(th)).reshape(p, h * w)
    return (jnp.asarray(ar.T, jnp.bfloat16),   # A_re (HW, P):  xhat_re = x @ A_re
            jnp.asarray(ai.T, jnp.bfloat16),   # A_im (HW, P):  xhat_im = x @ A_im
            jnp.asarray(br, jnp.bfloat16),     # B_re (P, HW):  x1 = o_re @ B_re
            jnp.asarray(bi, jnp.bfloat16))     #              +     o_im @ B_im


def pack_spectral_weights(cell):
    """weights1/2 (C_in, C_out, m1, m2) -> packed real (2*C_in, 2*C_out, P) f32
    with the complex mix written as [[wr, wi], [-wi, wr]] and modes on lanes.
    Kept in f32 so the mixing loop has no per-iteration dtype unpack."""
    wr = jnp.concatenate([cell['w1r'], cell['w2r']], axis=2)
    wi = jnp.concatenate([cell['w1i'], cell['w2i']], axis=2)
    wr = jnp.transpose(wr, (2, 3, 0, 1)).reshape(P, WIDTH, WIDTH)   # (P, Cin, Cout)
    wi = jnp.transpose(wi, (2, 3, 0, 1)).reshape(P, WIDTH, WIDTH)
    top = jnp.concatenate([wr, wi], axis=2)            # xr rows -> [wr | wi]
    bot = jnp.concatenate([-wi, wr], axis=2)           # xi rows -> [-wi | wr]
    wp = jnp.concatenate([top, bot], axis=1)           # (P, 2Cin, 2Cout)
    return jnp.transpose(wp, (1, 2, 0)).astype(jnp.float32)   # (2Cin, 2Cout, P)


def make_grid(b, h, w):
    # stand-in for get_grid (x_grid / y_grid linspaces appended as 2 channels)
    gx = jnp.broadcast_to(jnp.linspace(-1.5, 1.5, h, dtype=jnp.float32).reshape(1, h, 1, 1),
                          (b, h, w, 1))
    gy = jnp.broadcast_to(jnp.linspace(-2.0, 2.0, w, dtype=jnp.float32).reshape(1, 1, w, 1),
                          (b, h, w, 1))
    return jnp.concatenate([gx, gy], axis=-1)


def init_params(key):
    def u(k, shape, lo=-0.1, hi=0.1):
        return jax.random.uniform(k, shape, jnp.float32, lo, hi)

    ks = jax.random.split(key, 8)
    p = {
        'lin_in_x_w': u(ks[0], (WIDTH, T_IN + 2)),
        'lin_in_x_b': u(ks[1], (WIDTH,)),
        'lin_in_h_w': u(ks[2], (WIDTH, N_HIDDEN)),
        'lin_in_h_b': u(ks[3], (WIDTH,)),
        'lin_out_x_w': u(ks[4], (N_OUTPUT, WIDTH)),
        'lin_out_x_b': u(ks[5], (N_OUTPUT,)),
        'lin_out_h_w': u(ks[6], (N_HIDDEN - 2, WIDTH)),
        'lin_out_h_b': u(ks[7], (N_HIDDEN - 2,)),
        'cells': [],
    }
    scale = 1.0 / (WIDTH * WIDTH)
    for c in range(N_CELLS):
        kc = jax.random.split(jax.random.fold_in(key, 100 + c), 8)
        p['cells'].append({
            'wh_w': u(kc[0], (WIDTH, WIDTH)),
            'wh_b': u(kc[1], (WIDTH,)),
            'wx_w': u(kc[2], (WIDTH, WIDTH)),
            'wx_b': u(kc[3], (WIDTH,)),
            'w1r': scale * jax.random.uniform(kc[4], (WIDTH, WIDTH, MODES, MODES), jnp.float32),
            'w1i': scale * jax.random.uniform(kc[5], (WIDTH, WIDTH, MODES, MODES), jnp.float32),
            'w2r': scale * jax.random.uniform(kc[6], (WIDTH, WIDTH, MODES, MODES), jnp.float32),
            'w2i': scale * jax.random.uniform(kc[7], (WIDTH, WIDTH, MODES, MODES), jnp.float32),
        })
    return p


def _pad_rows(m, rows):
    pad = rows - m.shape[0]
    return jnp.pad(m, ((0, pad),) + ((0, 0),) * (m.ndim - 1))


def _choose_batch_block(b):
    # Largest divisor of b that still leaves >= 2 grid steps: amortizes per-step
    # overhead on single-TC v5e/v6e while keeping both v7x TensorCores busy.
    for d in range(b, 0, -1):
        if b % d == 0 and (b // d) >= min(2, b):
            return d
    return 1


# ============================== pallas wrapper ================================
def frnn_forward_pallas(x, h, params):
    b = x.shape[0]
    grid_ch = make_grid(b, H, W)
    # channels-first, spatially flattened: (B, C, HW) with HW on the minor axis
    xg = jnp.transpose(jnp.concatenate([x, grid_ch], axis=-1),
                       (0, 3, 1, 2)).reshape(b, T_IN + 2, HW)
    hg = jnp.transpose(jnp.concatenate([h, grid_ch], axis=-1),
                       (0, 3, 1, 2)).reshape(b, N_HIDDEN, HW)
    a2r, a2i, b2r, b2i = build_dft_mats(H, W, MODES, MODES)

    # epilogue weights padded to 16 rows -> unmasked output stores
    wox = _pad_rows(params['lin_out_x_w'], C_OUT_PAD)
    box = _pad_rows(params['lin_out_x_b'].reshape(-1, 1), C_OUT_PAD)
    woh = _pad_rows(params['lin_out_h_w'], C_OUT_PAD)
    boh = _pad_rows(params['lin_out_h_b'].reshape(-1, 1), C_OUT_PAD)

    inputs = [xg, hg,
              params['lin_in_x_w'], params['lin_in_x_b'].reshape(-1, 1),
              params['lin_in_h_w'], params['lin_in_h_b'].reshape(-1, 1),
              a2r, a2i, b2r, b2i]
    for cell in params['cells']:
        inputs += [cell['wh_w'], cell['wh_b'].reshape(-1, 1),
                   cell['wx_w'], cell['wx_b'].reshape(-1, 1),
                   pack_spectral_weights(cell)]
    inputs += [wox, box, woh, boh]

    batch_block = _choose_batch_block(b)
    grid = (b // batch_block,)

    def batched_spec(arr):
        nd = arr.ndim
        return pl.BlockSpec((batch_block,) + arr.shape[1:],
                            lambda bb, _nd=nd: (bb,) + (0,) * (_nd - 1))

    def full_spec(arr):
        nd = arr.ndim
        return pl.BlockSpec(arr.shape, lambda bb, _nd=nd: (0,) * _nd)

    in_specs = [batched_spec(xg), batched_spec(hg)] + [full_spec(a) for a in inputs[2:]]
    out_shape = [jax.ShapeDtypeStruct((b, C_OUT_PAD, HW), jnp.float32),
                 jax.ShapeDtypeStruct((b, C_OUT_PAD, HW), jnp.float32)]
    out_specs = [pl.BlockSpec((batch_block, C_OUT_PAD, HW), lambda bb: (bb, 0, 0)),
                 pl.BlockSpec((batch_block, C_OUT_PAD, HW), lambda bb: (bb, 0, 0))]

    y, hout = pl.pallas_call(
        _make_frnn_kernel(batch_block),
        out_shape=out_shape,
        grid_spec=pltpu.PrefetchScalarGridSpec(
            num_scalar_prefetch=0, grid=grid,
            in_specs=in_specs, out_specs=out_specs,
            scratch_shapes=[pltpu.VMEM((2 * WIDTH, P), jnp.float32)]),
        compiler_params=pltpu.CompilerParams(
            dimension_semantics=("parallel",),
            vmem_limit_bytes=32 * 1024 * 1024),
    )(*inputs)

    # back to the module's NHWC interface, dropping the channel padding
    y = jnp.transpose(y.reshape(b, C_OUT_PAD, H, W), (0, 2, 3, 1))[..., :N_OUTPUT]
    hout = jnp.transpose(hout.reshape(b, C_OUT_PAD, H, W), (0, 2, 3, 1))[..., :N_HIDDEN - 2]
    return y, hout


# ============================= pure-JAX reference =============================
def _spectral_ref(x_cf, w1, w2, m1, m2):
    bm, c, hs, ws = x_cf.shape
    x_ft = jnp.fft.rfft2(x_cf)
    out_ft = jnp.zeros((bm, c, hs, ws // 2 + 1), dtype=jnp.complex64)
    out_ft = out_ft.at[:, :, :m1, :m2].set(
        jnp.einsum('bixy,ioxy->boxy', x_ft[:, :, :m1, :m2], w1))
    out_ft = out_ft.at[:, :, hs - m1:, :m2].set(
        jnp.einsum('bixy,ioxy->boxy', x_ft[:, :, hs - m1:, :m2], w2))
    return jnp.fft.irfft2(out_ft, s=(hs, ws))


def frnn_forward_reference(x, h, params):
    b = x.shape[0]
    grid_ch = make_grid(b, H, W)
    xc = jnp.concatenate([x, grid_ch], axis=-1)
    hc = jnp.concatenate([h, grid_ch], axis=-1)
    xw = xc @ params['lin_in_x_w'].T + params['lin_in_x_b']
    hw = hc @ params['lin_in_h_w'].T + params['lin_in_h_b']
    xcf = jnp.transpose(xw, (0, 3, 1, 2))
    hcf = jnp.transpose(hw, (0, 3, 1, 2))
    for cell in params['cells']:
        h2 = jnp.einsum('oi,bihw->bohw', cell['wh_w'], hcf) + cell['wh_b'][None, :, None, None]
        h_gate = jax.nn.gelu(h2, approximate=False)
        w1 = (cell['w1r'] + 1j * cell['w1i']).astype(jnp.complex64)
        w2 = (cell['w2r'] + 1j * cell['w2i']).astype(jnp.complex64)
        x1 = _spectral_ref(xcf, w1, w2, MODES, MODES)
        x2 = jnp.einsum('oi,bihw->bohw', cell['wx_w'], xcf) + cell['wx_b'][None, :, None, None]
        xs = jax.nn.gelu(x1 + x2, approximate=False)
        hh = h_gate + xs
        xcf = jnp.tanh(hh)
        hcf = hh
    xw = jnp.transpose(xcf, (0, 2, 3, 1))
    hw = jnp.transpose(hcf, (0, 2, 3, 1))
    y = xw @ params['lin_out_x_w'].T + params['lin_out_x_b']
    hout = hw @ params['lin_out_h_w'].T + params['lin_out_h_b']
    return y, hout


# ==================================== main ====================================
if __name__ == "__main__":
    key = jax.random.PRNGKey(0)
    kx, kh, kp = jax.random.split(key, 3)
    B = 2
    x = jax.random.uniform(kx, (B, H, W, T_IN), jnp.float32)
    h = jax.random.uniform(kh, (B, H, W, N_HIDDEN - 2), jnp.float32)
    params = init_params(kp)

    y, hout = frnn_forward_pallas(x, h, params)
    jax.block_until_ready((y, hout))

    y_ref, h_ref = frnn_forward_reference(x, h, params)
    err_y = float(jnp.max(jnp.abs(y - y_ref)))
    err_h = float(jnp.max(jnp.abs(hout - h_ref)))

    assert y.shape == (B, H, W, N_OUTPUT)
    assert hout.shape == (B, H, W, N_HIDDEN - 2)
    assert np.isfinite(err_y) and np.isfinite(err_h)
    assert err_y < 1e-2 and err_h < 1e-2, (err_y, err_h)
    print("KERNEL_OK")
</pallas_src>

<mosaic_0001>
module attributes {stable_mosaic.version = 11 : i64} {
  func.func @frnn_kernel(%arg0: i32, %arg1: memref<1x12x256xf32, #tpu.memory_space<vmem>>, %arg2: memref<1x16x256xf32, #tpu.memory_space<vmem>>, %arg3: memref<32x12xf32, #tpu.memory_space<vmem>>, %arg4: memref<32x1xf32, #tpu.memory_space<vmem>>, %arg5: memref<32x16xf32, #tpu.memory_space<vmem>>, %arg6: memref<32x1xf32, #tpu.memory_space<vmem>>, %arg7: memref<256x128xbf16, #tpu.memory_space<vmem>>, %arg8: memref<256x128xbf16, #tpu.memory_space<vmem>>, %arg9: memref<128x256xbf16, #tpu.memory_space<vmem>>, %arg10: memref<128x256xbf16, #tpu.memory_space<vmem>>, %arg11: memref<32x32xf32, #tpu.memory_space<vmem>>, %arg12: memref<32x1xf32, #tpu.memory_space<vmem>>, %arg13: memref<32x32xf32, #tpu.memory_space<vmem>>, %arg14: memref<32x1xf32, #tpu.memory_space<vmem>>, %arg15: memref<64x64x128xf32, #tpu.memory_space<vmem>>, %arg16: memref<32x32xf32, #tpu.memory_space<vmem>>, %arg17: memref<32x1xf32, #tpu.memory_space<vmem>>, %arg18: memref<32x32xf32, #tpu.memory_space<vmem>>, %arg19: memref<32x1xf32, #tpu.memory_space<vmem>>, %arg20: memref<64x64x128xf32, #tpu.memory_space<vmem>>, %arg21: memref<16x32xf32, #tpu.memory_space<vmem>>, %arg22: memref<16x1xf32, #tpu.memory_space<vmem>>, %arg23: memref<16x32xf32, #tpu.memory_space<vmem>>, %arg24: memref<16x1xf32, #tpu.memory_space<vmem>>, %arg25: memref<1x16x256xf32, #tpu.memory_space<vmem>>, %arg26: memref<1x16x256xf32, #tpu.memory_space<vmem>>, %arg27: memref<64x128xf32, #tpu.memory_space<vmem>>) attributes {dimension_semantics = [#tpu.dimension_semantics<parallel>], iteration_bounds = array<i64: 2>, scalar_prefetch = 0 : i64, scratch_operands = 1 : i64, tpu.core_type = #tpu.core_type<tc>, window_params = [{transform_indices = @transform_0, window_bounds = array<i64: 1, 12, 256>}, {transform_indices = @transform_1, window_bounds = array<i64: 1, 16, 256>}, {pipeline_mode = #tpu.pipeline_mode<synchronous>, transform_indices = @transform_2, window_bounds = array<i64: 32, 12>}, {pipeline_mode = #tpu.pipeline_mode<synchronous>, transform_indices = @transform_3, window_bounds = array<i64: 32, 1>}, {pipeline_mode = #tpu.pipeline_mode<synchronous>, transform_indices = @transform_4, window_bounds = array<i64: 32, 16>}, {pipeline_mode = #tpu.pipeline_mode<synchronous>, transform_indices = @transform_5, window_bounds = array<i64: 32, 1>}, {pipeline_mode = #tpu.pipeline_mode<synchronous>, transform_indices = @transform_6, window_bounds = array<i64: 256, 128>}, {pipeline_mode = #tpu.pipeline_mode<synchronous>, transform_indices = @transform_7, window_bounds = array<i64: 256, 128>}, {pipeline_mode = #tpu.pipeline_mode<synchronous>, transform_indices = @transform_8, window_bounds = array<i64: 128, 256>}, {pipeline_mode = #tpu.pipeline_mode<synchronous>, transform_indices = @transform_9, window_bounds = array<i64: 128, 256>}, {pipeline_mode = #tpu.pipeline_mode<synchronous>, transform_indices = @transform_10, window_bounds = array<i64: 32, 32>}, {pipeline_mode = #tpu.pipeline_mode<synchronous>, transform_indices = @transform_11, window_bounds = array<i64: 32, 1>}, {pipeline_mode = #tpu.pipeline_mode<synchronous>, transform_indices = @transform_12, window_bounds = array<i64: 32, 32>}, {pipeline_mode = #tpu.pipeline_mode<synchronous>, transform_indices = @transform_13, window_bounds = array<i64: 32, 1>}, {pipeline_mode = #tpu.pipeline_mode<synchronous>, transform_indices = @transform_14, window_bounds = array<i64: 64, 64, 128>}, {pipeline_mode = #tpu.pipeline_mode<synchronous>, transform_indices = @transform_15, window_bounds = array<i64: 32, 32>}, {pipeline_mode = #tpu.pipeline_mode<synchronous>, transform_indices = @transform_16, window_bounds = array<i64: 32, 1>}, {pipeline_mode = #tpu.pipeline_mode<synchronous>, transform_indices = @transform_17, window_bounds = array<i64: 32, 32>}, {pipeline_mode = #tpu.pipeline_mode<synchronous>, transform_indices = @transform_18, window_bounds = array<i64: 32, 1>}, {pipeline_mode = #tpu.pipeline_mode<synchronous>, transform_indices = @transform_19, window_bounds = array<i64: 64, 64, 128>}, {pipeline_mode = #tpu.pipeline_mode<synchronous>, transform_indices = @transform_20, window_bounds = array<i64: 16, 32>}, {pipeline_mode = #tpu.pipeline_mode<synchronous>, transform_indices = @transform_21, window_bounds = array<i64: 16, 1>}, {pipeline_mode = #tpu.pipeline_mode<synchronous>, transform_indices = @transform_22, window_bounds = array<i64: 16, 32>}, {pipeline_mode = #tpu.pipeline_mode<synchronous>, transform_indices = @transform_23, window_bounds = array<i64: 16, 1>}, {transform_indices = @transform_24, window_bounds = array<i64: 1, 16, 256>}, {transform_indices = @transform_25, window_bounds = array<i64: 1, 16, 256>}]} {
    %c0 = arith.constant 0 : index
    %c0_0 = arith.constant 0 : index
    %c0_1 = arith.constant 0 : index
    %0 = vector.load %arg1[%c0, %c0_0, %c0_1] : memref<1x12x256xf32, #tpu.memory_space<vmem>>, vector<1x12x256xf32>
    %1 = vector.shape_cast %0 : vector<1x12x256xf32> to vector<12x256xf32>
    %c0_2 = arith.constant 0 : index
    %c0_3 = arith.constant 0 : index
    %c0_4 = arith.constant 0 : index
    %2 = vector.load %arg2[%c0_2, %c0_3, %c0_4] : memref<1x16x256xf32, #tpu.memory_space<vmem>>, vector<1x16x256xf32>
    %3 = vector.shape_cast %2 : vector<1x16x256xf32> to vector<16x256xf32>
    %c0_5 = arith.constant 0 : index
    %c0_6 = arith.constant 0 : index
    %4 = vector.load %arg3[%c0_5, %c0_6] : memref<32x12xf32, #tpu.memory_space<vmem>>, vector<32x12xf32>
    %cst = arith.constant dense<0.000000e+00> : vector<32x256xf32>
    %5 = tpu.matmul %4, %1, %cst {dimension_numbers = #tpu.dot_dimension_numbers<[1], [0], [0], [1], [0, 0, 1, 1], [], []>} : vector<32x12xf32>, vector<12x256xf32>, vector<32x256xf32> -> vector<32x256xf32>
    %c0_7 = arith.constant 0 : index
    %c0_8 = arith.constant 0 : index
    %6 = vector.load %arg4[%c0_7, %c0_8] : memref<32x1xf32, #tpu.memory_space<vmem>>, vector<32x1xf32>
    %7 = vector.broadcast %6 : vector<32x1xf32> to vector<32x256xf32>
    %8 = arith.addf %5, %7 : vector<32x256xf32>
    %c0_9 = arith.constant 0 : index
    %c0_10 = arith.constant 0 : index
    %9 = vector.load %arg5[%c0_9, %c0_10] : memref<32x16xf32, #tpu.memory_space<vmem>>, vector<32x16xf32>
    %cst_11 = arith.constant dense<0.000000e+00> : vector<32x256xf32>
    %10 = tpu.matmul %9, %3, %cst_11 {dimension_numbers = #tpu.dot_dimension_numbers<[1], [0], [0], [1], [0, 0, 1, 1], [], []>} : vector<32x16xf32>, vector<16x256xf32>, vector<32x256xf32> -> vector<32x256xf32>
    %c0_12 = arith.constant 0 : index
    %c0_13 = arith.constant 0 : index
    %11 = vector.load %arg6[%c0_12, %c0_13] : memref<32x1xf32, #tpu.memory_space<vmem>>, vector<32x1xf32>
    %12 = vector.broadcast %11 : vector<32x1xf32> to vector<32x256xf32>
    %13 = arith.addf %10, %12 : vector<32x256xf32>
    %c0_14 = arith.constant 0 : index
    %c0_15 = arith.constant 0 : index
    %14 = vector.load %arg11[%c0_14, %c0_15] : memref<32x32xf32, #tpu.memory_space<vmem>>, vector<32x32xf32>
    %cst_16 = arith.constant dense<0.000000e+00> : vector<32x256xf32>
    %15 = tpu.matmul %14, %13, %cst_16 {dimension_numbers = #tpu.dot_dimension_numbers<[1], [0], [0], [1], [0, 0, 1, 1], [], []>} : vector<32x32xf32>, vector<32x256xf32>, vector<32x256xf32> -> vector<32x256xf32>
    %c0_17 = arith.constant 0 : index
    %c0_18 = arith.constant 0 : index
    %16 = vector.load %arg12[%c0_17, %c0_18] : memref<32x1xf32, #tpu.memory_space<vmem>>, vector<32x1xf32>
    %17 = vector.broadcast %16 : vector<32x1xf32> to vector<32x256xf32>
    %18 = arith.addf %15, %17 : vector<32x256xf32>
    %cst_19 = arith.constant 5.000000e-01 : f32
    %19 = vector.broadcast %cst_19 : f32 to vector<32x256xf32>
    %20 = arith.mulf %19, %18 : vector<32x256xf32>
    %21 = arith.mulf %18, %18 : vector<32x256xf32>
    %22 = arith.mulf %21, %18 : vector<32x256xf32>
    %cst_20 = arith.constant 4.471500e-02 : f32
    %23 = vector.broadcast %cst_20 : f32 to vector<32x256xf32>
    %24 = arith.mulf %23, %22 : vector<32x256xf32>
    %25 = arith.addf %18, %24 : vector<32x256xf32>
    %cst_21 = arith.constant 0.797884583 : f32
    %26 = vector.broadcast %cst_21 : f32 to vector<32x256xf32>
    %27 = arith.mulf %26, %25 : vector<32x256xf32>
    %28 = math.tanh %27 : vector<32x256xf32>
    %cst_22 = arith.constant 1.000000e+00 : f32
    %29 = vector.broadcast %cst_22 : f32 to vector<32x256xf32>
    %30 = arith.addf %29, %28 : vector<32x256xf32>
    %31 = arith.mulf %20, %30 : vector<32x256xf32>
    %32 = arith.truncf %8 : vector<32x256xf32> to vector<32x256xbf16>
    %c0_23 = arith.constant 0 : index
    %c0_24 = arith.constant 0 : index
    %33 = vector.load %arg7[%c0_23, %c0_24] : memref<256x128xbf16, #tpu.memory_space<vmem>>, vector<256x128xbf16>
    %cst_25 = arith.constant dense<0.000000e+00> : vector<32x128xf32>
    %34 = tpu.matmul %32, %33, %cst_25 {dimension_numbers = #tpu.dot_dimension_numbers<[1], [0], [0], [1], [0, 0, 1, 1], [], []>} : vector<32x256xbf16>, vector<256x128xbf16>, vector<32x128xf32> -> vector<32x128xf32>
    %c0_26 = arith.constant 0 : index
    %c0_27 = arith.constant 0 : index
    %35 = vector.load %arg27[%c0_26, %c0_27] : memref<64x128xf32, #tpu.memory_space<vmem>>, vector<32x128xf32>
    tpu.vector_store %arg27[%c0_26, %c0_27], %34 {strides = array<i32>} : memref<64x128xf32, #tpu.memory_space<vmem>>, vector<32x128xf32>,
    %c0_28 = arith.constant 0 : index
    %c0_29 = arith.constant 0 : index
    %36 = vector.load %arg8[%c0_28, %c0_29] : memref<256x128xbf16, #tpu.memory_space<vmem>>, vector<256x128xbf16>
    %cst_30 = arith.constant dense<0.000000e+00> : vector<32x128xf32>
    %37 = tpu.matmul %32, %36, %cst_30 {dimension_numbers = #tpu.dot_dimension_numbers<[1], [0], [0], [1], [0, 0, 1, 1], [], []>} : vector<32x256xbf16>, vector<256x128xbf16>, vector<32x128xf32> -> vector<32x128xf32>
    %c32 = arith.constant 32 : index
    %c0_31 = arith.constant 0 : index
    %38 = vector.load %arg27[%c32, %c0_31] : memref<64x128xf32, #tpu.memory_space<vmem>>, vector<32x128xf32>
    tpu.vector_store %arg27[%c32, %c0_31], %37 {strides = array<i32>} : memref<64x128xf32, #tpu.memory_space<vmem>>, vector<32x128xf32>,
    %cst_32 = arith.constant 0.000000e+00 : f32
    %39 = vector.broadcast %cst_32 : f32 to vector<64x128xf32>
    %c0_i32 = arith.constant 0 : i32
    %c8_i32 = arith.constant 8 : i32
    %40 = arith.addi %c0_i32, %c8_i32 : i32
    %c1_i32 = arith.constant 1 : i32
    %41:2 = scf.for %arg28 = %c0_i32 to %40 step %c1_i32 iter_args(%arg29 = %39, %arg30 = %39) -> (vector<64x128xf32>, vector<64x128xf32>)  : i32 {
      %c8_i32_104 = arith.constant 8 : i32
      %148 = arith.muli %arg28, %c8_i32_104 : i32
      %149 = tpu.assume_multiple %148, 8 : i32
      %150 = arith.index_cast %149 : i32 to index
      %c0_105 = arith.constant 0 : index
      %151 = vector.load %arg27[%150, %c0_105] : memref<64x128xf32, #tpu.memory_space<vmem>>, vector<8x128xf32>
      %c0_i32_106 = arith.constant 0 : i32
      %152 = arith.addi %149, %c0_i32_106 : i32
      %153 = arith.index_cast %152 : i32 to index
      %c0_107 = arith.constant 0 : index
      %c0_108 = arith.constant 0 : index
      %154 = vector.load %arg15[%153, %c0_107, %c0_108] : memref<64x64x128xf32, #tpu.memory_space<vmem>>, vector<1x64x128xf32>
      %155 = vector.shape_cast %154 : vector<1x64x128xf32> to vector<64x128xf32>
      %156 = vector.extract_strided_slice %151 {offsets = [0, 0], sizes = [1, 128], strides = [1, 1]} : vector<8x128xf32> to vector<1x128xf32>
      %157 = vector.broadcast %156 : vector<1x128xf32> to vector<64x128xf32>
      %158 = arith.mulf %157, %155 : vector<64x128xf32>
      %159 = arith.addf %arg29, %158 : vector<64x128xf32>
      %c1_i32_109 = arith.constant 1 : i32
      %160 = arith.addi %149, %c1_i32_109 : i32
      %161 = arith.index_cast %160 : i32 to index
      %c0_110 = arith.constant 0 : index
      %c0_111 = arith.constant 0 : index
      %162 = vector.load %arg15[%161, %c0_110, %c0_111] : memref<64x64x128xf32, #tpu.memory_space<vmem>>, vector<1x64x128xf32>
      %163 = vector.shape_cast %162 : vector<1x64x128xf32> to vector<64x128xf32>
      %164 = vector.extract_strided_slice %151 {offsets = [1, 0], sizes = [1, 128], strides = [1, 1]} : vector<8x128xf32> to vector<1x128xf32>
      %165 = vector.broadcast %164 : vector<1x128xf32> to vector<64x128xf32>
      %166 = arith.mulf %165, %163 : vector<64x128xf32>
      %167 = arith.addf %arg30, %166 : vector<64x128xf32>
      %c2_i32 = arith.constant 2 : i32
      %168 = arith.addi %149, %c2_i32 : i32
      %169 = arith.index_cast %168 : i32 to index
      %c0_112 = arith.constant 0 : index
      %c0_113 = arith.constant 0 : index
      %170 = vector.load %arg15[%169, %c0_112, %c0_113] : memref<64x64x128xf32, #tpu.memory_space<vmem>>, vector<1x64x128xf32>
      %171 = vector.shape_cast %170 : vector<1x64x128xf32> to vector<64x128xf32>
      %172 = vector.extract_strided_slice %151 {offsets = [2, 0], sizes = [1, 128], strides = [1, 1]} : vector<8x128xf32> to vector<1x128xf32>
      %173 = vector.broadcast %172 : vector<1x128xf32> to vector<64x128xf32>
      %174 = arith.mulf %173, %171 : vector<64x128xf32>
      %175 = arith.addf %159, %174 : vector<64x128xf32>
      %c3_i32 = arith.constant 3 : i32
      %176 = arith.addi %149, %c3_i32 : i32
      %177 = arith.index_cast %176 : i32 to index
      %c0_114 = arith.constant 0 : index
      %c0_115 = arith.constant 0 : index
      %178 = vector.load %arg15[%177, %c0_114, %c0_115] : memref<64x64x128xf32, #tpu.memory_space<vmem>>, vector<1x64x128xf32>
      %179 = vector.shape_cast %178 : vector<1x64x128xf32> to vector<64x128xf32>
      %180 = vector.extract_strided_slice %151 {offsets = [3, 0], sizes = [1, 128], strides = [1, 1]} : vector<8x128xf32> to vector<1x128xf32>
      %181 = vector.broadcast %180 : vector<1x128xf32> to vector<64x128xf32>
      %182 = arith.mulf %181, %179 : vector<64x128xf32>
      %183 = arith.addf %167, %182 : vector<64x128xf32>
      %c4_i32 = arith.constant 4 : i32
      %184 = arith.addi %149, %c4_i32 : i32
      %185 = arith.index_cast %184 : i32 to index
      %c0_116 = arith.constant 0 : index
      %c0_117 = arith.constant 0 : index
      %186 = vector.load %arg15[%185, %c0_116, %c0_117] : memref<64x64x128xf32, #tpu.memory_space<vmem>>, vector<1x64x128xf32>
      %187 = vector.shape_cast %186 : vector<1x64x128xf32> to vector<64x128xf32>
      %188 = vector.extract_strided_slice %151 {offsets = [4, 0], sizes = [1, 128], strides = [1, 1]} : vector<8x128xf32> to vector<1x128xf32>
      %189 = vector.broadcast %188 : vector<1x128xf32> to vector<64x128xf32>
      %190 = arith.mulf %189, %187 : vector<64x128xf32>
      %191 = arith.addf %175, %190 : vector<64x128xf32>
      %c5_i32 = arith.constant 5 : i32
      %192 = arith.addi %149, %c5_i32 : i32
      %193 = arith.index_cast %192 : i32 to index
      %c0_118 = arith.constant 0 : index
      %c0_119 = arith.constant 0 : index
      %194 = vector.load %arg15[%193, %c0_118, %c0_119] : memref<64x64x128xf32, #tpu.memory_space<vmem>>, vector<1x64x128xf32>
      %195 = vector.shape_cast %194 : vector<1x64x128xf32> to vector<64x128xf32>
      %196 = vector.extract_strided_slice %151 {offsets = [5, 0], sizes = [1, 128], strides = [1, 1]} : vector<8x128xf32> to vector<1x128xf32>
      %197 = vector.broadcast %196 : vector<1x128xf32> to vector<64x128xf32>
      %198 = arith.mulf %197, %195 : vector<64x128xf32>
      %199 = arith.addf %183, %198 : vector<64x128xf32>
      %c6_i32 = arith.constant 6 : i32
      %200 = arith.addi %149, %c6_i32 : i32
      %201 = arith.index_cast %200 : i32 to index
      %c0_120 = arith.constant 0 : index
      %c0_121 = arith.constant 0 : index
      %202 = vector.load %arg15[%201, %c0_120, %c0_121] : memref<64x64x128xf32, #tpu.memory_space<vmem>>, vector<1x64x128xf32>
      %203 = vector.shape_cast %202 : vector<1x64x128xf32> to vector<64x128xf32>
      %204 = vector.extract_strided_slice %151 {offsets = [6, 0], sizes = [1, 128], strides = [1, 1]} : vector<8x128xf32> to vector<1x128xf32>
      %205 = vector.broadcast %204 : vector<1x128xf32> to vector<64x128xf32>
      %206 = arith.mulf %205, %203 : vector<64x128xf32>
      %207 = arith.addf %191, %206 : vector<64x128xf32>
      %c7_i32 = arith.constant 7 : i32
      %208 = arith.addi %149, %c7_i32 : i32
      %209 = arith.index_cast %208 : i32 to index
      %c0_122 = arith.constant 0 : index
      %c0_123 = arith.constant 0 : index
      %210 = vector.load %arg15[%209, %c0_122, %c0_123] : memref<64x64x128xf32, #tpu.memory_space<vmem>>, vector<1x64x128xf32>
      %211 = vector.shape_cast %210 : vector<1x64x128xf32> to vector<64x128xf32>
      %212 = vector.extract_strided_slice %151 {offsets = [7, 0], sizes = [1, 128], strides = [1, 1]} : vector<8x128xf32> to vector<1x128xf32>
      %213 = vector.broadcast %212 : vector<1x128xf32> to vector<64x128xf32>
      %214 = arith.mulf %213, %211 : vector<64x128xf32>
      %215 = arith.addf %199, %214 : vector<64x128xf32>
      scf.yield %207, %215 : vector<64x128xf32>, vector<64x128xf32>
    }
    %c8_i32_33 = arith.constant 8 : i32
    %42 = arith.addf %41#0, %41#1 : vector<64x128xf32>
    %43 = vector.extract_strided_slice %42 {offsets = [0, 0], sizes = [32, 128], strides = [1, 1]} : vector<64x128xf32> to vector<32x128xf32>
    %44 = arith.truncf %43 : vector<32x128xf32> to vector<32x128xbf16>
    %c0_34 = arith.constant 0 : index
    %c0_35 = arith.constant 0 : index
    %45 = vector.load %arg9[%c0_34, %c0_35] : memref<128x256xbf16, #tpu.memory_space<vmem>>, vector<128x256xbf16>
    %cst_36 = arith.constant dense<0.000000e+00> : vector<32x256xf32>
    %46 = tpu.matmul %44, %45, %cst_36 {dimension_numbers = #tpu.dot_dimension_numbers<[1], [0], [0], [1], [0, 0, 1, 1], [], []>} : vector<32x128xbf16>, vector<128x256xbf16>, vector<32x256xf32> -> vector<32x256xf32>
    %47 = vector.extract_strided_slice %42 {offsets = [32, 0], sizes = [32, 128], strides = [1, 1]} : vector<64x128xf32> to vector<32x128xf32>
    %48 = arith.truncf %47 : vector<32x128xf32> to vector<32x128xbf16>
    %c0_37 = arith.constant 0 : index
    %c0_38 = arith.constant 0 : index
    %49 = vector.load %arg10[%c0_37, %c0_38] : memref<128x256xbf16, #tpu.memory_space<vmem>>, vector<128x256xbf16>
    %cst_39 = arith.constant dense<0.000000e+00> : vector<32x256xf32>
    %50 = tpu.matmul %48, %49, %cst_39 {dimension_numbers = #tpu.dot_dimension_numbers<[1], [0], [0], [1], [0, 0, 1, 1], [], []>} : vector<32x128xbf16>, vector<128x256xbf16>, vector<32x256xf32> -> vector<32x256xf32>
    %51 = arith.addf %46, %50 : vector<32x256xf32>
    %c0_40 = arith.constant 0 : index
    %c0_41 = arith.constant 0 : index
    %52 = vector.load %arg13[%c0_40, %c0_41] : memref<32x32xf32, #tpu.memory_space<vmem>>, vector<32x32xf32>
    %cst_42 = arith.constant dense<0.000000e+00> : vector<32x256xf32>
    %53 = tpu.matmul %52, %8, %cst_42 {dimension_numbers = #tpu.dot_dimension_numbers<[1], [0], [0], [1], [0, 0, 1, 1], [], []>} : vector<32x32xf32>, vector<32x256xf32>, vector<32x256xf32> -> vector<32x256xf32>
    %c0_43 = arith.constant 0 : index
    %c0_44 = arith.constant 0 : index
    %54 = vector.load %arg14[%c0_43, %c0_44] : memref<32x1xf32, #tpu.memory_space<vmem>>, vector<32x1xf32>
    %55 = vector.broadcast %54 : vector<32x1xf32> to vector<32x256xf32>
    %56 = arith.addf %53, %55 : vector<32x256xf32>
    %57 = arith.addf %51, %56 : vector<32x256xf32>
    %cst_45 = arith.constant 5.000000e-01 : f32
    %58 = vector.broadcast %cst_45 : f32 to vector<32x256xf32>
    %59 = arith.mulf %58, %57 : vector<32x256xf32>
    %60 = arith.mulf %57, %57 : vector<32x256xf32>
    %61 = arith.mulf %60, %57 : vector<32x256xf32>
    %cst_46 = arith.constant 4.471500e-02 : f32
    %62 = vector.broadcast %cst_46 : f32 to vector<32x256xf32>
    %63 = arith.mulf %62, %61 : vector<32x256xf32>
    %64 = arith.addf %57, %63 : vector<32x256xf32>
    %cst_47 = arith.constant 0.797884583 : f32
    %65 = vector.broadcast %cst_47 : f32 to vector<32x256xf32>
    %66 = arith.mulf %65, %64 : vector<32x256xf32>
    %67 = math.tanh %66 : vector<32x256xf32>
    %cst_48 = arith.constant 1.000000e+00 : f32
    %68 = vector.broadcast %cst_48 : f32 to vector<32x256xf32>
    %69 = arith.addf %68, %67 : vector<32x256xf32>
    %70 = arith.mulf %59, %69 : vector<32x256xf32>
    %71 = arith.addf %31, %70 : vector<32x256xf32>
    %72 = math.tanh %71 : vector<32x256xf32>
    %c0_49 = arith.constant 0 : index
    %c0_50 = arith.constant 0 : index
    %73 = vector.load %arg16[%c0_49, %c0_50] : memref<32x32xf32, #tpu.memory_space<vmem>>, vector<32x32xf32>
    %cst_51 = arith.constant dense<0.000000e+00> : vector<32x256xf32>
    %74 = tpu.matmul %73, %71, %cst_51 {dimension_numbers = #tpu.dot_dimension_numbers<[1], [0], [0], [1], [0, 0, 1, 1], [], []>} : vector<32x32xf32>, vector<32x256xf32>, vector<32x256xf32> -> vector<32x256xf32>
    %c0_52 = arith.constant 0 : index
    %c0_53 = arith.constant 0 : index
    %75 = vector.load %arg17[%c0_52, %c0_53] : memref<32x1xf32, #tpu.memory_space<vmem>>, vector<32x1xf32>
    %76 = vector.broadcast %75 : vector<32x1xf32> to vector<32x256xf32>
    %77 = arith.addf %74, %76 : vector<32x256xf32>
    %cst_54 = arith.constant 5.000000e-01 : f32
    %78 = vector.broadcast %cst_54 : f32 to vector<32x256xf32>
    %79 = arith.mulf %78, %77 : vector<32x256xf32>
    %80 = arith.mulf %77, %77 : vector<32x256xf32>
    %81 = arith.mulf %80, %77 : vector<32x256xf32>
    %cst_55 = arith.constant 4.471500e-02 : f32
    %82 = vector.broadcast %cst_55 : f32 to vector<32x256xf32>
    %83 = arith.mulf %82, %81 : vector<32x256xf32>
    %84 = arith.addf %77, %83 : vector<32x256xf32>
    %cst_56 = arith.constant 0.797884583 : f32
    %85 = vector.broadcast %cst_56 : f32 to vector<32x256xf32>
    %86 = arith.mulf %85, %84 : vector<32x256xf32>
    %87 = math.tanh %86 : vector<32x256xf32>
    %cst_57 = arith.constant 1.000000e+00 : f32
    %88 = vector.broadcast %cst_57 : f32 to vector<32x256xf32>
    %89 = arith.addf %88, %87 : vector<32x256xf32>
    %90 = arith.mulf %79, %89 : vector<32x256xf32>
    %91 = arith.truncf %72 : vector<32x256xf32> to vector<32x256xbf16>
    %c0_58 = arith.constant 0 : index
    %c0_59 = arith.constant 0 : index
    %92 = vector.load %arg7[%c0_58, %c0_59] : memref<256x128xbf16, #tpu.memory_space<vmem>>, vector<256x128xbf16>
    %cst_60 = arith.constant dense<0.000000e+00> : vector<32x128xf32>
    %93 = tpu.matmul %91, %92, %cst_60 {dimension_numbers = #tpu.dot_dimension_numbers<[1], [0], [0], [1], [0, 0, 1, 1], [], []>} : vector<32x256xbf16>, vector<256x128xbf16>, vector<32x128xf32> -> vector<32x128xf32>
    %c0_61 = arith.constant 0 : index
    %c0_62 = arith.constant 0 : index
    %94 = vector.load %arg27[%c0_61, %c0_62] : memref<64x128xf32, #tpu.memory_space<vmem>>, vector<32x128xf32>
    tpu.vector_store %arg27[%c0_61, %c0_62], %93 {strides = array<i32>} : memref<64x128xf32, #tpu.memory_space<vmem>>, vector<32x128xf32>,
    %c0_63 = arith.constant 0 : index
    %c0_64 = arith.constant 0 : index
    %95 = vector.load %arg8[%c0_63, %c0_64] : memref<256x128xbf16, #tpu.memory_space<vmem>>, vector<256x128xbf16>
    %cst_65 = arith.constant dense<0.000000e+00> : vector<32x128xf32>
    %96 = tpu.matmul %91, %95, %cst_65 {dimension_numbers = #tpu.dot_dimension_numbers<[1], [0], [0], [1], [0, 0, 1, 1], [], []>} : vector<32x256xbf16>, vector<256x128xbf16>, vector<32x128xf32> -> vector<32x128xf32>
    %c32_66 = arith.constant 32 : index
    %c0_67 = arith.constant 0 : index
    %97 = vector.load %arg27[%c32_66, %c0_67] : memref<64x128xf32, #tpu.memory_space<vmem>>, vector<32x128xf32>
    tpu.vector_store %arg27[%c32_66, %c0_67], %96 {strides = array<i32>} : memref<64x128xf32, #tpu.memory_space<vmem>>, vector<32x128xf32>,
    %cst_68 = arith.constant 0.000000e+00 : f32
    %98 = vector.broadcast %cst_68 : f32 to vector<64x128xf32>
    %c0_i32_69 = arith.constant 0 : i32
    %c8_i32_70 = arith.constant 8 : i32
    %99 = arith.addi %c0_i32_69, %c8_i32_70 : i32
    %c1_i32_71 = arith.constant 1 : i32
    %100:2 = scf.for %arg28 = %c0_i32_69 to %99 step %c1_i32_71 iter_args(%arg29 = %98, %arg30 = %98) -> (vector<64x128xf32>, vector<64x128xf32>)  : i32 {
      %c8_i32_104 = arith.constant 8 : i32
      %148 = arith.muli %arg28, %c8_i32_104 : i32
      %149 = tpu.assume_multiple %148, 8 : i32
      %150 = arith.index_cast %149 : i32 to index
      %c0_105 = arith.constant 0 : index
      %151 = vector.load %arg27[%150, %c0_105] : memref<64x128xf32, #tpu.memory_space<vmem>>, vector<8x128xf32>
      %c0_i32_106 = arith.constant 0 : i32
      %152 = arith.addi %149, %c0_i32_106 : i32
      %153 = arith.index_cast %152 : i32 to index
      %c0_107 = arith.constant 0 : index
      %c0_108 = arith.constant 0 : index
      %154 = vector.load %arg20[%153, %c0_107, %c0_108] : memref<64x64x128xf32, #tpu.memory_space<vmem>>, vector<1x64x128xf32>
      %155 = vector.shape_cast %154 : vector<1x64x128xf32> to vector<64x128xf32>
      %156 = vector.extract_strided_slice %151 {offsets = [0, 0], sizes = [1, 128], strides = [1, 1]} : vector<8x128xf32> to vector<1x128xf32>
      %157 = vector.broadcast %156 : vector<1x128xf32> to vector<64x128xf32>
      %158 = arith.mulf %157, %155 : vector<64x128xf32>
      %159 = arith.addf %arg29, %158 : vector<64x128xf32>
      %c1_i32_109 = arith.constant 1 : i32
      %160 = arith.addi %149, %c1_i32_109 : i32
      %161 = arith.index_cast %160 : i32 to index
      %c0_110 = arith.constant 0 : index
      %c0_111 = arith.constant 0 : index
      %162 = vector.load %arg20[%161, %c0_110, %c0_111] : memref<64x64x128xf32, #tpu.memory_space<vmem>>, vector<1x64x128xf32>
      %163 = vector.shape_cast %162 : vector<1x64x128xf32> to vector<64x128xf32>
      %164 = vector.extract_strided_slice %151 {offsets = [1, 0], sizes = [1, 128], strides = [1, 1]} : vector<8x128xf32> to vector<1x128xf32>
      %165 = vector.broadcast %164 : vector<1x128xf32> to vector<64x128xf32>
      %166 = arith.mulf %165, %163 : vector<64x128xf32>
      %167 = arith.addf %arg30, %166 : vector<64x128xf32>
      %c2_i32 = arith.constant 2 : i32
      %168 = arith.addi %149, %c2_i32 : i32
      %169 = arith.index_cast %168 : i32 to index
      %c0_112 = arith.constant 0 : index
      %c0_113 = arith.constant 0 : index
      %170 = vector.load %arg20[%169, %c0_112, %c0_113] : memref<64x64x128xf32, #tpu.memory_space<vmem>>, vector<1x64x128xf32>
      %171 = vector.shape_cast %170 : vector<1x64x128xf32> to vector<64x128xf32>
      %172 = vector.extract_strided_slice %151 {offsets = [2, 0], sizes = [1, 128], strides = [1, 1]} : vector<8x128xf32> to vector<1x128xf32>
      %173 = vector.broadcast %172 : vector<1x128xf32> to vector<64x128xf32>
      %174 = arith.mulf %173, %171 : vector<64x128xf32>
      %175 = arith.addf %159, %174 : vector<64x128xf32>
      %c3_i32 = arith.constant 3 : i32
      %176 = arith.addi %149, %c3_i32 : i32
      %177 = arith.index_cast %176 : i32 to index
      %c0_114 = arith.constant 0 : index
      %c0_115 = arith.constant 0 : index
      %178 = vector.load %arg20[%177, %c0_114, %c0_115] : memref<64x64x128xf32, #tpu.memory_space<vmem>>, vector<1x64x128xf32>
      %179 = vector.shape_cast %178 : vector<1x64x128xf32> to vector<64x128xf32>
      %180 = vector.extract_strided_slice %151 {offsets = [3, 0], sizes = [1, 128], strides = [1, 1]} : vector<8x128xf32> to vector<1x128xf32>
      %181 = vector.broadcast %180 : vector<1x128xf32> to vector<64x128xf32>
      %182 = arith.mulf %181, %179 : vector<64x128xf32>
      %183 = arith.addf %167, %182 : vector<64x128xf32>
      %c4_i32 = arith.constant 4 : i32
      %184 = arith.addi %149, %c4_i32 : i32
      %185 = arith.index_cast %184 : i32 to index
      %c0_116 = arith.constant 0 : index
      %c0_117 = arith.constant 0 : index
      %186 = vector.load %arg20[%185, %c0_116, %c0_117] : memref<64x64x128xf32, #tpu.memory_space<vmem>>, vector<1x64x128xf32>
      %187 = vector.shape_cast %186 : vector<1x64x128xf32> to vector<64x128xf32>
      %188 = vector.extract_strided_slice %151 {offsets = [4, 0], sizes = [1, 128], strides = [1, 1]} : vector<8x128xf32> to vector<1x128xf32>
      %189 = vector.broadcast %188 : vector<1x128xf32> to vector<64x128xf32>
      %190 = arith.mulf %189, %187 : vector<64x128xf32>
      %191 = arith.addf %175, %190 : vector<64x128xf32>
      %c5_i32 = arith.constant 5 : i32
      %192 = arith.addi %149, %c5_i32 : i32
      %193 = arith.index_cast %192 : i32 to index
      %c0_118 = arith.constant 0 : index
      %c0_119 = arith.constant 0 : index
      %194 = vector.load %arg20[%193, %c0_118, %c0_119] : memref<64x64x128xf32, #tpu.memory_space<vmem>>, vector<1x64x128xf32>
      %195 = vector.shape_cast %194 : vector<1x64x128xf32> to vector<64x128xf32>
      %196 = vector.extract_strided_slice %151 {offsets = [5, 0], sizes = [1, 128], strides = [1, 1]} : vector<8x128xf32> to vector<1x128xf32>
      %197 = vector.broadcast %196 : vector<1x128xf32> to vector<64x128xf32>
      %198 = arith.mulf %197, %195 : vector<64x128xf32>
      %199 = arith.addf %183, %198 : vector<64x128xf32>
      %c6_i32 = arith.constant 6 : i32
      %200 = arith.addi %149, %c6_i32 : i32
      %201 = arith.index_cast %200 : i32 to index
      %c0_120 = arith.constant 0 : index
      %c0_121 = arith.constant 0 : index
      %202 = vector.load %arg20[%201, %c0_120, %c0_121] : memref<64x64x128xf32, #tpu.memory_space<vmem>>, vector<1x64x128xf32>
      %203 = vector.shape_cast %202 : vector<1x64x128xf32> to vector<64x128xf32>
      %204 = vector.extract_strided_slice %151 {offsets = [6, 0], sizes = [1, 128], strides = [1, 1]} : vector<8x128xf32> to vector<1x128xf32>
      %205 = vector.broadcast %204 : vector<1x128xf32> to vector<64x128xf32>
      %206 = arith.mulf %205, %203 : vector<64x128xf32>
      %207 = arith.addf %191, %206 : vector<64x128xf32>
      %c7_i32 = arith.constant 7 : i32
      %208 = arith.addi %149, %c7_i32 : i32
      %209 = arith.index_cast %208 : i32 to index
      %c0_122 = arith.constant 0 : index
      %c0_123 = arith.constant 0 : index
      %210 = vector.load %arg20[%209, %c0_122, %c0_123] : memref<64x64x128xf32, #tpu.memory_space<vmem>>, vector<1x64x128xf32>
      %211 = vector.shape_cast %210 : vector<1x64x128xf32> to vector<64x128xf32>
      %212 = vector.extract_strided_slice %151 {offsets = [7, 0], sizes = [1, 128], strides = [1, 1]} : vector<8x128xf32> to vector<1x128xf32>
      %213 = vector.broadcast %212 : vector<1x128xf32> to vector<64x128xf32>
      %214 = arith.mulf %213, %211 : vector<64x128xf32>
      %215 = arith.addf %199, %214 : vector<64x128xf32>
      scf.yield %207, %215 : vector<64x128xf32>, vector<64x128xf32>
    }
    %c8_i32_72 = arith.constant 8 : i32
    %101 = arith.addf %100#0, %100#1 : vector<64x128xf32>
    %102 = vector.extract_strided_slice %101 {offsets = [0, 0], sizes = [32, 128], strides = [1, 1]} : vector<64x128xf32> to vector<32x128xf32>
    %103 = arith.truncf %102 : vector<32x128xf32> to vector<32x128xbf16>
    %c0_73 = arith.constant 0 : index
    %c0_74 = arith.constant 0 : index
    %104 = vector.load %arg9[%c0_73, %c0_74] : memref<128x256xbf16, #tpu.memory_space<vmem>>, vector<128x256xbf16>
    %cst_75 = arith.constant dense<0.000000e+00> : vector<32x256xf32>
    %105 = tpu.matmul %103, %104, %cst_75 {dimension_numbers = #tpu.dot_dimension_numbers<[1], [0], [0], [1], [0, 0, 1, 1], [], []>} : vector<32x128xbf16>, vector<128x256xbf16>, vector<32x256xf32> -> vector<32x256xf32>
    %106 = vector.extract_strided_slice %101 {offsets = [32, 0], sizes = [32, 128], strides = [1, 1]} : vector<64x128xf32> to vector<32x128xf32>
    %107 = arith.truncf %106 : vector<32x128xf32> to vector<32x128xbf16>
    %c0_76 = arith.constant 0 : index
    %c0_77 = arith.constant 0 : index
    %108 = vector.load %arg10[%c0_76, %c0_77] : memref<128x256xbf16, #tpu.memory_space<vmem>>, vector<128x256xbf16>
    %cst_78 = arith.constant dense<0.000000e+00> : vector<32x256xf32>
    %109 = tpu.matmul %107, %108, %cst_78 {dimension_numbers = #tpu.dot_dimension_numbers<[1], [0], [0], [1], [0, 0, 1, 1], [], []>} : vector<32x128xbf16>, vector<128x256xbf16>, vector<32x256xf32> -> vector<32x256xf32>
    %110 = arith.addf %105, %109 : vector<32x256xf32>
    %c0_79 = arith.constant 0 : index
    %c0_80 = arith.constant 0 : index
    %111 = vector.load %arg18[%c0_79, %c0_80] : memref<32x32xf32, #tpu.memory_space<vmem>>, vector<32x32xf32>
    %cst_81 = arith.constant dense<0.000000e+00> : vector<32x256xf32>
    %112 = tpu.matmul %111, %72, %cst_81 {dimension_numbers = #tpu.dot_dimension_numbers<[1], [0], [0], [1], [0, 0, 1, 1], [], []>} : vector<32x32xf32>, vector<32x256xf32>, vector<32x256xf32> -> vector<32x256xf32>
    %c0_82 = arith.constant 0 : index
    %c0_83 = arith.constant 0 : index
    %113 = vector.load %arg19[%c0_82, %c0_83] : memref<32x1xf32, #tpu.memory_space<vmem>>, vector<32x1xf32>
    %114 = vector.broadcast %113 : vector<32x1xf32> to vector<32x256xf32>
    %115 = arith.addf %112, %114 : vector<32x256xf32>
    %116 = arith.addf %110, %115 : vector<32x256xf32>
    %cst_84 = arith.constant 5.000000e-01 : f32
    %117 = vector.broadcast %cst_84 : f32 to vector<32x256xf32>
    %118 = arith.mulf %117, %116 : vector<32x256xf32>
    %119 = arith.mulf %116, %116 : vector<32x256xf32>
    %120 = arith.mulf %119, %116 : vector<32x256xf32>
    %cst_85 = arith.constant 4.471500e-02 : f32
    %121 = vector.broadcast %cst_85 : f32 to vector<32x256xf32>
    %122 = arith.mulf %121, %120 : vector<32x256xf32>
    %123 = arith.addf %116, %122 : vector<32x256xf32>
    %cst_86 = arith.constant 0.797884583 : f32
    %124 = vector.broadcast %cst_86 : f32 to vector<32x256xf32>
    %125 = arith.mulf %124, %123 : vector<32x256xf32>
    %126 = math.tanh %125 : vector<32x256xf32>
    %cst_87 = arith.constant 1.000000e+00 : f32
    %127 = vector.broadcast %cst_87 : f32 to vector<32x256xf32>
    %128 = arith.addf %127, %126 : vector<32x256xf32>
    %129 = arith.mulf %118, %128 : vector<32x256xf32>
    %130 = arith.addf %90, %129 : vector<32x256xf32>
    %131 = math.tanh %130 : vector<32x256xf32>
    %c0_88 = arith.constant 0 : index
    %c0_89 = arith.constant 0 : index
    %132 = vector.load %arg21[%c0_88, %c0_89] : memref<16x32xf32, #tpu.memory_space<vmem>>, vector<16x32xf32>
    %cst_90 = arith.constant dense<0.000000e+00> : vector<16x256xf32>
    %133 = tpu.matmul %132, %131, %cst_90 {dimension_numbers = #tpu.dot_dimension_numbers<[1], [0], [0], [1], [0, 0, 1, 1], [], []>} : vector<16x32xf32>, vector<32x256xf32>, vector<16x256xf32> -> vector<16x256xf32>
    %c0_91 = arith.constant 0 : index
    %c0_92 = arith.constant 0 : index
    %134 = vector.load %arg22[%c0_91, %c0_92] : memref<16x1xf32, #tpu.memory_space<vmem>>, vector<16x1xf32>
    %135 = vector.broadcast %134 : vector<16x1xf32> to vector<16x256xf32>
    %136 = arith.addf %133, %135 : vector<16x256xf32>
    %c0_93 = arith.constant 0 : index
    %c0_94 = arith.constant 0 : index
    %c0_95 = arith.constant 0 : index
    %137 = vector.load %arg25[%c0_93, %c0_94, %c0_95] : memref<1x16x256xf32, #tpu.memory_space<vmem>>, vector<1x16x256xf32>
    %138 = vector.shape_cast %137 : vector<1x16x256xf32> to vector<16x256xf32>
    %139 = vector.shape_cast %136 : vector<16x256xf32> to vector<1x16x256xf32>
    tpu.vector_store %arg25[%c0_93, %c0_94, %c0_95], %139 {strides = array<i32>} : memref<1x16x256xf32, #tpu.memory_space<vmem>>, vector<1x16x256xf32>,
    %c0_96 = arith.constant 0 : index
    %c0_97 = arith.constant 0 : index
    %140 = vector.load %arg23[%c0_96, %c0_97] : memref<16x32xf32, #tpu.memory_space<vmem>>, vector<16x32xf32>
    %cst_98 = arith.constant dense<0.000000e+00> : vector<16x256xf32>
    %141 = tpu.matmul %140, %130, %cst_98 {dimension_numbers = #tpu.dot_dimension_numbers<[1], [0], [0], [1], [0, 0, 1, 1], [], []>} : vector<16x32xf32>, vector<32x256xf32>, vector<16x256xf32> -> vector<16x256xf32>
    %c0_99 = arith.constant 0 : index
    %c0_100 = arith.constant 0 : index
    %142 = vector.load %arg24[%c0_99, %c0_100] : memref<16x1xf32, #tpu.memory_space<vmem>>, vector<16x1xf32>
    %143 = vector.broadcast %142 : vector<16x1xf32> to vector<16x256xf32>
    %144 = arith.addf %141, %143 : vector<16x256xf32>
    %c0_101 = arith.constant 0 : index
    %c0_102 = arith.constant 0 : index
    %c0_103 = arith.constant 0 : index
    %145 = vector.load %arg26[%c0_101, %c0_102, %c0_103] : memref<1x16x256xf32, #tpu.memory_space<vmem>>, vector<1x16x256xf32>
    %146 = vector.shape_cast %145 : vector<1x16x256xf32> to vector<16x256xf32>
    %147 = vector.shape_cast %144 : vector<16x256xf32> to vector<1x16x256xf32>
    tpu.vector_store %arg26[%c0_101, %c0_102, %c0_103], %147 {strides = array<i32>} : memref<1x16x256xf32, #tpu.memory_space<vmem>>, vector<1x16x256xf32>,
    return
  }
  func.func @transform_0(%arg0: i32) -> (i32, i32, i32) {
    %c0_i32 = arith.constant 0 : i32
    %c0_i32_0 = arith.constant 0 : i32
    %c0_i32_1 = arith.constant 0 : i32
    return %arg0, %c0_i32, %c0_i32_0 : i32, i32, i32
  }
  func.func @transform_1(%arg0: i32) -> (i32, i32, i32) {
    %c0_i32 = arith.constant 0 : i32
    %c0_i32_0 = arith.constant 0 : i32
    %c0_i32_1 = arith.constant 0 : i32
    return %arg0, %c0_i32, %c0_i32_0 : i32, i32, i32
  }
  func.func @transform_2(%arg0: i32) -> (i32, i32) {
    %c0_i32 = arith.constant 0 : i32
    %c0_i32_0 = arith.constant 0 : i32
    %c0_i32_1 = arith.constant 0 : i32
    return %c0_i32, %c0_i32_0 : i32, i32
  }
  func.func @transform_3(%arg0: i32) -> (i32, i32) {
    %c0_i32 = arith.constant 0 : i32
    %c0_i32_0 = arith.constant 0 : i32
    %c0_i32_1 = arith.constant 0 : i32
    return %c0_i32, %c0_i32_0 : i32, i32
  }
  func.func @transform_4(%arg0: i32) -> (i32, i32) {
    %c0_i32 = arith.constant 0 : i32
    %c0_i32_0 = arith.constant 0 : i32
    %c0_i32_1 = arith.constant 0 : i32
    return %c0_i32, %c0_i32_0 : i32, i32
  }
  func.func @transform_5(%arg0: i32) -> (i32, i32) {
    %c0_i32 = arith.constant 0 : i32
    %c0_i32_0 = arith.constant 0 : i32
    %c0_i32_1 = arith.constant 0 : i32
    return %c0_i32, %c0_i32_0 : i32, i32
  }
  func.func @transform_6(%arg0: i32) -> (i32, i32) {
    %c0_i32 = arith.constant 0 : i32
    %c0_i32_0 = arith.constant 0 : i32
    %c0_i32_1 = arith.constant 0 : i32
    return %c0_i32, %c0_i32_0 : i32, i32
  }
  func.func @transform_7(%arg0: i32) -> (i32, i32) {
    %c0_i32 = arith.constant 0 : i32
    %c0_i32_0 = arith.constant 0 : i32
    %c0_i32_1 = arith.constant 0 : i32
    return %c0_i32, %c0_i32_0 : i32, i32
  }
  func.func @transform_8(%arg0: i32) -> (i32, i32) {
    %c0_i32 = arith.constant 0 : i32
    %c0_i32_0 = arith.constant 0 : i32
    %c0_i32_1 = arith.constant 0 : i32
    return %c0_i32, %c0_i32_0 : i32, i32
  }
  func.func @transform_9(%arg0: i32) -> (i32, i32) {
    %c0_i32 = arith.constant 0 : i32
    %c0_i32_0 = arith.constant 0 : i32
    %c0_i32_1 = arith.constant 0 : i32
    return %c0_i32, %c0_i32_0 : i32, i32
  }
  func.func @transform_10(%arg0: i32) -> (i32, i32) {
    %c0_i32 = arith.constant 0 : i32
    %c0_i32_0 = arith.constant 0 : i32
    %c0_i32_1 = arith.constant 0 : i32
    return %c0_i32, %c0_i32_0 : i32, i32
  }
  func.func @transform_11(%arg0: i32) -> (i32, i32) {
    %c0_i32 = arith.constant 0 : i32
    %c0_i32_0 = arith.constant 0 : i32
    %c0_i32_1 = arith.constant 0 : i32
    return %c0_i32, %c0_i32_0 : i32, i32
  }
  func.func @transform_12(%arg0: i32) -> (i32, i32) {
    %c0_i32 = arith.constant 0 : i32
    %c0_i32_0 = arith.constant 0 : i32
    %c0_i32_1 = arith.constant 0 : i32
    return %c0_i32, %c0_i32_0 : i32, i32
  }
  func.func @transform_13(%arg0: i32) -> (i32, i32) {
    %c0_i32 = arith.constant 0 : i32
    %c0_i32_0 = arith.constant 0 : i32
    %c0_i32_1 = arith.constant 0 : i32
    return %c0_i32, %c0_i32_0 : i32, i32
  }
  func.func @transform_14(%arg0: i32) -> (i32, i32, i32) {
    %c0_i32 = arith.constant 0 : i32
    %c0_i32_0 = arith.constant 0 : i32
    %c0_i32_1 = arith.constant 0 : i32
    %c0_i32_2 = arith.constant 0 : i32
    return %c0_i32, %c0_i32_0, %c0_i32_1 : i32, i32, i32
  }
  func.func @transform_15(%arg0: i32) -> (i32, i32) {
    %c0_i32 = arith.constant 0 : i32
    %c0_i32_0 = arith.constant 0 : i32
    %c0_i32_1 = arith.constant 0 : i32
    return %c0_i32, %c0_i32_0 : i32, i32
  }
  func.func @transform_16(%arg0: i32) -> (i32, i32) {
    %c0_i32 = arith.constant 0 : i32
    %c0_i32_0 = arith.constant 0 : i32
    %c0_i32_1 = arith.constant 0 : i32
    return %c0_i32, %c0_i32_0 : i32, i32
  }
  func.func @transform_17(%arg0: i32) -> (i32, i32) {
    %c0_i32 = arith.constant 0 : i32
    %c0_i32_0 = arith.constant 0 : i32
    %c0_i32_1 = arith.constant 0 : i32
    return %c0_i32, %c0_i32_0 : i32, i32
  }
  func.func @transform_18(%arg0: i32) -> (i32, i32) {
    %c0_i32 = arith.constant 0 : i32
    %c0_i32_0 = arith.constant 0 : i32
    %c0_i32_1 = arith.constant 0 : i32
    return %c0_i32, %c0_i32_0 : i32, i32
  }
  func.func @transform_19(%arg0: i32) -> (i32, i32, i32) {
    %c0_i32 = arith.constant 0 : i32
    %c0_i32_0 = arith.constant 0 : i32
    %c0_i32_1 = arith.constant 0 : i32
    %c0_i32_2 = arith.constant 0 : i32
    return %c0_i32, %c0_i32_0, %c0_i32_1 : i32, i32, i32
  }
  func.func @transform_20(%arg0: i32) -> (i32, i32) {
    %c0_i32 = arith.constant 0 : i32
    %c0_i32_0 = arith.constant 0 : i32
    %c0_i32_1 = arith.constant 0 : i32
    return %c0_i32, %c0_i32_0 : i32, i32
  }
  func.func @transform_21(%arg0: i32) -> (i32, i32) {
    %c0_i32 = arith.constant 0 : i32
    %c0_i32_0 = arith.constant 0 : i32
    %c0_i32_1 = arith.constant 0 : i32
    return %c0_i32, %c0_i32_0 : i32, i32
  }
  func.func @transform_22(%arg0: i32) -> (i32, i32) {
    %c0_i32 = arith.constant 0 : i32
    %c0_i32_0 = arith.constant 0 : i32
    %c0_i32_1 = arith.constant 0 : i32
    return %c0_i32, %c0_i32_0 : i32, i32
  }
  func.func @transform_23(%arg0: i32) -> (i32, i32) {
    %c0_i32 = arith.constant 0 : i32
    %c0_i32_0 = arith.constant 0 : i32
    %c0_i32_1 = arith.constant 0 : i32
    return %c0_i32, %c0_i32_0 : i32, i32
  }
  func.func @transform_24(%arg0: i32) -> (i32, i32, i32) {
    %c0_i32 = arith.constant 0 : i32
    %c0_i32_0 = arith.constant 0 : i32
    %c0_i32_1 = arith.constant 0 : i32
    return %arg0, %c0_i32, %c0_i32_0 : i32, i32, i32
  }
  func.func @transform_25(%arg0: i32) -> (i32, i32, i32) {
    %c0_i32 = arith.constant 0 : i32
    %c0_i32_0 = arith.constant 0 : i32
    %c0_i32_1 = arith.constant 0 : i32
    return %arg0, %c0_i32, %c0_i32_0 : i32, i32, i32
  }
}

</mosaic_0001>

<bundles_post_ra>
// kernel: tpu_custom_call.1
= control target key start
LH: loop header
LB: loop body
LE: loop exit
PB: predicated region body
PF: predicated region fallthrough
CT: control target
= control target key end

     0   :  { %s8510_s0 = inlined_call_operand.vmem [shape: f32[2,12,256], index: 0, kind: input, shape index: {}]   ;;  %s8511_s1 = inlined_call_operand.hbm [shape: f32[2,16,256], index: 1, kind: input, shape index: {}]   ;;  %s8512_s2 = inlined_call_operand.vmem [shape: f32[32,12], index: 2, kind: input, shape index: {}]   ;;  %s8513_s3 = inlined_call_operand.vmem [shape: f32[32,1], index: 3, kind: input, shape index: {}]   ;;  %s8514_s4 = inlined_call_operand.vmem [shape: f32[32,16], index: 4, kind: input, shape index: {}]   ;;  %s8515_s5 = inlined_call_operand.vmem [shape: f32[32,1], index: 5, kind: input, shape index: {}]   ;;  %s8516_s6 = inlined_call_operand.hbm [shape: bf16[256,128], index: 6, kind: input, shape index: {}]   ;;  %s8517_s7 = inlined_call_operand.hbm [shape: bf16[256,128], index: 7, kind: input, shape index: {}]   ;;  %s8518_s8 = inlined_call_operand.hbm [shape: bf16[128,256], index: 8, kind: input, shape index: {}]   ;;  %s8519_s9 = inlined_call_operand.hbm [shape: bf16[128,256], index: 9, kind: input, shape index: {}]   ;;  %s8520_s10 = inlined_call_operand.hbm [shape: f32[32,32], index: 10, kind: input, shape index: {}]   ;;  %s8521_s11 = inlined_call_operand.vmem [shape: f32[32,1], index: 11, kind: input, shape index: {}]   ;;  %s8522_s12 = inlined_call_operand.hbm [shape: f32[32,32], index: 12, kind: input, shape index: {}]   ;;  %s8523_s13 = inlined_call_operand.vmem [shape: f32[32,1], index: 13, kind: input, shape index: {}]   ;;  %s8524_s14 = inlined_call_operand.hbm [shape: f32[64,64,128], index: 14, kind: input, shape index: {}]   ;;  %s8525_s15 = inlined_call_operand.hbm [shape: f32[32,32], index: 15, kind: input, shape index: {}]   ;;  %s8526_s16 = inlined_call_operand.vmem [shape: f32[32,1], index: 16, kind: input, shape index: {}]   ;;  %s8527_s17 = inlined_call_operand.hbm [shape: f32[32,32], index: 17, kind: input, shape index: {}]   ;;  %s8528_s18 = inlined_call_operand.vmem [shape: f32[32,1], index: 18, kind: input, shape index: {}]   ;;  %s8529_s19 = inlined_call_operand.hbm [shape: f32[64,64,128], index: 19, kind: input, shape index: {}]   ;;  %s8530_s20 = inlined_call_operand.hbm [shape: f32[16,32], index: 20, kind: input, shape index: {}]   ;;  %s8531_s21 = inlined_call_operand.vmem [shape: f32[16,1], index: 21, kind: input, shape index: {}]   ;;  %s8532_s22 = inlined_call_operand.hbm [shape: f32[16,32], index: 22, kind: input, shape index: {}]   ;;  %s8533_s23 = inlined_call_operand.vmem [shape: f32[16,1], index: 23, kind: input, shape index: {}]   ;;  %s8534_s24 = inlined_call_operand.hbm [shape: f32[2,16,256], index: 24, kind: output, shape index: {0}]   ;;  %s8535_s25 = inlined_call_operand.hbm [shape: f32[2,16,256], index: 25, kind: output, shape index: {1}]  }
   0x1   :  { %8589 = sst [smem:[#allocation39_spill]] %s8510_s0 }
   0x2   :  { %8590 = sst [smem:[#allocation40_spill]] %s8511_s1 }
   0x3   :  { %8591 = sst [smem:[#allocation41_spill]] %s8512_s2 }
   0x4   :  { %8592 = sst [smem:[#allocation42_spill]] %s8513_s3 }
   0x5   :  { %8593 = sst [smem:[#allocation43_spill]] %s8514_s4 }
   0x6   :  { %8594 = sst [smem:[#allocation44_spill]] %s8515_s5 }
   0x7   :  { %8595 = sst [smem:[#allocation45_spill]] %s8516_s6 }
   0x8   :  { %8596 = sst [smem:[#allocation46_spill]] %s8517_s7 }
   0x9   :  { %8597 = sst [smem:[#allocation47_spill]] %s8518_s8 }
   0xa   :  { %8598 = sst [smem:[#allocation48_spill]] %s8519_s9 }
   0xb   :  { %8599 = sst [smem:[#allocation49_spill]] %s8520_s10 }
   0xc   :  { %8600 = sst [smem:[#allocation50_spill]] %s8521_s11 }
   0xd   :  { %8601 = sst [smem:[#allocation51_spill]] %s8522_s12 }
   0xe   :  { %8602 = sst [smem:[#allocation52_spill]] %s8523_s13 }
   0xf   :  { %8603 = sst [smem:[#allocation53_spill]] %s8524_s14 }
  0x10   :  { %8604 = sst [smem:[#allocation54_spill]] %s8526_s16 }
  0x11   :  { %8605 = sst [smem:[#allocation55_spill]] %s8528_s18 }
  0x12   :  { %8606 = sst [smem:[#allocation56_spill]] %s8531_s21 }
  0x13   :  { %8607 = sst [smem:[#allocation57_spill]] %s8533_s23 }
  0x14   :  { %8608 = sst [smem:[#allocation58_spill]] %s8534_s24 }
  0x15   :  { %8609 = sst [smem:[#allocation59_spill]] %s8535_s25 }
  0x16   :  { %31 = vsyncpa [#allocation4], 0 }
  0x17   :  { %33 = vsyncpa [#allocation4 + $0x1], 0 }
  0x18   :  { %34 = vsyncpa [#allocation7], 0 }
  0x19   :  { %35 = vsyncpa [#allocation10], 0 }
  0x1a   :  { %36 = vsyncpa [#allocation13], 0 }
  0x1b   :  { %37 = vsyncpa [#allocation16], 0 }
  0x1c   :  { %38 = vsyncpa [#allocation19], 0 }
  0x1d   :  { %39 = vsyncpa [#allocation22], 0 }
  0x1e   :  { %40 = vsyncpa [#allocation5], 0 }
  0x1f   :  { %42 = vsyncpa [#allocation5 + $0x1], 0 }
  0x20   :  { %43 = vsyncpa [#allocation26], 0 }
  0x21   :  { %45 = vsyncpa [#allocation26 + $0x1], 0  ;;  %s6840_s29 = smov 0   ;;  %s6842_s2 = smov 0  }
  0x22   :  { %s6844_s6 = smov 0   ;;  %s6846_s30 = smov 0  }
  0x23 LB: > { %s6684_s7 = smov [#allocation6]   ;;  %s6861_s26 = sadd.s32 4294967295, %s6546_s30   ;;  %s6546_s30 = sphi %s6846_s30, %s8746_s30   ;;  %s6542_s6 = sphi %s6844_s6, %s8745_s6   ;;  %s6538_s2 = sphi %s6842_s2, %s8744_s2   ;;  %s6534_s29 = sphi %s6840_s29, %s8743_s29  }
  0x24   : > { %s646_s3 = sshll.u32 %s6684_s7, 4  ;;  %p4652_p0 = scmp.ge.s32.totalorder %s6546_s30, 1  ;;  %s6866_s3 = int_to_ptr.vmem [resolvable:$true] %s646_s3 }
  0x25   : > { %p8555_p1 = scmp.eq.s32.totalorder %s6861_s26, 0  ;;  %p622_p2 = scmp.lt.s32.totalorder %s6546_s30, 3 }
  0x26   : > { %s6685_s8 = smov [#allocation9]   ;;  %s6686_s28 = smov [#allocation12]  }
  0x27   : > { %p6868_p3 = pnand %p4652_p0, %p622_p2  ;;  %s672_s27 = sshll.u32 %s6685_s8, 4  ;;  %s6881_s27 = int_to_ptr.vmem [resolvable:$true] %s672_s27 }
  0x28   : > { %s6883_s9 = sshll.u32 %s6686_s28, 4  ;;  %s8613_s7 = sld [smem:[#allocation45_spill]]  ;;  %s699_s9 = int_to_ptr.vmem [resolvable:$true] %s6883_s9 }
  0x29   : > { %s8610_s1 = scalar_select %p6868_p3, 1, 0 }
  0x2a   : > { %p5259_p5 = pneg %p6868_p3 }
  0x2b   : > { %8611 = sst [smem:[#allocation36_spill]] %s8610_s1 }
  0x2c   : > { %p6877_p6 = pnand %p5259_p5, %p8555_p1 }
  0x2e   : > { %s5922_s25 = scalar_lea.hbm %s8613_s7, 2048  ;;  %p6893_p8 = pneg %p6877_p6 }
  0x2f   : > { %p5923_p7 = scmp.ne.s32.totalorder %s8613_s7, %s5922_s25  ;;  %p5929_p11 = scmp.lt.u32.totalorder %s5922_s25, %s8613_s7 }
  0x31   : > { %p5925_p9 = pnand %p6893_p8, %p5923_p7 }
  0x33   : > { %p5926_p10 = pneg %p5925_p9 }
  0x35   : > { %p5931_p12 = pnand %p5929_p11, %p5926_p10 }
  0x37   : > { %5934 = shalt.err (!%p5931_p12)
}
  0x38   : > { %s5935_s23 = scalar_lea.vmem %s6866_s3, 2048  ;;  %p5943_p5 = scmp.lt.s32.totalorder %s6866_s3, %s6866_s3 }
  0x39   : > { %p5936_p13 = scmp.ne.s32.totalorder %s6866_s3, %s5935_s23  ;;  %p5944_p4 = scmp.lt.s32.totalorder %s5935_s23, %s5935_s23 }
  0x3b   : > { %p5938_p0 = pnand %p5936_p13, %p6893_p8  ;;  %p5945_p7 = por %p5944_p4, %p5943_p5 }
  0x3d   : > { %p5939_p2 = pneg %p5938_p0 }
  0x3f   : > { %p5946_p9 = pnand %p5945_p7, %p5939_p2 }
  0x41   : > { %5949 = shalt.err (!%p5946_p9)
}
  0x42   : > { %s8554_s24 = smov 64   ;;  %s8557_s21 = smov 4  }
  0x43   : > { %5262 = dma.hbm_to_vmem [thread:$0]  (!%p6877_p6), %s8613_s7, 2048, %s6866_s3, [#allocation7], %s8554_s24, %s8554_s24, %s8557_s21  }
  0x44   : > { %s8615_s18 = sld [smem:[#allocation47_spill]] }
  0x4a   : > { %s5950_s23 = scalar_lea.hbm %s8615_s18, 2048 }
  0x4b   : > { %p5951_p4 = scmp.ne.s32.totalorder %s8615_s18, %s5950_s23  ;;  %p5957_p12 = scmp.lt.u32.totalorder %s5950_s23, %s8615_s18 }
  0x4d   : > { %p5953_p10 = pnand %p5951_p4, %p6893_p8 }
  0x4f   : > { %p5954_p11 = pneg %p5953_p10 }
  0x51   : > { %p5959_p13 = pnand %p5957_p12, %p5954_p11 }
  0x53   : > { %5962 = shalt.err (!%p5959_p13)
}
  0x54   : > { %s5963_s3 = scalar_lea.vmem %s6881_s27, 2048  ;;  %p5971_p7 = scmp.lt.s32.totalorder %s6881_s27, %s6881_s27 }
  0x55   : > { %p5964_p0 = scmp.ne.s32.totalorder %s6881_s27, %s5963_s3  ;;  %p5972_p9 = scmp.lt.s32.totalorder %s5963_s3, %s5963_s3 }
  0x57   : > { %p5966_p2 = pnand %p5964_p0, %p6893_p8  ;;  %p5973_p4 = por %p5972_p9, %p5971_p7 }
  0x59   : > { %p5967_p5 = pneg %p5966_p2 }
  0x5b   : > { %p5974_p10 = pnand %p5973_p4, %p5967_p5 }
  0x5d   : > { %5977 = shalt.err (!%p5974_p10)
}
  0x5e   : > { %s8559_s13 = smov 128   ;;  %s8561_s11 = smov 8  }
  0x5f   : > { %5268 = dma.hbm_to_vmem [thread:$0]  (!%p6877_p6), %s8615_s18, 2048, %s6881_s27, [#allocation10], %s8559_s13, %s8559_s13, %s8561_s11  }
  0x60   : > { %s8616_s10 = sld [smem:[#allocation49_spill]] }
  0x66   : > { %s5978_s0 = scalar_lea.hbm %s8616_s10, 512 }
  0x67   : > { %p5979_p11 = scmp.ne.s32.totalorder %s8616_s10, %s5978_s0  ;;  %p5985_p0 = scmp.lt.u32.totalorder %s5978_s0, %s8616_s10 }
  0x69   : > { %p5981_p12 = pnand %p5979_p11, %p6893_p8 }
  0x6b   : > { %p5982_p13 = pneg %p5981_p12 }
  0x6d   : > { %p5987_p2 = pnand %p5985_p0, %p5982_p13 }
  0x6f   : > { %5990 = shalt.err (!%p5987_p2)
}
  0x70   : > { %s5991_s16 = scalar_lea.vmem %s699_s9, 512  ;;  %p5999_p4 = scmp.lt.s32.totalorder %s699_s9, %s699_s9 }
  0x71   : > { %p5992_p5 = scmp.ne.s32.totalorder %s699_s9, %s5991_s16  ;;  %p6000_p10 = scmp.lt.s32.totalorder %s5991_s16, %s5991_s16 }
  0x73   : > { %p5994_p7 = pnand %p5992_p5, %p6893_p8  ;;  %p6001_p1 = por %p6000_p10, %p5999_p4 }
  0x75   : > { %p5995_p9 = pneg %p5994_p7 }
  0x77   : > { %p6002_p3 = pnand %p6001_p1, %p5995_p9 }
  0x79   : > { %6005 = shalt.err (!%p6002_p3)
}
  0x7a   : > { %5274 = dma.hbm_to_vmem [thread:$0]  (!%p6877_p6), %s8616_s10, 512, %s699_s9, [#allocation13], %s8559_s13, %s8559_s13, %s8561_s11  }
  0x7b   : > { %s6691_s1 = smov [#allocation15]   ;;  %s6692_s5 = smov [#allocation18]  }
  0x7c   : > { %s730_s25 = sshll.u32 %s6691_s1, 4  ;;  %s759_s0 = sshll.u32 %s6692_s5, 4  ;;  %s731_s25 = int_to_ptr.vmem [resolvable:$true] %s730_s25  ;;  %s760_s0 = int_to_ptr.vmem [resolvable:$true] %s759_s0 }
  0x7d   : > { %s8617_s14 = sld [smem:[#allocation53_spill]] }
  0x83   : > { %s6006_s3 = scalar_lea.hbm %s8617_s14, 65536 }
  0x84   : > { %p6007_p1 = scmp.ne.s32.totalorder %s8617_s14, %s6006_s3  ;;  %p6013_p12 = scmp.lt.u32.totalorder %s6006_s3, %s8617_s14 }
  0x86   : > { %p6009_p3 = pnand %p6007_p1, %p6893_p8 }
  0x88   : > { %p6010_p11 = pneg %p6009_p3 }
  0x8a   : > { %p6015_p13 = pnand %p6013_p12, %p6010_p11 }
  0x8c   : > { %6018 = shalt.err (!%p6015_p13)
}
  0x8d   : > { %s6019_s9 = scalar_lea.vmem %s731_s25, 65536  ;;  %p6027_p7 = scmp.lt.s32.totalorder %s731_s25, %s731_s25 }
  0x8e   : > { %p6020_p0 = scmp.ne.s32.totalorder %s731_s25, %s6019_s9  ;;  %p6028_p9 = scmp.lt.s32.totalorder %s6019_s9, %s6019_s9 }
  0x90   : > { %p6022_p2 = pnand %p6020_p0, %p6893_p8  ;;  %p6029_p4 = por %p6028_p9, %p6027_p7 }
  0x92   : > { %p6023_p5 = pneg %p6022_p2 }
  0x94   : > { %p6030_p10 = pnand %p6029_p4, %p6023_p5 }
  0x96   : > { %6033 = shalt.err (!%p6030_p10)
}
  0x97   : > { %5280 = dma.hbm_to_vmem [thread:$0]  (!%p6877_p6), %s8617_s14, 65536, %s731_s25, [#allocation16], %s8559_s13, %s8559_s13, %s8561_s11  }
  0x98   : > { %s6034_s5 = scalar_lea.hbm %s8527_s17, 512 }
  0x99   : > { %p6035_p1 = scmp.ne.s32.totalorder %s8527_s17, %s6034_s5  ;;  %p6041_p12 = scmp.lt.u32.totalorder %s6034_s5, %s8527_s17 }
  0x9b   : > { %p6037_p3 = pnand %p6035_p1, %p6893_p8 }
  0x9d   : > { %p6038_p11 = pneg %p6037_p3 }
  0x9f   : > { %p6043_p13 = pnand %p6041_p12, %p6038_p11 }
  0xa1   : > { %6046 = shalt.err (!%p6043_p13)
}
  0xa2   : > { %s6047_s27 = scalar_lea.vmem %s760_s0, 512  ;;  %p6055_p7 = scmp.lt.s32.totalorder %s760_s0, %s760_s0 }
  0xa3   : > { %p6048_p0 = scmp.ne.s32.totalorder %s760_s0, %s6047_s27  ;;  %p6056_p9 = scmp.lt.s32.totalorder %s6047_s27, %s6047_s27 }
  0xa5   : > { %p6050_p2 = pnand %p6048_p0, %p6893_p8  ;;  %p6057_p4 = por %p6056_p9, %p6055_p7 }
  0xa7   : > { %p6051_p5 = pneg %p6050_p2 }
  0xa9   : > { %p6058_p10 = pnand %p6057_p4, %p6051_p5 }
  0xab   : > { %6061 = shalt.err (!%p6058_p10)
}
  0xac   : > { %5286 = dma.hbm_to_vmem [thread:$0]  (!%p6877_p6), %s8527_s17, 512, %s760_s0, [#allocation19], %s8559_s13, %s8559_s13, %s8561_s11  }
  0xad   : > { %s6693_s7 = smov [#allocation21]   ;;  %s6694_s24 = smov [#allocation8]  }
  0xae   : > { %s788_s21 = sshll.u32 %s6693_s7, 4  ;;  %s659_s1 = sshll.u32 %s6694_s24, 4  ;;  %s789_s21 = int_to_ptr.vmem [resolvable:$true] %s788_s21  ;;  %s660_s1 = int_to_ptr.vmem [resolvable:$true] %s659_s1 }
  0xaf   : > { %s6062_s23 = scalar_lea.hbm %s8530_s20, 256 }
  0xb0   : > { %p6063_p1 = scmp.ne.s32.totalorder %s8530_s20, %s6062_s23  ;;  %p6069_p12 = scmp.lt.u32.totalorder %s6062_s23, %s8530_s20 }
  0xb2   : > { %p6065_p3 = pnand %p6063_p1, %p6893_p8 }
  0xb4   : > { %p6066_p11 = pneg %p6065_p3 }
  0xb6   : > { %p6071_p13 = pnand %p6069_p12, %p6066_p11 }
  0xb8   : > { %6074 = shalt.err (!%p6071_p13)
}
  0xb9   : > { %s6075_s0 = scalar_lea.vmem %s789_s21, 256  ;;  %p6083_p7 = scmp.lt.s32.totalorder %s789_s21, %s789_s21 }
  0xba   : > { %p6076_p0 = scmp.ne.s32.totalorder %s789_s21, %s6075_s0  ;;  %p6084_p9 = scmp.lt.s32.totalorder %s6075_s0, %s6075_s0 }
  0xbc   : > { %p6078_p2 = pnand %p6076_p0, %p6893_p8  ;;  %p6085_p4 = por %p6084_p9, %p6083_p7 }
  0xbe   : > { %p6079_p5 = pneg %p6078_p2 }
  0xc0   : > { %p6086_p10 = pnand %p6085_p4, %p6079_p5 }
  0xc2   : > { %6089 = shalt.err (!%p6086_p10)
}
  0xc3   : > { %5292 = dma.hbm_to_vmem [thread:$0]  (!%p6877_p6), %s8530_s20, 256, %s789_s21, [#allocation22], %s8559_s13, %s8559_s13, %s8561_s11  }
  0xc4   : > { %s8618_s28 = sld [smem:[#allocation46_spill]] }
  0xca   : > { %s6090_s23 = scalar_lea.hbm %s8618_s28, 2048 }
  0xcb   : > { %p6091_p1 = scmp.ne.s32.totalorder %s8618_s28, %s6090_s23  ;;  %p6097_p12 = scmp.lt.u32.totalorder %s6090_s23, %s8618_s28 }
  0xcd   : > { %p6093_p3 = pnand %p6091_p1, %p6893_p8 }
  0xcf   : > { %p6094_p11 = pneg %p6093_p3 }
  0xd1   : > { %p6099_p13 = pnand %p6097_p12, %p6094_p11 }
  0xd3   : > { %6102 = shalt.err (!%p6099_p13)
}
  0xd4   : > { %s6103_s0 = scalar_lea.vmem %s660_s1, 2048  ;;  %p6111_p7 = scmp.lt.s32.totalorder %s660_s1, %s660_s1 }
  0xd5   : > { %p6104_p0 = scmp.ne.s32.totalorder %s660_s1, %s6103_s0  ;;  %p6112_p9 = scmp.lt.s32.totalorder %s6103_s0, %s6103_s0 }
  0xd7   : > { %p6106_p2 = pnand %p6104_p0, %p6893_p8  ;;  %p6113_p4 = por %p6112_p9, %p6111_p7 }
  0xd9   : > { %p6107_p5 = pneg %p6106_p2 }
  0xdb   : > { %p6114_p10 = pnand %p6113_p4, %p6107_p5 }
  0xdd   : > { %6117 = shalt.err (!%p6114_p10)
}
  0xde   : > { %s8619_s21 = smov 4   ;;  %s8620_s9 = smov 64  }
  0xdf   : > { %5265 = dma.hbm_to_vmem [thread:$0]  (!%p6877_p6), %s8618_s28, 2048, %s660_s1, [#allocation7], %s8620_s9, %s8620_s9, %s8619_s21  }
  0xe0   : > { %s6695_s5 = smov [#allocation11]   ;;  %s6696_s3 = smov [#allocation14]  }
  0xe1   : > { %s685_s23 = sshll.u32 %s6695_s5, 4  ;;  %s714_s16 = sshll.u32 %s6696_s3, 4  ;;  %s686_s23 = int_to_ptr.vmem [resolvable:$true] %s685_s23  ;;  %s715_s16 = int_to_ptr.vmem [resolvable:$true] %s714_s16 }
  0xe2   : > { %s8621_s0 = sld [smem:[#allocation48_spill]] }
  0xe8   : > { %s6118_s13 = scalar_lea.hbm %s8621_s0, 2048 }
  0xe9   : > { %p6119_p1 = scmp.ne.s32.totalorder %s8621_s0, %s6118_s13  ;;  %p6125_p12 = scmp.lt.u32.totalorder %s6118_s13, %s8621_s0 }
  0xeb   : > { %p6121_p3 = pnand %p6119_p1, %p6893_p8 }
  0xed   : > { %p6122_p11 = pneg %p6121_p3 }
  0xef   : > { %p6127_p13 = pnand %p6125_p12, %p6122_p11 }
  0xf1   : > { %6130 = shalt.err (!%p6127_p13)
}
  0xf2   : > { %s6131_s1 = scalar_lea.vmem %s686_s23, 2048  ;;  %p6139_p7 = scmp.lt.s32.totalorder %s686_s23, %s686_s23 }
  0xf3   : > { %p6132_p0 = scmp.ne.s32.totalorder %s686_s23, %s6131_s1  ;;  %p6140_p9 = scmp.lt.s32.totalorder %s6131_s1, %s6131_s1 }
  0xf5   : > { %p6134_p2 = pnand %p6132_p0, %p6893_p8  ;;  %p6141_p4 = por %p6140_p9, %p6139_p7 }
  0xf7   : > { %p6135_p5 = pneg %p6134_p2 }
  0xf9   : > { %p6142_p10 = pnand %p6141_p4, %p6135_p5 }
  0xfb   : > { %6145 = shalt.err (!%p6142_p10)
}
  0xfc   : > { %s8622_s10 = smov 8   ;;  %s8623_s11 = smov 128  }
  0xfd   : > { %5271 = dma.hbm_to_vmem [thread:$0]  (!%p6877_p6), %s8621_s0, 2048, %s686_s23, [#allocation10], %s8623_s11, %s8623_s11, %s8622_s10  }
  0xfe   : > { %s8624_s12 = sld [smem:[#allocation51_spill]] }
 0x104   : > { %s6146_s24 = scalar_lea.hbm %s8624_s12, 512 }
 0x105   : > { %p6147_p1 = scmp.ne.s32.totalorder %s8624_s12, %s6146_s24  ;;  %p6153_p12 = scmp.lt.u32.totalorder %s6146_s24, %s8624_s12 }
 0x107   : > { %p6149_p3 = pnand %p6147_p1, %p6893_p8 }
 0x109   : > { %p6150_p11 = pneg %p6149_p3 }
 0x10b   : > { %p6155_p13 = pnand %p6153_p12, %p6150_p11 }
 0x10d   : > { %6158 = shalt.err (!%p6155_p13)
}
 0x10e   : > { %s6159_s7 = scalar_lea.vmem %s715_s16, 512  ;;  %p6167_p7 = scmp.lt.s32.totalorder %s715_s16, %s715_s16 }
 0x10f   : > { %p6160_p0 = scmp.ne.s32.totalorder %s715_s16, %s6159_s7  ;;  %p6168_p9 = scmp.lt.s32.totalorder %s6159_s7, %s6159_s7 }
 0x111   : > { %p6162_p2 = pnand %p6160_p0, %p6893_p8  ;;  %p6169_p4 = por %p6168_p9, %p6167_p7 }
 0x113   : > { %p6163_p5 = pneg %p6162_p2 }
 0x115   : > { %p6170_p10 = pnand %p6169_p4, %p6163_p5 }
 0x117   : > { %6173 = shalt.err (!%p6170_p10)
}
 0x118   : > { %5277 = dma.hbm_to_vmem [thread:$0]  (!%p6877_p6), %s8624_s12, 512, %s715_s16, [#allocation13], %s8623_s11, %s8623_s11, %s8622_s10  }
 0x119   : > { %s6697_s14 = smov [#allocation17]   ;;  %s6698_s21 = smov [#allocation20]  }
 0x11a   : > { %s743_s13 = sshll.u32 %s6697_s14, 4  ;;  %s775_s9 = sshll.u32 %s6698_s21, 4  ;;  %s744_s13 = int_to_ptr.vmem [resolvable:$true] %s743_s13  ;;  %s776_s9 = int_to_ptr.vmem [resolvable:$true] %s775_s9 }
 0x11b   : > { %s6174_s3 = scalar_lea.hbm %s8525_s15, 512 }
 0x11c   : > { %p6175_p1 = scmp.ne.s32.totalorder %s8525_s15, %s6174_s3  ;;  %p6181_p12 = scmp.lt.u32.totalorder %s6174_s3, %s8525_s15 }
 0x11e   : > { %p6177_p3 = pnand %p6175_p1, %p6893_p8 }
 0x120   : > { %p6178_p11 = pneg %p6177_p3 }
 0x122   : > { %p6183_p13 = pnand %p6181_p12, %p6178_p11 }
 0x124   : > { %6186 = shalt.err (!%p6183_p13)
}
 0x125   : > { %s6187_s16 = scalar_lea.vmem %s744_s13, 512  ;;  %p6195_p7 = scmp.lt.s32.totalorder %s744_s13, %s744_s13 }
 0x126   : > { %p6188_p0 = scmp.ne.s32.totalorder %s744_s13, %s6187_s16  ;;  %p6196_p9 = scmp.lt.s32.totalorder %s6187_s16, %s6187_s16 }
 0x128   : > { %p6190_p2 = pnand %p6188_p0, %p6893_p8  ;;  %p6197_p4 = por %p6196_p9, %p6195_p7 }
 0x12a   : > { %p6191_p5 = pneg %p6190_p2 }
 0x12c   : > { %p6198_p10 = pnand %p6197_p4, %p6191_p5 }
 0x12e   : > { %6201 = shalt.err (!%p6198_p10)
}
 0x12f   : > { %5283 = dma.hbm_to_vmem [thread:$0]  (!%p6877_p6), %s8525_s15, 512, %s744_s13, [#allocation16], %s8623_s11, %s8623_s11, %s8622_s10  }
 0x130   : > { %s6202_s5 = scalar_lea.hbm %s8529_s19, 65536 }
 0x131   : > { %p6203_p1 = scmp.ne.s32.totalorder %s8529_s19, %s6202_s5  ;;  %p6209_p12 = scmp.lt.u32.totalorder %s6202_s5, %s8529_s19 }
 0x133   : > { %p6205_p3 = pnand %p6203_p1, %p6893_p8 }
 0x135   : > { %p6206_p11 = pneg %p6205_p3 }
 0x137   : > { %p6211_p13 = pnand %p6209_p12, %p6206_p11 }
 0x139   : > { %6214 = shalt.err (!%p6211_p13)
}
 0x13a   : > { %s6215_s23 = scalar_lea.vmem %s776_s9, 65536  ;;  %p6223_p7 = scmp.lt.s32.totalorder %s776_s9, %s776_s9 }
 0x13b   : > { %p6216_p0 = scmp.ne.s32.totalorder %s776_s9, %s6215_s23  ;;  %p6224_p9 = scmp.lt.s32.totalorder %s6215_s23, %s6215_s23 }
 0x13d   : > { %p6218_p2 = pnand %p6216_p0, %p6893_p8  ;;  %p6225_p4 = por %p6224_p9, %p6223_p7 }
 0x13f   : > { %p6219_p5 = pneg %p6218_p2 }
 0x141   : > { %p6226_p10 = pnand %p6225_p4, %p6219_p5 }
 0x143   : > { %6229 = shalt.err (!%p6226_p10)
}
 0x144   : > { %5289 = dma.hbm_to_vmem [thread:$0]  (!%p6877_p6), %s8529_s19, 65536, %s776_s9, [#allocation19], %s8623_s11, %s8623_s11, %s8622_s10  }
 0x145   : > { %s6699_s1 = smov [#allocation23]   ;;  %s6230_s5 = scalar_lea.hbm %s8532_s22, 256 }
 0x146   : > { %s804_s14 = sshll.u32 %s6699_s1, 4  ;;  %p6231_p1 = scmp.ne.s32.totalorder %s8532_s22, %s6230_s5  ;;  %s805_s14 = int_to_ptr.vmem [resolvable:$true] %s804_s14 }
 0x147   : > { %p6237_p12 = scmp.lt.u32.totalorder %s6230_s5, %s8532_s22 }
 0x148   : > { %p6233_p3 = pnand %p6231_p1, %p6893_p8 }
 0x14a   : > { %p6234_p11 = pneg %p6233_p3 }
 0x14c   : > { %p6239_p13 = pnand %p6237_p12, %p6234_p11 }
 0x14e   : > { %6242 = shalt.err (!%p6239_p13)
}
 0x14f   : > { %s6243_s9 = scalar_lea.vmem %s805_s14, 256  ;;  %p6251_p7 = scmp.lt.s32.totalorder %s805_s14, %s805_s14 }
 0x150   : > { %p6244_p0 = scmp.ne.s32.totalorder %s805_s14, %s6243_s9  ;;  %p6252_p9 = scmp.lt.s32.totalorder %s6243_s9, %s6243_s9 }
 0x152   : > { %p6246_p2 = pnand %p6244_p0, %p6893_p8  ;;  %p6253_p4 = por %p6252_p9, %p6251_p7 }
 0x154   : > { %p6247_p5 = pneg %p6246_p2 }
 0x156   : > { %p6254_p10 = pnand %p6253_p4, %p6247_p5 }
 0x158   : > { %6257 = shalt.err (!%p6254_p10)
}
 0x159   : > { %5295 = dma.hbm_to_vmem [thread:$0]  (!%p6877_p6), %s8532_s22, 256, %s805_s14, [#allocation22], %s8623_s11, %s8623_s11, %s8622_s10  }
 0x15a   : > { %s4651_s4 = sadd.s32 4294967294, %s6546_s30   ;;  %s7156_s8 = sadd.s32 1, %s6546_s30  }
 0x15b   : > { %s81_s16 = ssub.s32 %s6546_s30, %s7156_s8  ;;  %s84_s1 = sadd.s32 1, %s6542_s6 }
 0x15c   : > { %p82_p8 = scmp.eq.s32.totalorder %s81_s16, 0  ;;  %p91_p1 = scmp.ne.s32.totalorder %s6542_s6, %s6538_s2 }
 0x15d   : > { %p92_p3 = scmp.eq.s32.totalorder %s6546_s30, 0  ;;  %p97_p11 = scmp.ne.s32.totalorder %s6538_s2, %s6534_s29 }
 0x15e   : > { %s7167_s21 = scalar_select %p82_p8, %s6542_s6, %s84_s1  }
 0x15f   : > { %p7169_p12 = por %p92_p3, %p91_p1  ;;  %p8626_p13 = scmp.eq.s32.totalorder %s6861_s26, 0 }
 0x160   : > { %p583_p0 = scmp.eq.s32.totalorder %s6861_s26, 1  ;;  %p589_p2 = scmp.eq.s32.totalorder %s4651_s4, 1 }
 0x161   : > { %p7175_p6 = por %p8626_p13, %p97_p11  ;;  %p5319_p5 = scmp.lt.s32.totalorder %s6546_s30, 2 }
 0x162   : > { %s829_s11 = sand.u32 1, %s6542_s6   ;;  %p7182_p7 = por %p583_p0, %p91_p1 }
 0x163   : > { %p7186_p9 = por %p589_p2, %p97_p11  ;;  %s4666_s3 = sshll.u32 %s829_s11, 5 }
 0x164   : > { %s8628_s14 = scalar_select %p7182_p7, 1, 0 }
 0x165   : > { %s8629_s5 = scalar_select %p7186_p9, 1, 0 }
 0x166   : > { %s4997_s27 = sshll.u32 %s6546_s30, 9  ;;  %s8630_s9 = sld [smem:[#allocation40_spill]] }
 0x167   : > { %s833_s13 = scalar_lea.vmem [#allocation3], %s4666_s3  ;;  %p7200_p4 = pnand %p5319_p5, %p7169_p12 }
 0x168   : > { %s840_s4 = sshll.u32 %s833_s13, 4  ;;  %s7204_s1 = scalar_lea.sflag [#allocation4], %s829_s11  ;;  %s7196_s4 = int_to_ptr.vmem [resolvable:$true] %s840_s4 }
 0x169   : > { %p6260_p8 = pneg %p7200_p4 }
 0x16c   : > { %s7194_s23 = scalar_lea.hbm %s8630_s9, %s4997_s27  ;;  %s6263_s24 = scalar_lea.hbm %s8630_s9, 1024 }
 0x16d   : > { %s6258_s25 = scalar_lea.hbm %s7194_s23, 512  ;;  %p6264_p11 = scmp.lt.u32.totalorder %s7194_s23, %s8630_s9 }
 0x16e   : > { %p6259_p10 = scmp.ne.s32.totalorder %s7194_s23, %s6258_s25  ;;  %p6265_p12 = scmp.lt.u32.totalorder %s6263_s24, %s6258_s25 }
 0x16f   : > { %p6267_p0 = scmp.lt.u32.totalorder %s6258_s25, %s7194_s23 }
 0x170   : > { %p6261_p1 = pnand %p6260_p8, %p6259_p10  ;;  %p6266_p13 = por %p6265_p12, %p6264_p11 }
 0x172   : > { %p6262_p3 = pneg %p6261_p1  ;;  %p6268_p2 = por %p6267_p0, %p6266_p13 }
 0x174   : > { %p6269_p5 = pnand %p6268_p2, %p6262_p3 }
 0x176   : > { %6272 = shalt.err (!%p6269_p5)
}
 0x177   : > { %s6273_s11 = scalar_lea.vmem %s7196_s4, 512  ;;  %s6700_s3 = smov [#allocation3]  }
 0x178   : > { %p6274_p10 = scmp.ne.s32.totalorder %s7196_s4, %s6273_s11  ;;  %s6278_s27 = sshll.u32 %s6700_s3, 4  ;;  %s6279_s27 = int_to_ptr.vmem [resolvable:$false] %s6278_s27 }
 0x179   : > { %s6280_s7 = scalar_lea.vmem %s6279_s27, 1024  ;;  %p6281_p7 = scmp.lt.s32.totalorder %s7196_s4, %s6279_s27 }
 0x17a   : > { %p6276_p1 = pnand %p6274_p10, %p6260_p8  ;;  %p6282_p11 = scmp.lt.s32.totalorder %s6280_s7, %s6273_s11 }
 0x17c   : > { %p6277_p9 = pneg %p6276_p1  ;;  %p6283_p12 = por %p6282_p11, %p6281_p7 }
 0x17e   : > { %p6284_p13 = pnand %p6283_p12, %p6277_p9 }
 0x180   : > { %6287 = shalt.err (!%p6284_p13)
}
 0x181   : > { %s6701_s25 = smov 256   ;;  %s6702_s24 = smov 16  }
 0x182   : > { %5299 = dma.hbm_to_vmem [thread:$0]  (!%p7200_p4), %s7194_s23, 512, %s7196_s4, %s7204_s1, %s6701_s25, %s6701_s25, %s6702_s24  }
 0x183   : > { %s8632_s13 = sld [smem:[#allocation36_spill]] }
 0x189   : > { %p8633_p8 = scmp.ne.s32.totalorder %s8632_s13, 0 }
 0x18b   : > { %852 = sbr.rel (%p8633_p8) target bundleno = 2199 (0x897), region = 116 }
 0x192   : > { %s7235_s3 = sand.u32 1, %s6538_s2  }
 0x193   : > { %s7238_s11 = sshll.u32 %s7235_s3, 5  ;;  %s855_s27 = scalar_lea.sflag [#allocation4], %s7235_s3 }
 0x194   : > { %s7242_s7 = scalar_lea.vmem [#allocation3], %s7238_s11 }
 0x195   : > { %6497 = dma.done.wait (%p7175_p6), %s855_s27, 512  }
 0x196   : > { %6499 = vsyncadd (%p7175_p6), %s855_s27, 4294966784  ;;  %p8634_p7 = scmp.eq.s32.totalorder %s6861_s26, 0 }
 0x198   : > { %6501 = dma.done.wait (%p8634_p7), [#allocation7], 4096   ;;  %p8635_p9 = pmov %p8634_p7 }
 0x199   : > { %p8636_p4 = pmov %p8634_p7 }
 0x19a   : > { %6503 = vsyncadd (%p8635_p9), [#allocation7], 4294963200 }
 0x19b   : > { %6505 = dma.done.wait (%p8636_p4), [#allocation10], 4096   ;;  %p8637_p3 = pmov %p8636_p4 }
 0x19d   : > { %6507 = vsyncadd (%p8637_p3), [#allocation10], 4294963200  ;;  %p8638_p0 = pmov %p8637_p3 }
 0x19f   : > { %6509 = dma.done.wait (%p8638_p0), [#allocation13], 1024   ;;  %p8639_p2 = pmov %p8638_p0 }
 0x1a0   : > { %p8640_p6 = pmov %p8638_p0 }
 0x1a1   : > { %6511 = vsyncadd (%p8639_p2), [#allocation13], 4294966272 }
 0x1a2   : > { %6513 = dma.done.wait (%p8640_p6), [#allocation16], 66048   ;;  %p8641_p5 = pmov %p8638_p0 }
 0x1a3   : > { %p8642_p10 = pmov %p8638_p0 }
 0x1a4   : > { %6515 = vsyncadd (%p8641_p5), [#allocation16], 4294901248 }
 0x1a5   : > { %6517 = dma.done.wait (%p8642_p10), [#allocation19], 66048   ;;  %p8643_p1 = pmov %p8638_p0 }
 0x1a6   : > { %p8644_p11 = pmov %p8638_p0 }
 0x1a7   : > { %6519 = vsyncadd (%p8643_p1), [#allocation19], 4294901248 }
 0x1a8   : > { %6521 = dma.done.wait (%p8644_p11), [#allocation22], 512   ;;  %p8645_p12 = pmov %p8638_p0 }
 0x1a9   : > { %p983_p13 = scmp.lt.s32.totalorder %s6861_s26, 1  ;;  %v8572_v0 = vmov 0.0   ;;  %vm1038_vm0 = vcmask 1043456   ;;  %v8575_v1 = vmov 0   ;;  %s8646_s1 = sld [smem:[#allocation39_spill]]  ;;  %vm6705_vm1 = vmmov 1  }
 0x1aa   : > { %6523 = vsyncadd (%p8645_p12), [#allocation22], 4294966784  ;;  %1109 = vmatprep.mubr.f32.mxu0 %v8572_v0  ;;  %1121 = vmatprep.mubr.f32.mxu1 %v8572_v0  ;;  %v994_v8 = vld [vmem:[%s7242_s7 + $0x8] sm:$0xff]  ;;  %v996_v9 = vld [vmem:[%s7242_s7 + $0x18] sm:$0xff]  ;;  %s8647_s27 = sld [smem:[#allocation41_spill]]  ;;  %vm1025_vm3 = vcmask 97280  }
 0x1ab   : > { %s984_s10 = scalar_select %p983_p13, %s6861_s26, 1  ;;  %5660 = vset.pattern.permute.xlu0 %v8575_v1  ;;  %5661 = vset.pattern.permute.xlu1 %v8575_v1  ;;  %vm5130_vm2 = vmpackc.low %vm1038_vm0, %vm6705_vm1  ;;  %v993_v10 = vld [vmem:[%s7242_s7] sm:$0xff]  ;;  %v5135_v11 = vpack.c.bf16 %v996_v9, %v994_v8  ;;  %v995_v12 = vld [vmem:[%s7242_s7 + $0x10] sm:$0xff]  ;;  %vm1162_vm4 = vcmask 130048   ;;  %vm1292_vm5 = vcmask 261120  }
 0x1ac   : > { %v5137_v15 = vpack.c.bf16 %v995_v12, %v993_v10  ;;  %s8649_s24 = sld [smem:[#allocation42_spill]]  ;;  %v5662_v24 = vld [vmem:[#allocation6 + $0x40] sm:$0xff]   ;;  %v5664_v27 = vld [vmem:[#allocation6 + $0x48] sm:$0xff]   ;;  %v5666_v33 = vld [vmem:[#allocation6 + $0x50] sm:$0xff]   ;;  %s7435_s16 = scalar_lea.vmem [#allocation24], %s7238_s11 }
 0x1ad   : > { %s4998_s23 = sshll.u32 %s984_s10, 5  ;;  %s8650_s10 = sld [smem:[#allocation43_spill]]  ;;  %v5663_v26 = vld [vmem:[#allocation6] sm:$0xff]   ;;  %v5665_v31 = vld [vmem:[#allocation6 + $0x8] sm:$0xff]   ;;  %v5667_v36 = vld [vmem:[#allocation6 + $0x10] sm:$0xff]  }
 0x1ae   : > { %s8651_s9 = sld [smem:[#allocation50_spill]]  ;;  %v5668_v37 = vld [vmem:[#allocation6 + $0x58] sm:$0xff]   ;;  %v5670_v42 = vld [vmem:[#allocation6 + $0x60] sm:$0xff]   ;;  %v5672_v44 = vld [vmem:[#allocation6 + $0x68] sm:$0xff]  }
 0x1af   : > { %s987_s25 = scalar_lea.vmem %s8646_s1, %s4998_s23  ;;  %s8648_s1 = sld [smem:[#allocation44_spill]]  ;;  %v5669_v41 = vld [vmem:[#allocation6 + $0x18] sm:$0xff]   ;;  %v5671_v43 = vld [vmem:[#allocation6 + $0x20] sm:$0xff]   ;;  %v5673_v45 = vld [vmem:[#allocation6 + $0x28] sm:$0xff]  }
 0x1b0   : > { %v990_v2 = vld [vmem:[%s987_s25 + $0x8] sm:$0xff]  ;;  %v992_v3 = vld [vmem:[%s987_s25 + $0x18] sm:$0xf]  ;;  %v989_v4 = vld [vmem:[%s987_s25] sm:$0xff] }
 0x1b1   : > { %v5129_v5 = vpack.c.bf16 %v992_v3, %v990_v2  ;;  %v991_v6 = vld [vmem:[%s987_s25 + $0x10] sm:$0xf]  ;;  %v997_v13 = vld [vmem:[%s8647_s27] sm:$0xff]  ;;  %v998_v20 = vld [vmem:[%s8647_s27 + $0x8] sm:$0xff]  ;;  %s7438_s25 = scalar_lea.vmem [#allocation25], %s7238_s11  ;;  %s7472_s11 = smov 0  }
 0x1b2   : > { %v5132_v7 = vpack.c.bf16 %v991_v6, %v989_v4  ;;  %v999_v14 = vld [vmem:[%s8647_s27 + $0x10] sm:$0xff]  ;;  %v1000_v21 = vld [vmem:[%s8647_s27 + $0x18] sm:$0xff]  ;;  %v1001_v22 = vld [vmem:[%s8649_s24] sm:$0xff] }
 0x1b3   : > { %5131 = vmatprep.subr.msk.bf16.mxu0 %vm5130_vm2, %v5129_v5  ;;  %5187 = vmatprep.subr.msk.bf16.mxu1 %vm5130_vm2, %v5129_v5  ;;  %v1134_v23 = vld [vmem:[%s8650_s10] sm:$0xff]  ;;  %v1002_v25 = vld [vmem:[%s8649_s24 + $0x8] sm:$0xff]  ;;  %v1003_v29 = vld [vmem:[%s8649_s24 + $0x10] sm:$0xff] }
 0x1b4   : > { %5134 = vmatpush1.bf16.msk.msra.mxu0 %vm5130_vm2, %v5132_v7  ;;  %5188 = vmatpush1.bf16.msk.msra.mxu1 %vm5130_vm2, %v5132_v7  ;;  %v1135_v28 = vld [vmem:[%s8650_s10 + $0x8] sm:$0xff]  ;;  %v1004_v30 = vld [vmem:[%s8649_s24 + $0x18] sm:$0xff]  ;;  %v1268_v32 = vld [vmem:[%s8651_s9] sm:$0xff] }
 0x1b5   : > { %5136 = vmatprep.subr.bf16.mxu1 %v5135_v11  ;;  %v1138_v16 = vld [vmem:[%s8648_s1] sm:$0xff]  ;;  %v1140_v17 = vld [vmem:[%s8648_s1 + $0x10] sm:$0xff]  ;;  %v1139_v18 = vld [vmem:[%s8648_s1 + $0x8] sm:$0xff] }
 0x1b6   : > { %1144 = vperm.xlu0 %5660, %v1138_v16   ;;  %1154 = vperm.xlu1 %5661, %v1140_v17   ;;  %v1141_v19 = vld [vmem:[%s8648_s1 + $0x18] sm:$0xff]  ;;  %v1136_v34 = vld [vmem:[%s8650_s10 + $0x10] sm:$0xff]  ;;  %v1269_v35 = vld [vmem:[%s8651_s9 + $0x8] sm:$0xff] }
 0x1b7   : > { %4689 = vmatmul.mubr.msk.f32.vlgmr.msra.gmra.mrb[0].mxu0 %vm1025_vm3, %v997_v13  ;;  %4691 = vmatmul.mubr.msk.f32.vlgmr.msra.gmra.mrb[0].mxu1 %vm1025_vm3, %v999_v14  ;;  %v1270_v38 = vld [vmem:[%s8651_s9 + $0x10] sm:$0xff]  ;;  %v1271_v39 = vld [vmem:[%s8651_s9 + $0x18] sm:$0xff] }
 0x1b8   : > { %5138 = vmatpush1.bf16.msra.mxu1 %v5137_v15  ;;  %1115 = vmatprep.mubr.f32.mxu0 %v8572_v0  ;;  %v1137_v40 = vld [vmem:[%s8650_s10 + $0x18] sm:$0xff]  ;;  %v5674_v46 = vld [vmem:[#allocation6 + $0x70] sm:$0xff]  }
 0x1b9   : > { %1127 = vmatprep.mubr.f32.mxu1 %v8572_v0  ;;  %5017 = vmatprep.subr.bf16.mxu1 %v5662_v24  ;;  %v5675_v47 = vld [vmem:[#allocation6 + $0x30] sm:$0xff]   ;;  %v5676_v48 = vld [vmem:[#allocation6 + $0x78] sm:$0xff]  }
 0x1ba   : > { %1149 = vperm.xlu0 %5660, %v1139_v18   ;;  %1159 = vperm.xlu1 %5661, %v1141_v19   ;;  %v5677_v49 = vld [vmem:[#allocation6 + $0x38] sm:$0xff]  }
 0x1bb   : > { %4690 = vmatmul.mubr.msk.f32.gmra.mrb[2].mxu0 %vm1025_vm3, %v998_v20  ;;  %4692 = vmatmul.mubr.msk.f32.gmra.mrb[2].mxu1 %vm1025_vm3, %v1000_v21 }
 0x1bc   : > { %1239 = vmatprep.mubr.f32.mxu1 %v8572_v0  ;;  %1369 = vmatprep.mubr.f32.mxu0 %v8572_v0 }
 0x1be   : > { %1007 = vperm.xlu0 %5660, %v1001_v22   ;;  %1012 = vperm.xlu1 %5661, %v1002_v25  }
 0x1bf   : > { %4693 = vmatmul.mubr.msk.f32.vlgmr.msra.gmra.mrb[4].mxu1 %vm1162_vm4, %v1134_v23 }
 0x1c0   : > { %1245 = vmatprep.mubr.f32.mxu1 %v8572_v0  ;;  %5018 = vmatpush3.bf16.msra.mxu1 %v5663_v26 }
 0x1c1   : > { %5019 = vmatprep.subr.bf16.mxu1 %v5664_v27 }
 0x1c2   : > { %1017 = vperm.xlu0 %5660, %v1003_v29   ;;  %1022 = vperm.xlu1 %5661, %v1004_v30  }
 0x1c3   : > { %4694 = vmatmul.mubr.msk.f32.gmra.mrb[6].mxu1 %vm1162_vm4, %v1135_v28 }
 0x1c4   : > { %1251 = vmatprep.mubr.f32.mxu1 %v8572_v0  ;;  %5020 = vmatpush3.bf16.msra.mxu1 %v5665_v31 }
 0x1c5   : > { %5021 = vmatprep.subr.bf16.mxu1 %v5666_v33 }
 0x1c6   : > { %1274 = vperm.xlu0 %5660, %v1268_v32   ;;  %1279 = vperm.xlu1 %5661, %v1269_v35  }
 0x1c7   : > { %4695 = vmatmul.mubr.msk.f32.gmra.mrb[8].mxu1 %vm1162_vm4, %v1136_v34 }
 0x1c8   : > { %1257 = vmatprep.mubr.f32.mxu1 %v8572_v0  ;;  %5022 = vmatpush3.bf16.msra.mxu1 %v5667_v36  ;;  %v5678_v36 = vld [vmem:[#allocation8 + $0x40] sm:$0xff]  }
 0x1c9   : > { %5023 = vmatprep.subr.bf16.mxu1 %v5668_v37  ;;  %v1264_v37 = vld [vmem:[#allocation12] sm:$0xff] }
 0x1ca   : > { %1284 = vperm.xlu0 %5660, %v1270_v38   ;;  %1289 = vperm.xlu1 %5661, %v1271_v39   ;;  %v5679_v38 = vld [vmem:[#allocation8] sm:$0xff]   ;;  %v5680_v39 = vld [vmem:[#allocation8 + $0x48] sm:$0xff]  }
 0x1cb   : > { %4696 = vmatmul.mubr.msk.f32.gmra.mrb[10].mxu1 %vm1162_vm4, %v1137_v40  ;;  %v1265_v40 = vld [vmem:[#allocation12 + $0x8] sm:$0xff] }
 0x1cc   : > { %5024 = vmatpush3.bf16.msra.mxu1 %v5669_v41  ;;  %v5681_v41 = vld [vmem:[#allocation8 + $0x8] sm:$0xff]  }
 0x1cd   : > { %5025 = vmatprep.subr.bf16.mxu1 %v5670_v42  ;;  %v5682_v42 = vld [vmem:[#allocation8 + $0x50] sm:$0xff]  }
 0x1d0   : > { %5026 = vmatpush3.bf16.msra.mxu1 %v5671_v43  ;;  %v1266_v43 = vld [vmem:[#allocation12 + $0x10] sm:$0xff] }
 0x1d1   : > { %5027 = vmatprep.subr.bf16.mxu1 %v5672_v44  ;;  %v5683_v44 = vld [vmem:[#allocation8 + $0x10] sm:$0xff]  }
 0x1d4   : > { %5028 = vmatpush3.bf16.msra.mxu1 %v5673_v45  ;;  %v5684_v45 = vld [vmem:[#allocation8 + $0x58] sm:$0xff]  }
 0x1d5   : > { %5029 = vmatprep.subr.bf16.mxu1 %v5674_v46  ;;  %v1267_v46 = vld [vmem:[#allocation12 + $0x18] sm:$0xff] }
 0x1d8   : > { %5030 = vmatpush3.bf16.msra.mxu1 %v5675_v47  ;;  %v5685_v47 = vld [vmem:[#allocation8 + $0x18] sm:$0xff]  }
 0x1d9   : > { %5031 = vmatprep.subr.bf16.mxu1 %v5676_v48  ;;  %v5686_v48 = vld [vmem:[#allocation8 + $0x60] sm:$0xff]  }
 0x1dc   : > { %5032 = vmatpush3.bf16.msra.mxu1 %v5677_v49  ;;  %v5687_v49 = vld [vmem:[#allocation8 + $0x20] sm:$0xff]  }
 0x235   : > { %v1145_v50 = vpop.permute.xlu0 %1144  ;;  %v1155_v51 = vpop.permute.xlu1 %1154 }
 0x239   : > { %v1150_v52 = vpop.permute.xlu0 %1149  ;;  %v1160_v53 = vpop.permute.xlu1 %1159 }
 0x23d   : > { %v1008_v54 = vpop.permute.xlu0 %1007  ;;  %v1013_v55 = vpop.permute.xlu1 %1012 }
 0x241   : > { %v1018_v60 = vpop.permute.xlu0 %1017  ;;  %v1023_v61 = vpop.permute.xlu1 %1022 }
 0x28a   : > { %v1123_v56 = vpop.f32.mrb[0].mxu1  ;;  %v1111_v57 = vpop.f32.mrb[0].mxu0 }
 0x28b   : > { %v1125_v58 = vpop.f32.mrb[1].mxu1  ;;  %v1113_v59 = vpop.f32.mrb[1].mxu0  ;;  %v1112_v62 = vadd.f32 %v1111_v57, %v1008_v54  ;;  %v1124_v4 = vadd.f32 %v1123_v56, %v1018_v60 }
 0x28c   : > { %v1114_v63 = vadd.f32 %v1113_v59, %v1008_v54  ;;  %v1126_v9 = vadd.f32 %v1125_v58, %v1018_v60  ;;  %v5692_v54 = vld [vmem:[#allocation8 + $0x78] sm:$0xff]  }
 0x28e   : > { %v1117_v2 = vpop.f32.mrb[2].mxu0  ;;  %v1129_v3 = vpop.f32.mrb[2].mxu1 }
 0x28f   : > { %v1118_v5 = vadd.f32 %v1117_v2, %v1013_v55  ;;  %v1130_v6 = vadd.f32 %v1129_v3, %v1023_v61  ;;  %v1119_v7 = vpop.f32.mrb[3].mxu0  ;;  %v1131_v8 = vpop.f32.mrb[3].mxu1 }
 0x290   : > { %v1120_v10 = vadd.f32 %v1119_v7, %v1013_v55  ;;  %v1132_v11 = vadd.f32 %v1131_v8, %v1023_v61  ;;  %v5693_v55 = vld [vmem:[#allocation8 + $0x38] sm:$0xff]  }
 0x291   : > { %v7360_v12 = vpack.c.bf16 %v1118_v5, %v1112_v62  ;;  %v7362_v13 = vpack.c.bf16 %v1130_v6, %v1124_v4  ;;  %v1275_v6 = vpop.permute.xlu0 %1274 }
 0x292   : > { %v7364_v14 = vpack.c.bf16 %v1120_v10, %v1114_v63  ;;  %v7366_v15 = vpack.c.bf16 %v1132_v11, %v1126_v9  ;;  %v1241_v16 = vpop.f32.mrb[4].mxu1 }
 0x293   : > { %v1243_v17 = vpop.f32.mrb[5].mxu1  ;;  %v1242_v19 = vadd.f32 %v1241_v16, %v1145_v50  ;;  %v1280_v16 = vpop.permute.xlu1 %1279 }
 0x294   : > { %1630 = vmatprep.mubr.bf16.mxu1 %v7364_v14  ;;  %v1244_v22 = vadd.f32 %v1243_v17, %v1145_v50  ;;  %v5688_v50 = vld [vmem:[#allocation8 + $0x68] sm:$0xff]  }
 0x295   : > { %1631 = vmatmul.mubr.bf16.vlgmr.msra.gmra.mrb[12].mxu1 %v7360_v12 }
 0x296   : > { %v1247_v18 = vpop.f32.mrb[6].mxu1  ;;  %1638 = vmatprep.mubr.bf16.mxu1 %v7366_v15 }
 0x297   : > { %v1248_v20 = vadd.f32 %v1247_v18, %v1150_v52  ;;  %v1249_v21 = vpop.f32.mrb[7].mxu1 }
 0x298   : > { %v1250_v23 = vadd.f32 %v1249_v21, %v1150_v52  ;;  %v5690_v52 = vld [vmem:[#allocation8 + $0x70] sm:$0xff]  }
 0x299   : > { %v5141_v24 = vpack.c.bf16 %v1248_v20, %v1242_v19 }
 0x29a   : > { %v5139_v25 = vpack.c.bf16 %v1250_v23, %v1244_v22  ;;  %v1253_v26 = vpop.f32.mrb[8].mxu1 }
 0x29b   : > { %v1255_v27 = vpop.f32.mrb[9].mxu1  ;;  %v1254_v29 = vadd.f32 %v1253_v26, %v1155_v51  ;;  %v1285_v26 = vpop.permute.xlu0 %1284 }
 0x29c   : > { %5140 = vmatprep.subr.bf16.mxu0 %v5139_v25  ;;  %v1256_v32 = vadd.f32 %v1255_v27, %v1155_v51  ;;  %v5689_v51 = vld [vmem:[#allocation8 + $0x28] sm:$0xff]  }
 0x29d   : > { %5142 = vmatpush1.bf16.msra.mxu0 %v5141_v24  ;;  %1639 = vmatmul.mubr.bf16.gmra.mrb[16].mxu1 %v7362_v13 }
 0x29e   : > { %v1259_v28 = vpop.f32.mrb[10].mxu1 }
 0x29f   : > { %v1260_v30 = vadd.f32 %v1259_v28, %v1160_v53  ;;  %v1261_v31 = vpop.f32.mrb[11].mxu1 }
 0x2a0   : > { %v1262_v33 = vadd.f32 %v1261_v31, %v1160_v53  ;;  %v5691_v53 = vld [vmem:[#allocation8 + $0x30] sm:$0xff]  }
 0x2a1   : > { %v5145_v34 = vpack.c.bf16 %v1260_v30, %v1254_v29 }
 0x2a2   : > { %v5143_v35 = vpack.c.bf16 %v1262_v33, %v1256_v32 }
 0x2a4   : > { %5144 = vmatprep.subr.bf16.mxu0 %v5143_v35 }
 0x2a5   : > { %5146 = vmatpush1.bf16.msra.mxu0 %v5145_v34 }
 0x2a6   : > { %5045 = vmatprep.subr.bf16.mxu0 %v5678_v36 }
 0x2a8   : > { %4697 = vmatmul.mubr.msk.f32.vlgmr.msra.gmra.mrb[4].mxu0 %vm1292_vm5, %v1264_v37 }
 0x2a9   : > { %5046 = vmatpush3.bf16.msra.mxu0 %v5679_v38  ;;  %1375 = vmatprep.mubr.f32.mxu0 %v8572_v0 }
 0x2aa   : > { %5047 = vmatprep.subr.bf16.mxu0 %v5680_v39 }
 0x2ac   : > { %4698 = vmatmul.mubr.msk.f32.gmra.mrb[6].mxu0 %vm1292_vm5, %v1265_v40  ;;  %v1290_v40 = vpop.permute.xlu1 %1289 }
 0x2ad   : > { %5048 = vmatpush3.bf16.msra.mxu0 %v5681_v41  ;;  %1381 = vmatprep.mubr.f32.mxu0 %v8572_v0 }
 0x2ae   : > { %5049 = vmatprep.subr.bf16.mxu0 %v5682_v42 }
 0x2b0   : > { %4699 = vmatmul.mubr.msk.f32.gmra.mrb[8].mxu0 %vm1292_vm5, %v1266_v43 }
 0x2b1   : > { %5050 = vmatpush3.bf16.msra.mxu0 %v5683_v44  ;;  %1387 = vmatprep.mubr.f32.mxu0 %v8572_v0 }
 0x2b2   : > { %5051 = vmatprep.subr.bf16.mxu0 %v5684_v45 }
 0x2b4   : > { %4700 = vmatmul.mubr.msk.f32.gmra.mrb[10].mxu0 %vm1292_vm5, %v1267_v46 }
 0x2b5   : > { %5052 = vmatpush3.bf16.msra.mxu0 %v5685_v47  ;;  %1811 = vmatprep.mubr.bf16.mxu0 %v7364_v14 }
 0x2b6   : > { %5053 = vmatprep.subr.bf16.mxu0 %v5686_v48 }
 0x2b9   : > { %5054 = vmatpush3.bf16.msra.mxu0 %v5687_v49 }
 0x2ba   : > { %5055 = vmatprep.subr.bf16.mxu0 %v5688_v50 }
 0x2bd   : > { %5056 = vmatpush3.bf16.msra.mxu0 %v5689_v51 }
 0x2be   : > { %5057 = vmatprep.subr.bf16.mxu0 %v5690_v52 }
 0x2c1   : > { %5058 = vmatpush3.bf16.msra.mxu0 %v5691_v53 }
 0x2c2   : > { %5059 = vmatprep.subr.bf16.mxu0 %v5692_v54 }
 0x2c5   : > { %5060 = vmatpush3.bf16.msra.mxu0 %v5693_v55 }
 0x2c8   : > { %1812 = vmatmul.mubr.bf16.vlgmr.msra.gmra.mrb[12].mxu0 %v7360_v12 }
 0x2c9   : > { %1819 = vmatprep.mubr.bf16.mxu0 %v7366_v15 }
 0x2d0   : > { %1820 = vmatmul.mubr.bf16.gmra.mrb[16].mxu0 %v7362_v13 }
 0x368   : > { %v5033_v56 = vpop.f32.mrb[12].mxu1 }
 0x369   : > { %v5034_v57 = vpop.f32.mrb[13].mxu1 }
 0x36a   : > { %v5035_v58 = vadd.f32 %v5034_v57, %v5033_v56  ;;  %v5036_v59 = vpop.f32.mrb[14].mxu1 }
 0x36b   : > { %v5037_v60 = vpop.f32.mrb[15].mxu1 }
 0x36c   : > { %1647 = vst [vmem:[#allocation2] sm:$0xff] %v5035_v58  ;;  %v5038_v61 = vadd.f32 %v5037_v60, %v5036_v59 }
 0x36e   : > { %1648 = vst [vmem:[#allocation2 + $0x8] sm:$0xff] %v5038_v61 }
 0x370   : > { %v5039_v62 = vpop.f32.mrb[16].mxu1 }
 0x371   : > { %v5040_v63 = vpop.f32.mrb[17].mxu1 }
 0x372   : > { %v5041_v2 = vadd.f32 %v5040_v63, %v5039_v62  ;;  %v5042_v3 = vpop.f32.mrb[18].mxu1 }
 0x373   : > { %v5043_v4 = vpop.f32.mrb[19].mxu1 }
 0x374   : > { %1649 = vst [vmem:[#allocation2 + $0x10] sm:$0xff] %v5041_v2  ;;  %v5044_v5 = vadd.f32 %v5043_v4, %v5042_v3 }
 0x376   : > { %1650 = vst [vmem:[#allocation2 + $0x18] sm:$0xff] %v5044_v5 }
 0x37b   : > { %v1371_v7 = vpop.f32.mrb[4].mxu0 }
 0x37c   : > { %v7383_v8 = vadd.f32 %v1371_v7, %v1275_v6  ;;  %v1373_v9 = vpop.f32.mrb[5].mxu0 }
 0x37d   : > { %v7385_v10 = vadd.f32 %v1373_v9, %v1275_v6 }
 0x37e   : > { %v1402_v11 = vmul.f32 %v7383_v8, %v7383_v8 }
 0x37f   : > { %v1403_v17 = vmul.f32 %v7385_v10, %v7385_v10  ;;  %v1377_v18 = vpop.f32.mrb[6].mxu0 }
 0x380   : > { %v1410_v19 = vmul.f32 %v1402_v11, %v7383_v8  ;;  %v7392_v20 = vadd.f32 %v1377_v18, %v1280_v16  ;;  %v1379_v21 = vpop.f32.mrb[7].mxu0  ;;  %v1394_v11 = vmul.f32 0.5, %v7383_v8  ;;  %v1395_v18 = vmul.f32 0.5, %v7385_v10 }
 0x381   : > { %v1411_v22 = vmul.f32 %v1403_v17, %v7385_v10  ;;  %v7395_v23 = vadd.f32 %v1379_v21, %v1280_v16 }
 0x382   : > { %v1418_v24 = vmul.f32 0.044715, %v1410_v19  ;;  %v1404_v25 = vmul.f32 %v7392_v20, %v7392_v20 }
 0x383   : > { %v1419_v27 = vmul.f32 0.044715, %v1411_v22  ;;  %v1405_v28 = vmul.f32 %v7395_v23, %v7395_v23  ;;  %v1383_v29 = vpop.f32.mrb[8].mxu0 }
 0x384   : > { %v1426_v30 = vadd.f32 %v1418_v24, %v7383_v8  ;;  %v1412_v31 = vmul.f32 %v1404_v25, %v7392_v20  ;;  %v7403_v32 = vadd.f32 %v1383_v29, %v1285_v26  ;;  %v1385_v33 = vpop.f32.mrb[9].mxu0 }
 0x385   : > { %v1427_v34 = vadd.f32 %v1419_v27, %v7385_v10  ;;  %v1413_v35 = vmul.f32 %v1405_v28, %v7395_v23  ;;  %v1386_v36 = vadd.f32 %v1385_v33, %v1285_v26  ;;  %v1396_v26 = vmul.f32 0.5, %v7392_v20 }
 0x386   : > { %v1434_v37 = vmul.f32 0.7978846, %v1426_v30  ;;  %v1420_v38 = vmul.f32 0.044715, %v1412_v31  ;;  %v1406_v39 = vmul.f32 %v7403_v32, %v7403_v32  ;;  %v1397_v28 = vmul.f32 0.5, %v7395_v23 }
 0x387   : > { %v1435_v41 = vmul.f32 0.7978846, %v1427_v34  ;;  %v1421_v42 = vmul.f32 0.044715, %v1413_v35  ;;  %v1407_v43 = vmul.f32 %v1386_v36, %v1386_v36  ;;  %v1389_v44 = vpop.f32.mrb[10].mxu0  ;;  %v1398_v33 = vmul.f32 0.5, %v7403_v32 }
 0x388   : > { %5694 = vtanh.f32 %v1434_v37  ;;  %v1428_v45 = vadd.f32 %v1420_v38, %v7392_v20  ;;  %v1414_v46 = vmul.f32 %v1406_v39, %v7403_v32  ;;  %v1390_v47 = vadd.f32 %v1389_v44, %v1290_v40  ;;  %v1391_v48 = vpop.f32.mrb[11].mxu0 }
 0x389   : > { %5696 = vtanh.f32 %v1435_v41  ;;  %v1429_v49 = vadd.f32 %v1421_v42, %v7395_v23  ;;  %v1415_v50 = vmul.f32 %v1407_v43, %v1386_v36  ;;  %v1392_v51 = vadd.f32 %v1391_v48, %v1290_v40 }
 0x38a   : > { %v1436_v52 = vmul.f32 0.7978846, %v1428_v45  ;;  %v1422_v53 = vmul.f32 0.044715, %v1414_v46  ;;  %v1408_v54 = vmul.f32 %v1390_v47, %v1390_v47  ;;  %v1399_v37 = vmul.f32 0.5, %v1386_v36 }
 0x38b   : > { %v1437_v55 = vmul.f32 0.7978846, %v1429_v49  ;;  %v1423_v56 = vmul.f32 0.044715, %v1415_v50  ;;  %v1409_v57 = vmul.f32 %v1392_v51, %v1392_v51  ;;  %v1400_v45 = vmul.f32 0.5, %v1390_v47 }
 0x38c   : > { %5698 = vtanh.f32 %v1436_v52  ;;  %v1430_v58 = vadd.f32 %v1422_v53, %v7403_v32  ;;  %v1416_v59 = vmul.f32 %v1408_v54, %v1390_v47  ;;  %v1401_v48 = vmul.f32 0.5, %v1392_v51 }
 0x38d   : > { %5700 = vtanh.f32 %v1437_v55  ;;  %v1431_v60 = vadd.f32 %v1423_v56, %v1386_v36  ;;  %v1417_v61 = vmul.f32 %v1409_v57, %v1392_v51 }
 0x38e   : > { %v1438_v62 = vmul.f32 0.7978846, %v1430_v58  ;;  %v1424_v63 = vmul.f32 0.044715, %v1416_v59  ;;  %v7444_v58 = vmov 0.0   ;;  %v7446_v59 = vmov 0.0  }
 0x38f   : > { %v1439_v2 = vmul.f32 0.7978846, %v1431_v60  ;;  %v1425_v3 = vmul.f32 0.044715, %v1417_v61  ;;  %v7448_v60 = vmov 0.0   ;;  %v7450_v61 = vmov 0.0  }
 0x390   : > { %5702 = vtanh.f32 %v1438_v62  ;;  %v1432_v4 = vadd.f32 %v1424_v63, %v1390_v47  ;;  %v7440_v47 = vmov 0.0   ;;  %v7452_v62 = vmov 0.0  }
 0x391   : > { %5704 = vtanh.f32 %v1439_v2  ;;  %v1433_v5 = vadd.f32 %v1425_v3, %v1392_v51  ;;  %v7442_v51 = vmov 0.0   ;;  %v7454_v63 = vmov 0.0  }
 0x392   : > { %v5695_v6 = vpop.eup %5694  ;;  %v1440_v7 = vmul.f32 0.7978846, %v1432_v4  ;;  %v7456_v2 = vmov 0.0   ;;  %v7458_v3 = vmov 0.0   ;;  %v7460_v4 = vmov 0.0  }
 0x393   : > { %v5697_v9 = vpop.eup %5696  ;;  %v1450_v16 = vadd.f32 1.0, %v5695_v6  ;;  %v1441_v17 = vmul.f32 0.7978846, %v1433_v5  ;;  %v7462_v5 = vmov 0.0   ;;  %v7464_v6 = vmov 0.0  }
 0x394   : > { %v1451_v19 = vadd.f32 1.0, %v5697_v9  ;;  %5706 = vtanh.f32 %v1440_v7  ;;  %v7466_v7 = vmov 0.0   ;;  %v7468_v9 = vmov 0.0  }
 0x395   : > { %v7415_v21 = vmul.f32 %v1450_v16, %v1394_v11  ;;  %5708 = vtanh.f32 %v1441_v17  ;;  %v7470_v11 = vmov 0.0  }
 0x396   : > { %v5699_v22 = vpop.eup %5698  ;;  %v7417_v24 = vmul.f32 %v1451_v19, %v1395_v18 }
 0x397   : > { %v5701_v25 = vpop.eup %5700  ;;  %v1452_v27 = vadd.f32 1.0, %v5699_v22 }
 0x398   : > { %v1453_v29 = vadd.f32 1.0, %v5701_v25 }
 0x399   : > { %v7421_v8 = vmul.f32 %v1452_v27, %v1396_v26 }
 0x39a   : > { %v5703_v30 = vpop.eup %5702  ;;  %v7423_v31 = vmul.f32 %v1453_v29, %v1397_v28 }
 0x39b   : > { %v5705_v10 = vpop.eup %5704  ;;  %v1454_v34 = vadd.f32 1.0, %v5703_v30  ;;  %v5061_v35 = vpop.f32.mrb[12].mxu0 }
 0x39c   : > { %v1455_v38 = vadd.f32 1.0, %v5705_v10  ;;  %v5062_v39 = vpop.f32.mrb[13].mxu0 }
 0x39d   : > { %v7426_v40 = vmul.f32 %v1454_v34, %v1398_v33  ;;  %v5063_v20 = vadd.f32 %v5062_v39, %v5061_v35  ;;  %v5064_v41 = vpop.f32.mrb[14].mxu0 }
 0x39e   : > { %v5707_v42 = vpop.eup %5706  ;;  %v7428_v23 = vmul.f32 %v1455_v38, %v1399_v37  ;;  %v5065_v43 = vpop.f32.mrb[15].mxu0 }
 0x39f   : > { %v5709_v44 = vpop.eup %5708  ;;  %v1456_v46 = vadd.f32 1.0, %v5707_v42  ;;  %1828 = vst [vmem:[#allocation2 + $0x20] sm:$0xff] %v5063_v20  ;;  %v5066_v32 = vadd.f32 %v5065_v43, %v5064_v41 }
 0x3a0   : > { %v1457_v49 = vadd.f32 1.0, %v5709_v44 }
 0x3a1   : > { %v7430_v36 = vmul.f32 %v1456_v46, %v1400_v45  ;;  %1829 = vst [vmem:[#allocation2 + $0x28] sm:$0xff] %v5066_v32 }
 0x3a2   : > { %v7432_v50 = vmul.f32 %v1457_v49, %v1401_v48 }
 0x3a3   : > { %8652 = vst [vmem:[#allocation37_spill] sm:$0xff] %v7430_v36  ;;  %v5067_v52 = vpop.f32.mrb[16].mxu0 }
 0x3a4   : > { %8653 = vst [vmem:[#allocation38_spill] sm:$0xff] %v7432_v50  ;;  %v5068_v53 = vpop.f32.mrb[17].mxu0 }
 0x3a5   : > { %v5069_v54 = vadd.f32 %v5068_v53, %v5067_v52  ;;  %v5070_v55 = vpop.f32.mrb[18].mxu0 }
 0x3a6   : > { %v5071_v56 = vpop.f32.mrb[19].mxu0 }
 0x3a7   : > { %1830 = vst [vmem:[#allocation2 + $0x30] sm:$0xff] %v5069_v54  ;;  %v5072_v57 = vadd.f32 %v5071_v56, %v5070_v55 }
 0x3a9   : > { %1831 = vst [vmem:[#allocation2 + $0x38] sm:$0xff] %v5072_v57 }
 0x3aa LB: >> { %s4733_s7 = sshll.u32 %s6614_s11, 3  ;;  %s4999_s13 = sshll.u32 %s6614_s11, 9  ;;  %v1867_v16 = vlaneseq  ;;  %s6614_s11 = sphi %s7472_s11, %s1837_s11   ;;  %v6610_v11 = vphi %v7470_v11, %v8684_v11   ;;  %v6606_v9 = vphi %v7468_v9, %v8683_v9   ;;  %v6602_v7 = vphi %v7466_v7, %v8682_v7   ;;  %v6598_v6 = vphi %v7464_v6, %v8681_v6   ;;  %v6594_v5 = vphi %v7462_v5, %v8680_v5   ;;  %v6590_v4 = vphi %v7460_v4, %v8679_v4   ;;  %v6586_v3 = vphi %v7458_v3, %v8678_v3   ;;  %v6582_v2 = vphi %v7456_v2, %v8677_v2   ;;  %v6578_v63 = vphi %v7454_v63, %v8676_v63   ;;  %v6574_v62 = vphi %v7452_v62, %v8675_v62   ;;  %v6570_v61 = vphi %v7450_v61, %v8674_v61   ;;  %v6566_v60 = vphi %v7448_v60, %v8673_v60   ;;  %v6562_v59 = vphi %v7446_v59, %v8672_v59   ;;  %v6558_v58 = vphi %v7444_v58, %v8671_v58   ;;  %v6554_v51 = vphi %v7442_v51, %v8670_v51   ;;  %v6550_v47 = vphi %v7440_v47, %v8669_v47  }
 0x3ab   : >> { %s1855_s23 = scalar_lea.vmem [#allocation2], %s4733_s7  ;;  %s7528_s1 = scalar_lea.vmem [#allocation15], %s4999_s13 }
 0x3ac   : >> { %v7521_v17 = vshrl.u32 %v1867_v16, 7  ;;  %v1859_v26 = vld [vmem:[%s7528_s1] sm:$0xff]  ;;  %v1860_v27 = vld [vmem:[%s7528_s1 + $0x8] sm:$0xff]  ;;  %v1861_v10 = vld [vmem:[%s7528_s1 + $0x10] sm:$0xff]  ;;  %s1837_s11 = sadd.s32 1, %s6614_s11  }
 0x3ad   : >> { %v1862_v33 = vld [vmem:[%s7528_s1 + $0x18] sm:$0xff]  ;;  %v1863_v35 = vld [vmem:[%s7528_s1 + $0x20] sm:$0xff]  ;;  %v1864_v37 = vld [vmem:[%s7528_s1 + $0x28] sm:$0xff]  ;;  %p7709_p8 = scmp.ge.s32.totalorder %s1837_s11, 8  }
 0x3ae   : >> { %v8570_v19 = vsub.s32 0, %v7521_v17  ;;  %v8569_v22 = vsub.s32 1, %v7521_v17  ;;  %v8568_v25 = vsub.s32 2, %v7521_v17  ;;  %v8567_v28 = vsub.s32 3, %v7521_v17  ;;  %v1865_v38 = vld [vmem:[%s7528_s1 + $0x30] sm:$0xff]  ;;  %v1866_v20 = vld [vmem:[%s7528_s1 + $0x38] sm:$0xff]  ;;  %5148 = vmatprep.subr.bf16.mxu0 (%p7709_p8), %v7364_v14 }
 0x3af   : >> { %v8571_v29 = vsub.s32 4, %v7521_v17  ;;  %v8578_v30 = vsub.s32 5, %v7521_v17  ;;  %v4737_v43 = vld [vmem:[%s7528_s1 + $0x40] sm:$0xff]  ;;  %v4738_v44 = vld [vmem:[%s7528_s1 + $0x48] sm:$0xff]  ;;  %v4739_v32 = vld [vmem:[%s7528_s1 + $0x50] sm:$0xff]  ;;  %5150 = vmatpush1.bf16.msra.mxu0 (%p7709_p8), %v7360_v12  ;;  %s8687_s7 = sld [smem:[#allocation52_spill]] (%p7709_p8) }
 0x3b0   : >> { %v7523_v18 = vld [vmem:[%s1855_s23] sm:$0xff]  ;;  %v4740_v48 = vld [vmem:[%s7528_s1 + $0x58] sm:$0xff]  ;;  %v4748_v36 = vld [vmem:[%s7528_s1 + $0x88] sm:$0xff]  ;;  %5152 = vmatprep.subr.bf16.mxu0 (%p7709_p8), %v7366_v15  ;;  %s8001_s23 = smov (%p7709_p8), 0  }
 0x3b1   : >> { %v1870_v34 = vrot.slane %v7523_v18, %v8570_v19  ;;  %v1901_v39 = vrot.slane %v7523_v18, %v8569_v22  ;;  %v7552_v45 = vrot.slane %v7523_v18, %v8568_v25  ;;  %v4741_v49 = vld [vmem:[%s7528_s1 + $0x60] sm:$0xff]  ;;  %v7561_v52 = vrot.slane %v7523_v18, %v8567_v28  ;;  %v4743_v28 = vld [vmem:[%s7528_s1 + $0x70] sm:$0xff]  ;;  %v4744_v25 = vld [vmem:[%s7528_s1 + $0x78] sm:$0xff] }
 0x3b2   : >> { %v7566_v53 = vrot.slane %v7523_v18, %v8571_v29  ;;  %v7571_v54 = vrot.slane %v7523_v18, %v8578_v30  ;;  %v5720_v14 = vld [vmem:[#allocation11 + $0x20] ss:$8 sps:$4 sm:$0xff] (%p7709_p8)   ;;  %v5721_v12 = vld [vmem:[#allocation11 + $0x34] ss:$8 sps:$4 sm:$0xff] (%p7709_p8)  }
 0x3b3   : >> { %v1871_v41 = vmul.f32 %v1870_v34, %v1859_v26  ;;  %v1872_v42 = vmul.f32 %v1870_v34, %v1860_v27  ;;  %v1873_v56 = vmul.f32 %v1870_v34, %v1861_v10  ;;  %v1874_v57 = vmul.f32 %v1870_v34, %v1862_v33  ;;  %v4742_v27 = vld [vmem:[%s7528_s1 + $0x68] sm:$0xff]  ;;  %5154 = vmatpush1.bf16.msra.mxu0 (%p7709_p8), %v7362_v13 }
 0x3b4   : >> { %v1875_v16 = vmul.f32 %v1870_v34, %v1863_v35  ;;  %v1876_v26 = vmul.f32 %v1870_v34, %v1864_v37  ;;  %v1877_v22 = vmul.f32 %v1870_v34, %v1865_v38  ;;  %v1878_v19 = vmul.f32 %v1870_v34, %v1866_v20  ;;  %v4747_v37 = vld [vmem:[%s7528_s1 + $0x80] sm:$0xff]  ;;  %v4749_v20 = vld [vmem:[%s7528_s1 + $0x90] sm:$0xff]  ;;  %v2415_v13 = vld [vmem:[#allocation14 + $0x8] sm:$0xff] (%p7709_p8) }
 0x3b5   : >> { %v1879_v29 = vadd.f32 %v6610_v11, %v1871_v41  ;;  %v1880_v0 = vadd.f32 %v6606_v9, %v1872_v42  ;;  %v1902_v1 = vmul.f32 %v4737_v43, %v1901_v39  ;;  %v1903_v30 = vmul.f32 %v4738_v44, %v1901_v39  ;;  %v4750_v41 = vld [vmem:[%s7528_s1 + $0x98] sm:$0xff]  ;;  %v5726_v15 = vld [vmem:[#allocation11 + $0x40] ss:$8 sps:$4 sm:$0xff] (%p7709_p8)  }
 0x3b6   : >> { %v1904_v46 = vmul.f32 %v4739_v32, %v1901_v39  ;;  %v1905_v50 = vmul.f32 %v4740_v48, %v1901_v39  ;;  %v1906_v55 = vmul.f32 %v4741_v49, %v1901_v39  ;;  %v1907_v10 = vmul.f32 %v4742_v27, %v1901_v39  ;;  %v4754_v44 = vld [vmem:[%s7528_s1 + $0xb8] sm:$0xff]  ;;  %v4762_v49 = vld [vmem:[%s7528_s1 + $0xe8] sm:$0xff] }
 0x3b7   : >> { %v1908_v33 = vmul.f32 %v4743_v28, %v1901_v39  ;;  %v1909_v35 = vmul.f32 %v4744_v25, %v1901_v39  ;;  %v1881_v38 = vadd.f32 %v6602_v7, %v1873_v56  ;;  %v1882_v11 = vadd.f32 %v6598_v6, %v1874_v57  ;;  %v4751_v7 = vld [vmem:[%s7528_s1 + $0xa0] sm:$0xff]  ;;  %v4752_v6 = vld [vmem:[%s7528_s1 + $0xa8] sm:$0xff] }
 0x3b8   : >> { %v1883_v9 = vadd.f32 %v6594_v5, %v1875_v16  ;;  %v1884_v34 = vadd.f32 %v6590_v4, %v1876_v26  ;;  %v1885_v42 = vadd.f32 %v6586_v3, %v1877_v22  ;;  %v1886_v28 = vadd.f32 %v6582_v2, %v1878_v19  ;;  %v4753_v5 = vld [vmem:[%s7528_s1 + $0xb0] sm:$0xff] }
 0x3b9   : >> { %v1910_v25 = vadd.f32 %v6578_v63, %v1902_v1  ;;  %v1911_v39 = vadd.f32 %v6574_v62, %v1903_v30  ;;  %v1912_v43 = vadd.f32 %v6570_v61, %v1904_v46  ;;  %v1913_v4 = vadd.f32 %v6566_v60, %v1905_v50  ;;  %v4757_v1 = vld [vmem:[%s7528_s1 + $0xc0] sm:$0xff]  ;;  %v4758_v63 = vld [vmem:[%s7528_s1 + $0xc8] sm:$0xff]  ;;  %v4759_v30 = vld [vmem:[%s7528_s1 + $0xd0] sm:$0xff] }
 0x3ba   : >> { %v1933_v3 = vmul.f32 %v4747_v37, %v7552_v45  ;;  %v1934_v2 = vmul.f32 %v4748_v36, %v7552_v45  ;;  %v1914_v62 = vadd.f32 %v6562_v59, %v1906_v55  ;;  %v1915_v19 = vadd.f32 %v6558_v58, %v1907_v10  ;;  %v4760_v50 = vld [vmem:[%s7528_s1 + $0xd8] sm:$0xff]  ;;  %v4761_v60 = vld [vmem:[%s7528_s1 + $0xe0] sm:$0xff]  ;;  %v4763_v59 = vld [vmem:[%s7528_s1 + $0xf0] sm:$0xff] }
 0x3bb   : >> { %v1916_v22 = vadd.f32 %v6554_v51, %v1908_v33  ;;  %v1917_v61 = vadd.f32 %v6550_v47, %v1909_v35  ;;  %v1935_v46 = vmul.f32 %v4749_v20, %v7552_v45  ;;  %v1936_v32 = vmul.f32 %v4750_v41, %v7552_v45  ;;  %v4764_v58 = vld [vmem:[%s7528_s1 + $0xf8] sm:$0xff]  ;;  %v4768_v35 = vld [vmem:[%s7528_s1 + $0x108] sm:$0xff] }
 0x3bc   : >> { %v1937_v36 = vmul.f32 %v4751_v7, %v7552_v45  ;;  %v1938_v48 = vmul.f32 %v4752_v6, %v7552_v45  ;;  %v1939_v51 = vmul.f32 %v4753_v5, %v7552_v45  ;;  %v1940_v47 = vmul.f32 %v4754_v44, %v7552_v45  ;;  %v4769_v6 = vld [vmem:[%s7528_s1 + $0x110] sm:$0xff]  ;;  %v4770_v5 = vld [vmem:[%s7528_s1 + $0x118] sm:$0xff] }
 0x3bd   : >> { %v1941_v55 = vadd.f32 %v1933_v3, %v1879_v29  ;;  %v1942_v56 = vadd.f32 %v1934_v2, %v1880_v0  ;;  %v1964_v57 = vmul.f32 %v4757_v1, %v7561_v52  ;;  %v1965_v16 = vmul.f32 %v4758_v63, %v7561_v52  ;;  %v4767_v29 = vld [vmem:[%s7528_s1 + $0x100] sm:$0xff] }
 0x3be   : >> { %v1966_v26 = vmul.f32 %v4759_v30, %v7561_v52  ;;  %v1967_v27 = vmul.f32 %v4760_v50, %v7561_v52  ;;  %v1968_v10 = vmul.f32 %v4761_v60, %v7561_v52  ;;  %v1969_v33 = vmul.f32 %v4762_v49, %v7561_v52  ;;  %v4771_v63 = vld [vmem:[%s7528_s1 + $0x120] sm:$0xff]  ;;  %v4773_v30 = vld [vmem:[%s7528_s1 + $0x130] sm:$0xff] }
 0x3bf   : >> { %v1970_v45 = vmul.f32 %v4763_v59, %v7561_v52  ;;  %v1971_v0 = vmul.f32 %v4764_v58, %v7561_v52  ;;  %v1943_v37 = vadd.f32 %v1935_v46, %v1881_v38  ;;  %v1944_v20 = vadd.f32 %v1936_v32, %v1882_v11  ;;  %v4772_v52 = vld [vmem:[%s7528_s1 + $0x128] sm:$0xff]  ;;  %v4774_v38 = vld [vmem:[%s7528_s1 + $0x138] sm:$0xff]  ;;  %v4779_v32 = vld [vmem:[%s7528_s1 + $0x150] sm:$0xff] }
 0x3c0   : >> { %v1945_v41 = vadd.f32 %v1937_v36, %v1883_v9  ;;  %v1946_v7 = vadd.f32 %v1938_v48, %v1884_v34  ;;  %v1947_v44 = vadd.f32 %v1939_v51, %v1885_v42  ;;  %v1948_v3 = vadd.f32 %v1940_v47, %v1886_v28  ;;  %v4777_v34 = vld [vmem:[%s7528_s1 + $0x140] sm:$0xff]  ;;  %v4778_v42 = vld [vmem:[%s7528_s1 + $0x148] sm:$0xff]  ;;  %v4780_v36 = vld [vmem:[%s7528_s1 + $0x158] sm:$0xff] }
 0x3c1   : >> { %v1972_v2 = vadd.f32 %v1964_v57, %v1910_v25  ;;  %v1973_v1 = vadd.f32 %v1965_v16, %v1911_v39  ;;  %v1974_v50 = vadd.f32 %v1966_v26, %v1912_v43  ;;  %v1975_v60 = vadd.f32 %v1967_v27, %v1913_v4  ;;  %v4781_v48 = vld [vmem:[%s7528_s1 + $0x160] sm:$0xff]  ;;  %v4782_v58 = vld [vmem:[%s7528_s1 + $0x168] sm:$0xff]  ;;  %v4783_v51 = vld [vmem:[%s7528_s1 + $0x170] sm:$0xff] }
 0x3c2   : >> { %v1995_v11 = vmul.f32 %v4767_v29, %v7566_v53  ;;  %v1996_v9 = vmul.f32 %v4768_v35, %v7566_v53  ;;  %v1976_v28 = vadd.f32 %v1968_v10, %v1914_v62  ;;  %v1977_v25 = vadd.f32 %v1969_v33, %v1915_v19  ;;  %v4784_v47 = vld [vmem:[%s7528_s1 + $0x178] sm:$0xff]  ;;  %v4787_v35 = vld [vmem:[%s7528_s1 + $0x180] sm:$0xff] }
 0x3c3   : >> { %v1978_v39 = vadd.f32 %v1970_v45, %v1916_v22  ;;  %v1979_v46 = vadd.f32 %v1971_v0, %v1917_v61  ;;  %v1997_v43 = vmul.f32 %v4769_v6, %v7566_v53  ;;  %v1998_v4 = vmul.f32 %v4770_v5, %v7566_v53  ;;  %v4788_v6 = vld [vmem:[%s7528_s1 + $0x188] sm:$0xff] }
 0x3c4   : >> { %v1999_v49 = vmul.f32 %v4771_v63, %v7566_v53  ;;  %v2000_v59 = vmul.f32 %v4772_v52, %v7566_v53  ;;  %v2001_v57 = vmul.f32 %v4773_v30, %v7566_v53  ;;  %v2002_v62 = vmul.f32 %v4774_v38, %v7566_v53  ;;  %v4789_v38 = vld [vmem:[%s7528_s1 + $0x190] sm:$0xff] }
 0x3c5   : >> { %v2003_v19 = vadd.f32 %v1995_v11, %v1941_v55  ;;  %v2004_v22 = vadd.f32 %v1996_v9, %v1942_v56  ;;  %v2026_v61 = vmul.f32 %v4777_v34, %v7571_v54  ;;  %v2027_v16 = vmul.f32 %v4778_v42, %v7571_v54  ;;  %v4790_v11 = vld [vmem:[%s7528_s1 + $0x198] sm:$0xff]  ;;  %v4791_v9 = vld [vmem:[%s7528_s1 + $0x1a0] sm:$0xff]  ;;  %v4792_v42 = vld [vmem:[%s7528_s1 + $0x1a8] sm:$0xff] }
 0x3c6   : >> { %v2028_v26 = vmul.f32 %v4779_v32, %v7571_v54  ;;  %v2029_v27 = vmul.f32 %v4780_v36, %v7571_v54  ;;  %v2030_v10 = vmul.f32 %v4781_v48, %v7571_v54  ;;  %v2031_v33 = vmul.f32 %v4782_v58, %v7571_v54  ;;  %v4794_v32 = vld [vmem:[%s7528_s1 + $0x1b8] sm:$0xff] }
 0x3c7   : >> { %v2032_v53 = vmul.f32 %v4783_v51, %v7571_v54  ;;  %v2033_v55 = vmul.f32 %v4784_v47, %v7571_v54  ;;  %v2005_v56 = vadd.f32 %v1997_v43, %v1943_v37  ;;  %v2006_v45 = vadd.f32 %v1998_v4, %v1944_v20  ;;  %v4793_v20 = vld [vmem:[%s7528_s1 + $0x1b0] sm:$0xff]  ;;  %v4797_v43 = vld [vmem:[%s7528_s1 + $0x1c0] sm:$0xff]  ;;  %v4798_v4 = vld [vmem:[%s7528_s1 + $0x1c8] sm:$0xff] }
 0x3c8   : >> { %v2007_v0 = vadd.f32 %v1999_v49, %v1945_v41  ;;  %v2008_v29 = vadd.f32 %v2000_v59, %v1946_v7  ;;  %v2009_v5 = vadd.f32 %v2001_v57, %v1947_v44  ;;  %v2010_v63 = vadd.f32 %v2002_v62, %v1948_v3  ;;  %v4799_v51 = vld [vmem:[%s7528_s1 + $0x1d0] sm:$0xff]  ;;  %v4802_v47 = vld [vmem:[%s7528_s1 + $0x1e8] sm:$0xff] }
 0x3c9   : >> { %v2034_v52 = vadd.f32 %v2026_v61, %v1972_v2  ;;  %v2035_v30 = vadd.f32 %v2027_v16, %v1973_v1  ;;  %v2036_v34 = vadd.f32 %v2028_v26, %v1974_v50  ;;  %v2037_v54 = vadd.f32 %v2029_v27, %v1975_v60  ;;  %v4803_v62 = vld [vmem:[%s7528_s1 + $0x1f0] sm:$0xff]  ;;  %v4804_v61 = vld [vmem:[%s7528_s1 + $0x1f8] sm:$0xff] }
 0x3ca   : >> { %v2038_v37 = vadd.f32 %v2030_v10, %v1976_v28  ;;  %v8654_v41 = vsub.s32 6, %v7521_v17  ;;  %v2039_v44 = vadd.f32 %v2031_v33, %v1977_v25  ;;  %v2040_v3 = vadd.f32 %v2032_v53, %v1978_v39  ;;  %v4800_v39 = vld [vmem:[%s7528_s1 + $0x1d8] sm:$0xff] }
 0x3cb   : >> { %v2041_v2 = vadd.f32 %v2033_v55, %v1979_v46  ;;  %v8655_v1 = vsub.s32 7, %v7521_v17  ;;  %v4801_v46 = vld [vmem:[%s7528_s1 + $0x1e0] sm:$0xff]  ;;  %s8688_s1 = sld [smem:[#allocation54_spill]] (%p7709_p8) }
 0x3cc   : >> { %v2056_v7 = vrot.slane %v7523_v18, %v8654_v41 }
 0x3cd   : >> { %v2087_v50 = vrot.slane %v7523_v18, %v8655_v1 }
 0x3ce   : >> { %v2057_v36 = vmul.f32 %v4787_v35, %v2056_v7  ;;  %v2058_v60 = vmul.f32 %v4788_v6, %v2056_v7  ;;  %v2059_v28 = vmul.f32 %v4789_v38, %v2056_v7  ;;  %v2060_v48 = vmul.f32 %v4790_v11, %v2056_v7 }
 0x3cf   : >> { %v2061_v49 = vmul.f32 %v4791_v9, %v2056_v7  ;;  %v2062_v59 = vmul.f32 %v4792_v42, %v2056_v7  ;;  %v2063_v58 = vmul.f32 %v4793_v20, %v2056_v7  ;;  %v2064_v25 = vmul.f32 %v4794_v32, %v2056_v7 }
 0x3d0   : >> { %v7673_v11 = vadd.f32 %v2057_v36, %v2003_v19   ;;  %v7675_v9 = vadd.f32 %v2058_v60, %v2004_v22   ;;  %v7677_v7 = vadd.f32 %v2059_v28, %v2005_v56   ;;  %v7679_v6 = vadd.f32 %v2060_v48, %v2006_v45   ;;  %v2420_v28 = vld [vmem:[%s8687_s7 + $0x10] sm:$0xff] (%p7709_p8) }
 0x3d1   : >> { %v7684_v27 = vadd.f32 %v2061_v49, %v2007_v0   ;;  %v7686_v10 = vadd.f32 %v2062_v59, %v2008_v29   ;;  %v7688_v33 = vadd.f32 %v2063_v58, %v2009_v5   ;;  %v7690_v53 = vadd.f32 %v2064_v25, %v2010_v63   ;;  %v5733_v48 = vld [vmem:[#allocation11 + $0x74] ss:$8 sps:$4 sm:$0xff] (%p7709_p8)   ;;  %v5735_v49 = vld [vmem:[#allocation11 + $0x70] ss:$8 sps:$4 sm:$0xff] (%p7709_p8)  }
 0x3d2   : >> { %v8656_v57 = vmov %v7673_v11  ;;  %v8657_v18 = vmov %v7675_v9  ;;  %v8658_v16 = vmov %v7677_v7  ;;  %v8659_v26 = vmov %v7679_v6 }
 0x3d3   : >> { %v2088_v55 = vmul.f32 %v4797_v43, %v2087_v50  ;;  %v2089_v19 = vmul.f32 %v4798_v4, %v2087_v50  ;;  %v2090_v35 = vmul.f32 %v4799_v51, %v2087_v50  ;;  %v2091_v22 = vmul.f32 %v4800_v39, %v2087_v50  ;;  %v2416_v43 = vld [vmem:[#allocation14 + $0x10] sm:$0xff] (%p7709_p8)  ;;  %v2643_v39 = vld [vmem:[%s8688_s1] sm:$0xff] (%p7709_p8) }
 0x3d4   : >> { %v2092_v38 = vmul.f32 %v4801_v46, %v2087_v50  ;;  %v2093_v56 = vmul.f32 %v4802_v47, %v2087_v50  ;;  %v2094_v11 = vmul.f32 %v4803_v62, %v2087_v50  ;;  %v2095_v45 = vmul.f32 %v4804_v61, %v2087_v50  ;;  %v5718_v50 = vld [vmem:[#allocation11 + $0x24] ss:$8 sps:$4 sm:$0xff] (%p7709_p8)  }
 0x3d5   : >> { %v7692_v63 = vadd.f32 %v2088_v55, %v2034_v52   ;;  %v7694_v62 = vadd.f32 %v2089_v19, %v2035_v30   ;;  %v7696_v61 = vadd.f32 %v2090_v35, %v2036_v34   ;;  %v7698_v60 = vadd.f32 %v2091_v22, %v2037_v54   ;;  %v5712_v52 = vld [vmem:[#allocation11 + $0x4] ss:$8 sps:$4 sm:$0xff] (%p7709_p8)   ;;  %v5714_v34 = vld [vmem:[#allocation11] ss:$8 sps:$4 sm:$0xff] (%p7709_p8)   ;;  %v2646_v55 = vld [vmem:[%s8688_s1 + $0x18] sm:$0xff] (%p7709_p8) }
 0x3d6   : >> { %v7700_v59 = vadd.f32 %v2092_v38, %v2038_v37   ;;  %v7702_v58 = vadd.f32 %v2093_v56, %v2039_v44   ;;  %v7704_v51 = vadd.f32 %v2094_v11, %v2040_v3   ;;  %v7706_v47 = vadd.f32 %v2095_v45, %v2041_v2   ;;  %1836 = sbr.rel (!%p7709_p8) target bundleno = 938 (0x3aa), region = 261  ;;  %2228 = vmatprep.subr.bf16.mxu1 (%p7709_p8), %v5712_v52  ;;  %v5715_v37 = vld [vmem:[#allocation11 + $0x14] ss:$8 sps:$4 sm:$0xff] (%p7709_p8)   ;;  %v5717_v44 = vld [vmem:[#allocation11 + $0x10] ss:$8 sps:$4 sm:$0xff] (%p7709_p8)   ;;  %v2644_v46 = vld [vmem:[%s8688_s1 + $0x8] sm:$0xff] (%p7709_p8) }
 0x3d7   : >> { %v8660_v42 = vmov %v7692_v63  ;;  %v8661_v20 = vmov %v7694_v62  ;;  %v8662_v0 = vmov %v7696_v61  ;;  %v8663_v29 = vmov %v7698_v60  ;;  %2229 = vmatpush1.bf16.msra.mxu1 (%p7709_p8), %v5714_v34  ;;  %v5739_v19 = vld [vmem:[#allocation9 + $0x10] ss:$8 sps:$4 sm:$0xff] (%p7709_p8)   ;;  %v5744_v35 = vld [vmem:[#allocation9 + $0x24] ss:$8 sps:$4 sm:$0xff] (%p7709_p8)   ;;  %v5742_v56 = vld [vmem:[#allocation9 + $0x20] ss:$8 sps:$4 sm:$0xff] (%p7709_p8)  }
 0x3d8   : >> { %v8664_v32 = vmov %v7700_v59  ;;  %v8665_v41 = vmov %v7702_v58  ;;  %v8666_v1 = vmov %v7704_v51  ;;  %v8667_v36 = vmov %v7706_v47  ;;  %2230 = vmatprep.subr.bf16.mxu1 (%p7709_p8), %v5715_v37  ;;  %v5754_v52 = vld [vmem:[#allocation9 + $0x60] ss:$8 sps:$4 sm:$0xff] (%p7709_p8)   ;;  %v5759_v34 = vld [vmem:[#allocation9 + $0x74] ss:$8 sps:$4 sm:$0xff] (%p7709_p8)  }
 0x3d9   : >> { %v8669_v47 = vmov %v8667_v36  ;;  %v8670_v51 = vmov %v8666_v1  ;;  %v8671_v58 = vmov %v8665_v41  ;;  %v8672_v59 = vmov %v8664_v32 }
 0x3da   : >> { %v8673_v60 = vmov %v8663_v29  ;;  %v8674_v61 = vmov %v8662_v0  ;;  %v8675_v62 = vmov %v8661_v20  ;;  %v8676_v63 = vmov %v8660_v42  ;;  %v2421_v59 = vld [vmem:[%s8687_s7 + $0x18] sm:$0xff] (%p7709_p8)  ;;  %v5738_v58 = vld [vmem:[#allocation9 + $0x4] ss:$8 sps:$4 sm:$0xff] (%p7709_p8)  }
 0x3db   : >> { %v8677_v2 = vmov %v7690_v53  ;;  %v8678_v3 = vmov %v7688_v33  ;;  %v8679_v4 = vmov %v7686_v10  ;;  %v8680_v5 = vmov %v7684_v27  ;;  %2231 = vmatpush1.bf16.msra.mxu1 (%p7709_p8), %v5717_v44  ;;  %v5727_v63 = vld [vmem:[#allocation11 + $0x54] ss:$8 sps:$4 sm:$0xff] (%p7709_p8)   ;;  %v5732_v60 = vld [vmem:[#allocation11 + $0x60] ss:$8 sps:$4 sm:$0xff] (%p7709_p8)  }
 0x3dc   : >> { %v8681_v6 = vmov %v8659_v26  ;;  %v8682_v7 = vmov %v8658_v16  ;;  %v8683_v9 = vmov %v8657_v18  ;;  %v8684_v11 = vmov %v8656_v57  ;;  %2232 = vmatprep.subr.bf16.mxu1 (%p7709_p8), %v5718_v50  ;;  %v5724_v5 = vld [vmem:[#allocation11 + $0x44] ss:$8 sps:$4 sm:$0xff] (%p7709_p8)   ;;  %v2417_v47 = vld [vmem:[#allocation14 + $0x18] sm:$0xff] (%p7709_p8)  ;;  %v5736_v62 = vld [vmem:[#allocation9] ss:$8 sps:$4 sm:$0xff] (%p7709_p8)  }
 0x3dd   : > { %v8685_v30 = vmov 0   ;;  %v8686_v54 = vmov 0.0   ;;  %v5723_v6 = vld [vmem:[#allocation11 + $0x30] ss:$8 sps:$4 sm:$0xff]   ;;  %v5730_v7 = vld [vmem:[#allocation11 + $0x64] ss:$8 sps:$4 sm:$0xff]   ;;  %v2108_v25 = vadd.f32 %v8664_v32, %v7684_v27  ;;  %v2109_v51 = vadd.f32 %v8665_v41, %v7686_v10 }
 0x3de   : > { %2260 = vmatprep.mubr.bf16.mxu1 %v8685_v30  ;;  %2518 = vmatprep.mubr.f32.mxu0 %v8686_v54  ;;  %v5729_v9 = vld [vmem:[#allocation11 + $0x50] ss:$8 sps:$4 sm:$0xff]   ;;  %v2414_v3 = vld [vmem:[#allocation14] sm:$0xff]  ;;  %v2419_v4 = vld [vmem:[%s8687_s7 + $0x8] sm:$0xff]  ;;  %v2110_v22 = vadd.f32 %v8666_v1, %v7688_v33  ;;  %v2111_v38 = vadd.f32 %v8667_v36, %v7690_v53  ;;  %v2104_v37 = vadd.f32 %v8660_v42, %v8656_v57 }
 0x3df   : > { %5710 = vset.pattern.permute.xlu0 %v8685_v30  ;;  %5711 = vset.pattern.permute.xlu1 %v8685_v30  ;;  %v2418_v2 = vld [vmem:[%s8687_s7] sm:$0xff]  ;;  %v2130_v61 = vpack.c.bf16 %v2109_v51, %v2108_v25  ;;  %v5741_v27 = vld [vmem:[#allocation9 + $0x14] ss:$8 sps:$4 sm:$0xff]   ;;  %v5745_v32 = vld [vmem:[#allocation9 + $0x30] ss:$8 sps:$4 sm:$0xff]   ;;  %v2105_v44 = vadd.f32 %v8661_v20, %v8657_v18 }
 0x3e0   : > { %2233 = vmatpush1.bf16.msra.mxu1 %v5720_v14  ;;  %4837 = vmatmul.mubr.msk.f32.vlgmr.msra.gmra.mrb[20].mxu0 %vm1292_vm5, %v2414_v3  ;;  %v2645_v10 = vld [vmem:[%s8688_s1 + $0x10] sm:$0xff]  ;;  %v2131_v45 = vpack.c.bf16 %v2111_v38, %v2110_v22  ;;  %v5750_v41 = vld [vmem:[#allocation9 + $0x44] ss:$8 sps:$4 sm:$0xff]   ;;  %v5748_v33 = vld [vmem:[#allocation9 + $0x40] ss:$8 sps:$4 sm:$0xff]  }
 0x3e1   : > { %2234 = vmatprep.subr.bf16.mxu1 %v5721_v12  ;;  %2524 = vmatprep.mubr.f32.mxu0 %v8686_v54  ;;  %v5747_v11 = vld [vmem:[#allocation9 + $0x34] ss:$8 sps:$4 sm:$0xff]   ;;  %v5751_v1 = vld [vmem:[#allocation9 + $0x50] ss:$8 sps:$4 sm:$0xff]   ;;  %v5756_v36 = vld [vmem:[#allocation9 + $0x64] ss:$8 sps:$4 sm:$0xff]   ;;  %v2112_v14 = vpack.c.bf16 %v2105_v44, %v2104_v37  ;;  %v2106_v12 = vadd.f32 %v8662_v0, %v8658_v16 }
 0x3e2   : > { %2424 = vperm.xlu0 %5710, %v2418_v2   ;;  %2434 = vperm.xlu1 %5711, %v2420_v28   ;;  %v5753_v53 = vld [vmem:[#allocation9 + $0x54] ss:$8 sps:$4 sm:$0xff]   ;;  %v5757_v50 = vld [vmem:[#allocation9 + $0x70] ss:$8 sps:$4 sm:$0xff]   ;;  %v5760_v57 = vld [vmem:[#allocation8 + $0x40] sm:$0xff]  }
 0x3e3   : > { %v5761_v42 = vld [vmem:[#allocation8] sm:$0xff]   ;;  %v5762_v18 = vld [vmem:[#allocation8 + $0x48] sm:$0xff]   ;;  %v5766_v16 = vld [vmem:[#allocation8 + $0x58] sm:$0xff]  }
 0x3e4   : > { %2235 = vmatpush1.bf16.msra.mxu1 %v5723_v6  ;;  %4838 = vmatmul.mubr.msk.f32.gmra.mrb[22].mxu0 %vm1292_vm5, %v2415_v13  ;;  %v2107_v6 = vadd.f32 %v8663_v29, %v8659_v26  ;;  %v5763_v20 = vld [vmem:[#allocation8 + $0x8] sm:$0xff]   ;;  %v5767_v0 = vld [vmem:[#allocation8 + $0x18] sm:$0xff]   ;;  %v5769_v26 = vld [vmem:[#allocation8 + $0x20] sm:$0xff]  }
 0x3e5   : > { %2236 = vmatprep.subr.bf16.mxu1 %v5724_v5  ;;  %2530 = vmatprep.mubr.f32.mxu0 %v8686_v54  ;;  %v5770_v29 = vld [vmem:[#allocation8 + $0x68] sm:$0xff]   ;;  %v5773_v3 = vld [vmem:[#allocation8 + $0x30] sm:$0xff]   ;;  %v5774_v13 = vld [vmem:[#allocation8 + $0x78] sm:$0xff]  }
 0x3e6   : > { %2429 = vperm.xlu0 %5710, %v2419_v4   ;;  %2439 = vperm.xlu1 %5711, %v2421_v59   ;;  %v2113_v5 = vpack.c.bf16 %v2107_v6, %v2106_v12  ;;  %v5775_v2 = vld [vmem:[#allocation8 + $0x38] sm:$0xff]  }
 0x3e8   : > { %2237 = vmatpush1.bf16.msra.mxu1 %v5726_v15  ;;  %4839 = vmatmul.mubr.msk.f32.gmra.mrb[24].mxu0 %vm1292_vm5, %v2416_v43  ;;  %v5764_v15 = vld [vmem:[#allocation8 + $0x50] sm:$0xff]  }
 0x3e9   : > { %2238 = vmatprep.subr.bf16.mxu1 %v5727_v63  ;;  %2536 = vmatprep.mubr.f32.mxu0 %v8686_v54  ;;  %v5765_v63 = vld [vmem:[#allocation8 + $0x10] sm:$0xff]  }
 0x3ea   : > { %2649 = vperm.xlu0 %5710, %v2643_v39   ;;  %2654 = vperm.xlu1 %5711, %v2644_v46  }
 0x3ec   : > { %2239 = vmatpush1.bf16.msra.mxu1 %v5729_v9  ;;  %4840 = vmatmul.mubr.msk.f32.gmra.mrb[26].mxu0 %vm1292_vm5, %v2417_v47  ;;  %v5768_v9 = vld [vmem:[#allocation8 + $0x60] sm:$0xff]  }
 0x3ed   : > { %2240 = vmatprep.subr.bf16.mxu1 %v5730_v7  ;;  %2743 = vmatprep.mubr.f32.mxu0 %v8686_v54  ;;  %v5772_v7 = vld [vmem:[#allocation8 + $0x70] sm:$0xff]  }
 0x3ee   : > { %2659 = vperm.xlu0 %5710, %v2645_v10   ;;  %2664 = vperm.xlu1 %5711, %v2646_v55  }
 0x3f0   : > { %2241 = vmatpush1.bf16.msra.mxu1 %v5732_v60 }
 0x3f1   : > { %2242 = vmatprep.subr.bf16.mxu1 %v5733_v48 }
 0x3f4   : > { %2243 = vmatpush1.bf16.msra.mxu1 %v5735_v49 }
 0x3f5   : > { %2361 = vmatprep.subr.bf16.mxu1 %v5738_v58 }
 0x3f7   : > { %2261 = vmatmul.mubr.bf16.vlgmr.msra.gmra.mrb[20].mxu1 %v2130_v61 }
 0x3f8   : > { %2362 = vmatpush1.bf16.msra.mxu1 %v5736_v62  ;;  %2270 = vmatprep.mubr.bf16.mxu1 %v8685_v30 }
 0x3f9   : > { %2363 = vmatprep.subr.bf16.mxu1 %v5741_v27 }
 0x3fc   : > { %2364 = vmatpush1.bf16.msra.mxu1 %v5739_v19 }
 0x3fd   : > { %2365 = vmatprep.subr.bf16.mxu1 %v5744_v35 }
 0x3ff   : > { %2271 = vmatmul.mubr.bf16.gmra.mrb[24].mxu1 %v2131_v45 }
 0x400   : > { %2366 = vmatpush1.bf16.msra.mxu1 %v5742_v56  ;;  %2393 = vmatprep.mubr.bf16.mxu1 %v8685_v30 }
 0x401   : > { %2367 = vmatprep.subr.bf16.mxu1 %v5747_v11 }
 0x404   : > { %2368 = vmatpush1.bf16.msra.mxu1 %v5745_v32 }
 0x405   : > { %2369 = vmatprep.subr.bf16.mxu1 %v5750_v41 }
 0x408   : > { %2370 = vmatpush1.bf16.msra.mxu1 %v5748_v33 }
 0x409   : > { %2371 = vmatprep.subr.bf16.mxu1 %v5753_v53 }
 0x40c   : > { %2372 = vmatpush1.bf16.msra.mxu1 %v5751_v1 }
 0x40d   : > { %2373 = vmatprep.subr.bf16.mxu1 %v5756_v36 }
 0x410   : > { %2374 = vmatpush1.bf16.msra.mxu1 %v5754_v52 }
 0x411   : > { %2375 = vmatprep.subr.bf16.mxu1 %v5759_v34 }
 0x414   : > { %2376 = vmatpush1.bf16.msra.mxu1 %v5757_v50 }
 0x415   : > { %5101 = vmatprep.subr.bf16.mxu1 %v5760_v57 }
 0x417   : > { %2394 = vmatmul.mubr.bf16.vlgmr.msra.gmra.mrb[20].mxu1 %v2112_v14 }
 0x418   : > { %2403 = vmatprep.mubr.bf16.mxu1 %v8685_v30  ;;  %5102 = vmatpush3.bf16.msra.mxu1 %v5761_v42  ;;  %v5771_v30 = vld [vmem:[#allocation8 + $0x28] sm:$0xff]  }
 0x419   : > { %5103 = vmatprep.subr.bf16.mxu1 %v5762_v18 }
 0x41c   : > { %5104 = vmatpush3.bf16.msra.mxu1 %v5763_v20 }
 0x41d   : > { %5105 = vmatprep.subr.bf16.mxu1 %v5764_v15 }
 0x41f   : > { %2404 = vmatmul.mubr.bf16.gmra.mrb[24].mxu1 %v2113_v5 }
 0x420   : > { %5106 = vmatpush3.bf16.msra.mxu1 %v5765_v63 }
 0x421   : > { %5107 = vmatprep.subr.bf16.mxu1 %v5766_v16 }
 0x424   : > { %5108 = vmatpush3.bf16.msra.mxu1 %v5767_v0 }
 0x425   : > { %5109 = vmatprep.subr.bf16.mxu1 %v5768_v9 }
 0x428   : > { %5110 = vmatpush3.bf16.msra.mxu1 %v5769_v26 }
 0x429   : > { %5111 = vmatprep.subr.bf16.mxu1 %v5770_v29 }
 0x42c   : > { %5112 = vmatpush3.bf16.msra.mxu1 %v5771_v30 }
 0x42d   : > { %5113 = vmatprep.subr.bf16.mxu1 %v5772_v7 }
 0x430   : > { %5114 = vmatpush3.bf16.msra.mxu1 %v5773_v3 }
 0x431   : > { %5115 = vmatprep.subr.bf16.mxu1 %v5774_v13 }
 0x434   : > { %5116 = vmatpush3.bf16.msra.mxu1 %v5775_v2 }
 0x461   : > { %v2425_v25 = vpop.permute.xlu0 %2424  ;;  %v2435_v35 = vpop.permute.xlu1 %2434 }
 0x465   : > { %v2430_v51 = vpop.permute.xlu0 %2429  ;;  %v2440_v14 = vpop.permute.xlu1 %2439 }
 0x4b3   : > { %v2520_v60 = vpop.f32.mrb[20].mxu0 }
 0x4b4   : > { %v2522_v28 = vpop.f32.mrb[21].mxu0  ;;  %v2521_v39 = vadd.f32 %v2520_v60, %v2425_v25 }
 0x4b5   : > { %v2523_v47 = vadd.f32 %v2522_v28, %v2425_v25 }
 0x4b7   : > { %v2526_v48 = vpop.f32.mrb[22].mxu0 }
 0x4b8   : > { %v2528_v43 = vpop.f32.mrb[23].mxu0  ;;  %v2527_v46 = vadd.f32 %v2526_v48, %v2430_v51 }
 0x4b9   : > { %v2529_v62 = vadd.f32 %v2528_v43, %v2430_v51 }
 0x4bb   : > { %v2532_v4 = vpop.f32.mrb[24].mxu0 }
 0x4bc   : > { %v2534_v49 = vpop.f32.mrb[25].mxu0  ;;  %v2533_v52 = vadd.f32 %v2532_v4, %v2435_v35 }
 0x4bd   : > { %v2535_v44 = vadd.f32 %v2534_v49, %v2435_v35 }
 0x4bf   : > { %v2538_v59 = vpop.f32.mrb[26].mxu0 }
 0x4c0   : > { %v2540_v58 = vpop.f32.mrb[27].mxu0  ;;  %v2539_v20 = vadd.f32 %v2538_v59, %v2440_v14 }
 0x4c1   : > { %v2541_v9 = vadd.f32 %v2540_v58, %v2440_v14 }
 0x4ea   : > { %v2395_v61 = vpop.f32.mrb[20].mxu1 }
 0x4eb   : > { %v7824_v27 = vadd.f32 %v2521_v39, %v2395_v61  ;;  %v2397_v10 = vpop.f32.mrb[21].mxu1 }
 0x4ec   : > { %v7826_v55 = vadd.f32 %v2523_v47, %v2397_v10  ;;  %v2399_v19 = vpop.f32.mrb[22].mxu1 }
 0x4ed   : > { %v2559_v22 = vmul.f32 %v7824_v27, %v7824_v27  ;;  %v7830_v38 = vadd.f32 %v2527_v46, %v2399_v19  ;;  %v2401_v56 = vpop.f32.mrb[23].mxu1 }
 0x4ee   : > { %v2560_v11 = vmul.f32 %v7826_v55, %v7826_v55  ;;  %v7834_v45 = vadd.f32 %v2529_v62, %v2401_v56 }
 0x4ef   : > { %v2567_v32 = vmul.f32 %v2559_v22, %v7824_v27  ;;  %v2561_v41 = vmul.f32 %v7830_v38, %v7830_v38 }
 0x4f0   : > { %v2568_v33 = vmul.f32 %v2560_v11, %v7826_v55  ;;  %v2562_v53 = vmul.f32 %v7834_v45, %v7834_v45 }
 0x4f1   : > { %v2575_v1 = vmul.f32 0.044715, %v2567_v32  ;;  %v2569_v36 = vmul.f32 %v2561_v41, %v7830_v38  ;;  %v2551_v41 = vmul.f32 0.5, %v7824_v27 }
 0x4f2   : > { %v2576_v34 = vmul.f32 0.044715, %v2568_v33  ;;  %v2570_v37 = vmul.f32 %v2562_v53, %v7834_v45  ;;  %v2405_v50 = vpop.f32.mrb[24].mxu1 }
 0x4f3   : > { %v2583_v12 = vadd.f32 %v2575_v1, %v7824_v27  ;;  %v2577_v6 = vmul.f32 0.044715, %v2569_v36  ;;  %v7845_v5 = vadd.f32 %v2533_v52, %v2405_v50  ;;  %v2407_v57 = vpop.f32.mrb[25].mxu1  ;;  %v2552_v1 = vmul.f32 0.5, %v7826_v55 }
 0x4f4   : > { %v2584_v42 = vadd.f32 %v2576_v34, %v7826_v55  ;;  %v2578_v18 = vmul.f32 0.044715, %v2570_v37  ;;  %v7848_v15 = vadd.f32 %v2535_v44, %v2407_v57  ;;  %v2409_v63 = vpop.f32.mrb[26].mxu1  ;;  %v2553_v34 = vmul.f32 0.5, %v7830_v38 }
 0x4f5   : > { %v2591_v16 = vmul.f32 0.7978846, %v2583_v12  ;;  %v2585_v0 = vadd.f32 %v2577_v6, %v7830_v38  ;;  %v2563_v26 = vmul.f32 %v7845_v5, %v7845_v5  ;;  %v2411_v29 = vpop.f32.mrb[27].mxu1  ;;  %v7856_v13 = vadd.f32 %v2539_v20, %v2409_v63 }
 0x4f6   : > { %v2592_v30 = vmul.f32 0.7978846, %v2584_v42  ;;  %v2586_v7 = vadd.f32 %v2578_v18, %v7834_v45  ;;  %v2564_v3 = vmul.f32 %v7848_v15, %v7848_v15  ;;  %v7859_v28 = vadd.f32 %v2541_v9, %v2411_v29 }
 0x4f7   : > { %5792 = vtanh.f32 %v2591_v16  ;;  %v2593_v2 = vmul.f32 0.7978846, %v2585_v0  ;;  %v2571_v60 = vmul.f32 %v2563_v26, %v7845_v5  ;;  %v2565_v49 = vmul.f32 %v7856_v13, %v7856_v13 }
 0x4f8   : > { %5794 = vtanh.f32 %v2592_v30  ;;  %v2594_v48 = vmul.f32 0.7978846, %v2586_v7  ;;  %v2572_v43 = vmul.f32 %v2564_v3, %v7848_v15  ;;  %v2566_v59 = vmul.f32 %v7859_v28, %v7859_v28 }
 0x4f9   : > { %5796 = vtanh.f32 %v2593_v2  ;;  %v2579_v4 = vmul.f32 0.044715, %v2571_v60  ;;  %v2573_v51 = vmul.f32 %v2565_v49, %v7856_v13  ;;  %v2554_v50 = vmul.f32 0.5, %v7834_v45 }
 0x4fa   : > { %5798 = vtanh.f32 %v2594_v48  ;;  %v2580_v58 = vmul.f32 0.044715, %v2572_v43  ;;  %v2574_v39 = vmul.f32 %v2566_v59, %v7859_v28  ;;  %v2555_v63 = vmul.f32 0.5, %v7845_v5  ;;  %v8689_v43 = vld [vmem:[#allocation37_spill] sm:$0xff]  ;;  %v8690_v59 = vld [vmem:[#allocation38_spill] sm:$0xff] }
 0x4fb   : > { %v2587_v25 = vadd.f32 %v2579_v4, %v7845_v5  ;;  %v2581_v62 = vmul.f32 0.044715, %v2573_v51  ;;  %v2557_v30 = vmul.f32 0.5, %v7856_v13  ;;  %v2558_v5 = vmul.f32 0.5, %v7859_v28 }
 0x4fc   : > { %v2588_v46 = vadd.f32 %v2580_v58, %v7848_v15  ;;  %v2582_v61 = vmul.f32 0.044715, %v2574_v39 }
 0x4fd   : > { %v2595_v47 = vmul.f32 0.7978846, %v2587_v25  ;;  %v2589_v19 = vadd.f32 %v2581_v62, %v7856_v13  ;;  %v5778_v62 = vld [vmem:[#allocation6 + $0x48] sm:$0xff]  }
 0x4fe   : > { %v2596_v10 = vmul.f32 0.7978846, %v2588_v46  ;;  %v2590_v35 = vadd.f32 %v2582_v61, %v7859_v28  ;;  %v5776_v28 = vld [vmem:[#allocation6 + $0x40] sm:$0xff]  }
 0x4ff   : > { %5800 = vtanh.f32 %v2595_v47  ;;  %v2597_v56 = vmul.f32 0.7978846, %v2589_v19  ;;  %v2639_v46 = vld [vmem:[#allocation17] sm:$0xff]  ;;  %v5779_v19 = vld [vmem:[#allocation6 + $0x8] sm:$0xff]  }
 0x500   : > { %5802 = vtanh.f32 %v2596_v10  ;;  %v2598_v11 = vmul.f32 0.7978846, %v2590_v35  ;;  %v5777_v47 = vld [vmem:[#allocation6] sm:$0xff]   ;;  %v2640_v10 = vld [vmem:[#allocation17 + $0x8] sm:$0xff] }
 0x501   : > { %v5793_v22 = vpop.eup %5792  ;;  %5804 = vtanh.f32 %v2597_v56 }
 0x502   : > { %v5795_v32 = vpop.eup %5794  ;;  %v2607_v33 = vadd.f32 1.0, %v5793_v22  ;;  %5806 = vtanh.f32 %v2598_v11  ;;  %v5780_v22 = vld [vmem:[#allocation6 + $0x50] sm:$0xff]  }
 0x503   : > { %v5797_v53 = vpop.eup %5796  ;;  %v2608_v36 = vadd.f32 1.0, %v5795_v32 }
 0x504   : > { %v5799_v52 = vpop.eup %5798  ;;  %v2609_v37 = vadd.f32 1.0, %v5797_v53  ;;  %v2615_v44 = vmul.f32 %v2607_v33, %v2551_v41  ;;  %v2641_v33 = vld [vmem:[#allocation17 + $0x10] sm:$0xff] }
 0x505   : > { %v2610_v14 = vadd.f32 1.0, %v5799_v52  ;;  %v2616_v12 = vmul.f32 %v2608_v36, %v2552_v1  ;;  %v5781_v53 = vld [vmem:[#allocation6 + $0x10] sm:$0xff]   ;;  %v5782_v1 = vld [vmem:[#allocation6 + $0x58] sm:$0xff]  }
 0x506   : > { %v2617_v6 = vmul.f32 %v2609_v37, %v2553_v34  ;;  %v2623_v57 = vadd.f32 %v2615_v44, %v7415_v21  ;;  %v2556_v21 = vmul.f32 0.5, %v7848_v15  ;;  %v2642_v36 = vld [vmem:[#allocation17 + $0x18] sm:$0xff]  ;;  %v5784_v34 = vld [vmem:[#allocation6 + $0x60] sm:$0xff]   ;;  %v5786_v44 = vld [vmem:[#allocation6 + $0x68] sm:$0xff]  }
 0x507   : > { %v2618_v27 = vmul.f32 %v2610_v14, %v2554_v50  ;;  %v2624_v42 = vadd.f32 %v2616_v12, %v7417_v24  ;;  %v5783_v52 = vld [vmem:[#allocation6 + $0x18] sm:$0xff]   ;;  %v5785_v37 = vld [vmem:[#allocation6 + $0x20] sm:$0xff]   ;;  %v5787_v50 = vld [vmem:[#allocation6 + $0x28] sm:$0xff]  }
 0x508   : > { %v2625_v18 = vadd.f32 %v2617_v6, %v7421_v8  ;;  %5808 = vtanh.f32 %v2623_v57  ;;  %v5788_v14 = vld [vmem:[#allocation6 + $0x70] sm:$0xff]   ;;  %v5791_v6 = vld [vmem:[#allocation6 + $0x38] sm:$0xff]  }
 0x509   : > { %v5801_v55 = vpop.eup %5800  ;;  %v2626_v20 = vadd.f32 %v2618_v27, %v7423_v31  ;;  %5810 = vtanh.f32 %v2624_v42  ;;  %v5789_v12 = vld [vmem:[#allocation6 + $0x30] sm:$0xff]   ;;  %v2650_v27 = vpop.permute.xlu0 %2649 }
 0x50a   : > { %v5803_v38 = vpop.eup %5802  ;;  %5812 = vtanh.f32 %v2625_v18  ;;  %v5157_v45 = vpack.c.bf16 %v2625_v18, %v2623_v57  ;;  %v2611_v16 = vadd.f32 1.0, %v5801_v55 }
 0x50b   : > { %5814 = vtanh.f32 %v2626_v20  ;;  %v5155_v0 = vpack.c.bf16 %v2626_v20, %v2624_v42  ;;  %v2612_v9 = vadd.f32 1.0, %v5803_v38  ;;  %v5805_v24 = vpop.eup %5804 }
 0x50c   : > { %v2619_v26 = vmul.f32 %v2611_v16, %v2555_v63  ;;  %v5807_v29 = vpop.eup %5806  ;;  %v2613_v31 = vadd.f32 1.0, %v5805_v24 }
 0x50d   : > { %5156 = vmatprep.subr.bf16.mxu0 %v5155_v0  ;;  %v2620_v8 = vmul.f32 %v2612_v9, %v2556_v21  ;;  %v2614_v3 = vadd.f32 1.0, %v5807_v29  ;;  %v2655_v9 = vpop.permute.xlu1 %2654 }
 0x50e   : > { %5158 = vmatpush1.bf16.msra.mxu0 %v5157_v45  ;;  %v2627_v7 = vadd.f32 %v2619_v26, %v7426_v40  ;;  %v2621_v60 = vmul.f32 %v2613_v31, %v2557_v30 }
 0x50f   : > { %v2628_v2 = vadd.f32 %v2620_v8, %v7428_v23  ;;  %v2622_v48 = vmul.f32 %v2614_v3, %v2558_v5  ;;  %v2660_v5 = vpop.permute.xlu0 %2659 }
 0x510   : > { %v2629_v4 = vadd.f32 %v2621_v60, %v8689_v43  ;;  %5816 = vtanh.f32 %v2627_v7 }
 0x511   : > { %v2630_v58 = vadd.f32 %v2622_v48, %v8690_v59  ;;  %5818 = vtanh.f32 %v2628_v2 }
 0x512   : > { %v5809_v15 = vpop.eup %5808  ;;  %5820 = vtanh.f32 %v2629_v4  ;;  %v5161_v25 = vpack.c.bf16 %v2629_v4, %v2627_v7 }
 0x513   : > { %v5811_v49 = vpop.eup %5810  ;;  %5822 = vtanh.f32 %v2630_v58  ;;  %v5159_v40 = vpack.c.bf16 %v2630_v58, %v2628_v2 }
 0x514   : > { %v5813_v13 = vpop.eup %5812 }
 0x515   : > { %v5815_v51 = vpop.eup %5814  ;;  %v7888_v39 = vpack.c.bf16 %v5813_v13, %v5809_v15  ;;  %5160 = vmatprep.subr.bf16.mxu0 %v5159_v40 }
 0x516   : > { %v7890_v23 = vpack.c.bf16 %v5815_v51, %v5811_v49  ;;  %5162 = vmatpush1.bf16.msra.mxu0 %v5161_v25 }
 0x517   : > { %5073 = vmatprep.subr.bf16.mxu0 %v5776_v28 }
 0x518   : > { %3185 = vmatprep.mubr.bf16.mxu1 %v7890_v23 }
 0x519   : > { %3186 = vmatmul.mubr.bf16.vlgmr.msra.gmra.mrb[28].mxu1 %v7888_v39  ;;  %4841 = vmatmul.mubr.msk.f32.vlgmr.msra.gmra.mrb[28].mxu0 %vm1292_vm5, %v2639_v46 }
 0x51a   : > { %v5817_v61 = vpop.eup %5816  ;;  %5074 = vmatpush3.bf16.msra.mxu0 %v5777_v47  ;;  %2749 = vmatprep.mubr.f32.mxu0 %v8686_v54 }
 0x51b   : > { %v5819_v35 = vpop.eup %5818  ;;  %5075 = vmatprep.subr.bf16.mxu0 %v5778_v62 }
 0x51c   : > { %v5821_v56 = vpop.eup %5820 }
 0x51d   : > { %v5823_v11 = vpop.eup %5822  ;;  %4842 = vmatmul.mubr.msk.f32.gmra.mrb[30].mxu0 %vm1292_vm5, %v2640_v10  ;;  %v7897_v32 = vpack.c.bf16 %v5821_v56, %v5817_v61 }
 0x51e   : > { %5076 = vmatpush3.bf16.msra.mxu0 %v5779_v19  ;;  %2755 = vmatprep.mubr.f32.mxu0 %v8686_v54  ;;  %v7900_v41 = vpack.c.bf16 %v5823_v11, %v5819_v35  ;;  %v2665_v11 = vpop.permute.xlu1 %2664 }
 0x51f   : > { %5077 = vmatprep.subr.bf16.mxu0 %v5780_v22 }
 0x520   : > { %3193 = vmatprep.mubr.bf16.mxu1 %v7900_v41 }
 0x521   : > { %4843 = vmatmul.mubr.msk.f32.gmra.mrb[32].mxu0 %vm1292_vm5, %v2641_v33  ;;  %3194 = vmatmul.mubr.bf16.gmra.mrb[32].mxu1 %v7897_v32 }
 0x522   : > { %5078 = vmatpush3.bf16.msra.mxu0 %v5781_v53  ;;  %2761 = vmatprep.mubr.f32.mxu0 %v8686_v54  ;;  %v5790_v54 = vld [vmem:[#allocation6 + $0x78] sm:$0xff]  }
 0x523   : > { %5079 = vmatprep.subr.bf16.mxu0 %v5782_v1 }
 0x525   : > { %4844 = vmatmul.mubr.msk.f32.gmra.mrb[34].mxu0 %vm1292_vm5, %v2642_v36 }
 0x526   : > { %5080 = vmatpush3.bf16.msra.mxu0 %v5783_v52  ;;  %3004 = vmatprep.mubr.bf16.mxu0 %v7890_v23 }
 0x527   : > { %5081 = vmatprep.subr.bf16.mxu0 %v5784_v34 }
 0x52a   : > { %5082 = vmatpush3.bf16.msra.mxu0 %v5785_v37 }
 0x52b   : > { %5083 = vmatprep.subr.bf16.mxu0 %v5786_v44 }
 0x52e   : > { %5084 = vmatpush3.bf16.msra.mxu0 %v5787_v50 }
 0x52f   : > { %5085 = vmatprep.subr.bf16.mxu0 %v5788_v14 }
 0x532   : > { %5086 = vmatpush3.bf16.msra.mxu0 %v5789_v12 }
 0x533   : > { %5087 = vmatprep.subr.bf16.mxu0 %v5790_v54 }
 0x536   : > { %5088 = vmatpush3.bf16.msra.mxu0 %v5791_v6 }
 0x539   : > { %3005 = vmatmul.mubr.bf16.vlgmr.msra.gmra.mrb[36].mxu0 %v7888_v39 }
 0x53a   : > { %3012 = vmatprep.mubr.bf16.mxu0 %v7900_v41 }
 0x541   : > { %3013 = vmatmul.mubr.bf16.gmra.mrb[40].mxu0 %v7897_v32 }
 0x5ec   : > { %v5117_v57 = vpop.f32.mrb[28].mxu1  ;;  %v2745_v18 = vpop.f32.mrb[28].mxu0 }
 0x5ed   : > { %v5118_v42 = vpop.f32.mrb[29].mxu1  ;;  %v7911_v38 = vadd.f32 %v2745_v18, %v2650_v27  ;;  %v2747_v63 = vpop.f32.mrb[29].mxu0 }
 0x5ee   : > { %v5119_v55 = vadd.f32 %v5118_v42, %v5117_v57  ;;  %v5120_v20 = vpop.f32.mrb[30].mxu1  ;;  %v7913_v16 = vadd.f32 %v2747_v63, %v2650_v27 }
 0x5ef   : > { %v5121_v45 = vpop.f32.mrb[31].mxu1  ;;  %v2776_v21 = vmul.f32 %v7911_v38, %v7911_v38 }
 0x5f0   : > { %3202 = vst [vmem:[#allocation2 + $0x20] sm:$0xff] %v5119_v55  ;;  %v5122_v0 = vadd.f32 %v5121_v45, %v5120_v20  ;;  %v2777_v26 = vmul.f32 %v7913_v16, %v7913_v16  ;;  %v2751_v24 = vpop.f32.mrb[30].mxu0 }
 0x5f1   : > { %v2784_v8 = vmul.f32 %v2776_v21, %v7911_v38  ;;  %v7920_v29 = vadd.f32 %v2751_v24, %v2655_v9  ;;  %v2753_v30 = vpop.f32.mrb[31].mxu0 }
 0x5f2   : > { %3203 = vst [vmem:[#allocation2 + $0x28] sm:$0xff] %v5122_v0  ;;  %v2785_v31 = vmul.f32 %v2777_v26, %v7913_v16  ;;  %v7923_v7 = vadd.f32 %v2753_v30, %v2655_v9 }
 0x5f3   : > { %v2792_v3 = vmul.f32 0.044715, %v2784_v8  ;;  %v2778_v2 = vmul.f32 %v7920_v29, %v7920_v29  ;;  %v2768_v8 = vmul.f32 0.5, %v7911_v38 }
 0x5f4   : > { %v2793_v60 = vmul.f32 0.044715, %v2785_v31  ;;  %v2779_v48 = vmul.f32 %v7923_v7, %v7923_v7  ;;  %v2757_v15 = vpop.f32.mrb[32].mxu0  ;;  %v5123_v43 = vpop.f32.mrb[32].mxu1 }
 0x5f5   : > { %v2800_v4 = vadd.f32 %v2792_v3, %v7911_v38  ;;  %v2786_v49 = vmul.f32 %v2778_v2, %v7920_v29  ;;  %v7931_v59 = vadd.f32 %v2757_v15, %v2660_v5  ;;  %v2759_v58 = vpop.f32.mrb[33].mxu0  ;;  %v5124_v13 = vpop.f32.mrb[33].mxu1 }
 0x5f6   : > { %v2801_v25 = vadd.f32 %v2793_v60, %v7913_v16  ;;  %v2787_v51 = vmul.f32 %v2779_v48, %v7923_v7  ;;  %v7935_v40 = vadd.f32 %v2759_v58, %v2660_v5  ;;  %v5125_v28 = vadd.f32 %v5124_v13, %v5123_v43  ;;  %v5126_v46 = vpop.f32.mrb[34].mxu1 }
 0x5f7   : > { %v2808_v47 = vmul.f32 0.7978846, %v2800_v4  ;;  %v2794_v62 = vmul.f32 0.044715, %v2786_v49  ;;  %v2780_v61 = vmul.f32 %v7931_v59, %v7931_v59  ;;  %v5127_v10 = vpop.f32.mrb[35].mxu1  ;;  %v2769_v5 = vmul.f32 0.5, %v7913_v16 }
 0x5f8   : > { %v2809_v19 = vmul.f32 0.7978846, %v2801_v25  ;;  %v2795_v35 = vmul.f32 0.044715, %v2787_v51  ;;  %v2781_v22 = vmul.f32 %v7935_v40, %v7935_v40  ;;  %3204 = vst [vmem:[#allocation2 + $0x30] sm:$0xff] %v5125_v28  ;;  %v2763_v56 = vpop.f32.mrb[34].mxu0  ;;  %v5128_v1 = vadd.f32 %v5127_v10, %v5126_v46 }
 0x5f9   : > { %5824 = vtanh.f32 %v2808_v47  ;;  %v2802_v33 = vadd.f32 %v2794_v62, %v7920_v29  ;;  %v2788_v53 = vmul.f32 %v2780_v61, %v7931_v59  ;;  %v2765_v36 = vpop.f32.mrb[35].mxu0  ;;  %v2764_v37 = vadd.f32 %v2763_v56, %v2665_v11 }
 0x5fa   : > { %5826 = vtanh.f32 %v2809_v19  ;;  %v2803_v52 = vadd.f32 %v2795_v35, %v7923_v7  ;;  %v2789_v34 = vmul.f32 %v2781_v22, %v7935_v40  ;;  %3205 = vst [vmem:[#allocation2 + $0x38] sm:$0xff] %v5128_v1  ;;  %v2766_v14 = vadd.f32 %v2765_v36, %v2665_v11 }
 0x5fb   : > { %v2810_v44 = vmul.f32 0.7978846, %v2802_v33  ;;  %v2796_v50 = vmul.f32 0.044715, %v2788_v53  ;;  %v2782_v6 = vmul.f32 %v2764_v37, %v2764_v37  ;;  %v2770_v4 = vmul.f32 0.5, %v7920_v29 }
 0x5fc   : > { %v2811_v12 = vmul.f32 0.7978846, %v2803_v52  ;;  %v2797_v54 = vmul.f32 0.044715, %v2789_v34  ;;  %v2783_v27 = vmul.f32 %v2766_v14, %v2766_v14  ;;  %v2771_v58 = vmul.f32 0.5, %v7923_v7 }
 0x5fd   : > { %5828 = vtanh.f32 %v2810_v44  ;;  %v2804_v57 = vadd.f32 %v2796_v50, %v7931_v59  ;;  %v2790_v18 = vmul.f32 %v2782_v6, %v2764_v37  ;;  %v2772_v28 = vmul.f32 0.5, %v7931_v59 }
 0x5fe   : > { %5830 = vtanh.f32 %v2811_v12  ;;  %v2805_v42 = vadd.f32 %v2797_v54, %v7935_v40  ;;  %v2791_v20 = vmul.f32 %v2783_v27, %v2766_v14  ;;  %v2773_v62 = vmul.f32 0.5, %v7935_v40 }
 0x5ff   : > { %v2812_v55 = vmul.f32 0.7978846, %v2804_v57  ;;  %v2798_v45 = vmul.f32 0.044715, %v2790_v18  ;;  %v2774_v53 = vmul.f32 0.5, %v2764_v37  ;;  %v2775_v59 = vmul.f32 0.5, %v2766_v14 }
 0x600   : > { %v2813_v63 = vmul.f32 0.7978846, %v2805_v42  ;;  %v2799_v0 = vmul.f32 0.044715, %v2791_v20  ;;  %v7969_v57 = vmov 0.0   ;;  %v7971_v27 = vmov 0.0  }
 0x601   : > { %5832 = vtanh.f32 %v2812_v55  ;;  %v2806_v21 = vadd.f32 %v2798_v45, %v2764_v37  ;;  %v7973_v37 = vmov 0.0   ;;  %v7977_v42 = vmov 0.0  }
 0x602   : > { %5834 = vtanh.f32 %v2813_v63  ;;  %v2807_v26 = vadd.f32 %v2799_v0, %v2766_v14  ;;  %v7975_v14 = vmov 0.0   ;;  %v7979_v18 = vmov 0.0  }
 0x603   : > { %v5825_v9 = vpop.eup %5824  ;;  %v2814_v31 = vmul.f32 0.7978846, %v2806_v21  ;;  %v7981_v55 = vmov 0.0   ;;  %v7983_v20 = vmov 0.0   ;;  %v7985_v63 = vmov 0.0  }
 0x604   : > { %v5827_v24 = vpop.eup %5826  ;;  %v2824_v30 = vadd.f32 1.0, %v5825_v9  ;;  %v2815_v2 = vmul.f32 0.7978846, %v2807_v26  ;;  %v7987_v45 = vmov 0.0   ;;  %v7989_v0 = vmov 0.0  }
 0x605   : > { %v2825_v3 = vadd.f32 1.0, %v5827_v24  ;;  %5836 = vtanh.f32 %v2814_v31  ;;  %v7991_v21 = vmov 0.0   ;;  %v7993_v9 = vmov 0.0  }
 0x606   : > { %v7949_v60 = vmul.f32 %v2824_v30, %v2768_v8  ;;  %5838 = vtanh.f32 %v2815_v2  ;;  %v7995_v26 = vmov 0.0   ;;  %v7997_v24 = vmov 0.0  }
 0x607   : > { %v5829_v48 = vpop.eup %5828  ;;  %v7951_v15 = vmul.f32 %v2825_v3, %v2769_v5  ;;  %v7999_v8 = vmov 0.0  }
 0x608   : > { %v5831_v43 = vpop.eup %5830  ;;  %v2826_v49 = vadd.f32 1.0, %v5829_v48 }
 0x609   : > { %v2827_v38 = vadd.f32 1.0, %v5831_v43 }
 0x60a   : > { %v7955_v13 = vmul.f32 %v2826_v49, %v2770_v4 }
 0x60b   : > { %v5833_v25 = vpop.eup %5832  ;;  %v7957_v16 = vmul.f32 %v2827_v38, %v2771_v58 }
 0x60c   : > { %v5835_v51 = vpop.eup %5834  ;;  %v2828_v46 = vadd.f32 1.0, %v5833_v25  ;;  %v5089_v47 = vpop.f32.mrb[36].mxu0 }
 0x60d   : > { %v2829_v61 = vadd.f32 1.0, %v5835_v51  ;;  %v5090_v10 = vpop.f32.mrb[37].mxu0 }
 0x60e   : > { %v7961_v19 = vmul.f32 %v2828_v46, %v2772_v28  ;;  %v5091_v29 = vadd.f32 %v5090_v10, %v5089_v47  ;;  %v5092_v35 = vpop.f32.mrb[38].mxu0 }
 0x60f   : > { %v7963_v7 = vmul.f32 %v2829_v61, %v2773_v62  ;;  %v5093_v22 = vpop.f32.mrb[39].mxu0  ;;  %v5837_v56 = vpop.eup %5836 }
 0x610   : > { %3021 = vst [vmem:[#allocation2] sm:$0xff] %v5091_v29  ;;  %v5094_v11 = vadd.f32 %v5093_v22, %v5092_v35  ;;  %v5839_v33 = vpop.eup %5838  ;;  %v2830_v1 = vadd.f32 1.0, %v5837_v56 }
 0x611   : > { %v2831_v36 = vadd.f32 1.0, %v5839_v33 }
 0x612   : > { %3022 = vst [vmem:[#allocation2 + $0x8] sm:$0xff] %v5094_v11  ;;  %v7965_v52 = vmul.f32 %v2830_v1, %v2774_v53 }
 0x613   : > { %v7967_v40 = vmul.f32 %v2831_v36, %v2775_v59 }
 0x614   : > { %v5095_v34 = vpop.f32.mrb[40].mxu0 }
 0x615   : > { %v5096_v44 = vpop.f32.mrb[41].mxu0 }
 0x616   : > { %v5097_v50 = vadd.f32 %v5096_v44, %v5095_v34  ;;  %v5098_v12 = vpop.f32.mrb[42].mxu0 }
 0x617   : > { %v5099_v54 = vpop.f32.mrb[43].mxu0 }
 0x618   : > { %3023 = vst [vmem:[#allocation2 + $0x10] sm:$0xff] %v5097_v50  ;;  %v5100_v6 = vadd.f32 %v5099_v54, %v5098_v12 }
 0x61a   : > { %3024 = vst [vmem:[#allocation2 + $0x18] sm:$0xff] %v5100_v6 }
 0x61b LB: >> { %s4877_s0 = sshll.u32 %s6682_s23, 3  ;;  %s5007_s4 = sshll.u32 %s6682_s23, 9  ;;  %v8691_v58 = vsub.s32 0, %v7521_v17  ;;  %v8692_v25 = vsub.s32 1, %v7521_v17  ;;  %v8693_v28 = vsub.s32 2, %v7521_v17  ;;  %v8694_v47 = vsub.s32 3, %v7521_v17  ;;  %s6682_s23 = sphi %s8001_s23, %s3211_s23   ;;  %v6678_v8 = vphi %v7999_v8, %v8729_v8   ;;  %v6674_v24 = vphi %v7997_v24, %v8728_v24   ;;  %v6670_v26 = vphi %v7995_v26, %v8727_v26   ;;  %v6666_v9 = vphi %v7993_v9, %v8726_v9   ;;  %v6662_v21 = vphi %v7991_v21, %v8725_v21   ;;  %v6658_v0 = vphi %v7989_v0, %v8724_v0   ;;  %v6654_v45 = vphi %v7987_v45, %v8723_v45   ;;  %v6650_v63 = vphi %v7985_v63, %v8722_v63   ;;  %v6646_v20 = vphi %v7983_v20, %v8721_v20   ;;  %v6642_v55 = vphi %v7981_v55, %v8720_v55   ;;  %v6638_v18 = vphi %v7979_v18, %v8719_v18   ;;  %v6634_v42 = vphi %v7977_v42, %v8718_v42   ;;  %v6630_v14 = vphi %v7975_v14, %v8717_v14   ;;  %v6626_v37 = vphi %v7973_v37, %v8716_v37   ;;  %v6622_v27 = vphi %v7971_v27, %v8715_v27   ;;  %v6618_v57 = vphi %v7969_v57, %v8714_v57  }
 0x61c   : >> { %s3229_s11 = scalar_lea.vmem [#allocation2], %s4877_s0  ;;  %s8040_s9 = scalar_lea.vmem [#allocation20], %s5007_s4  ;;  %v8695_v61 = vsub.s32 4, %v7521_v17  ;;  %v8696_v29 = vsub.s32 5, %v7521_v17  ;;  %v8697_v22 = vsub.s32 6, %v7521_v17  ;;  %v8698_v11 = vsub.s32 7, %v7521_v17 }
 0x61d   : >> { %v3233_v31 = vld [vmem:[%s8040_s9] sm:$0xff]  ;;  %v3234_v5 = vld [vmem:[%s8040_s9 + $0x8] sm:$0xff]  ;;  %v3235_v3 = vld [vmem:[%s8040_s9 + $0x10] sm:$0xff]  ;;  %s3211_s23 = sadd.s32 1, %s6682_s23  }
 0x61e   : >> { %v3236_v2 = vld [vmem:[%s8040_s9 + $0x18] sm:$0xff]  ;;  %v3237_v48 = vld [vmem:[%s8040_s9 + $0x20] sm:$0xff]  ;;  %v3238_v43 = vld [vmem:[%s8040_s9 + $0x28] sm:$0xff]  ;;  %p8223_p7 = scmp.ge.s32.totalorder %s3211_s23, 8  }
 0x61f   : >> { %v3239_v4 = vld [vmem:[%s8040_s9 + $0x30] sm:$0xff]  ;;  %v3240_v49 = vld [vmem:[%s8040_s9 + $0x38] sm:$0xff]  ;;  %v4881_v34 = vld [vmem:[%s8040_s9 + $0x40] sm:$0xff]  ;;  %5164 = vmatprep.subr.bf16.mxu1 (%p8223_p7), %v7890_v23  ;;  %s8732_s4 = sld [smem:[#allocation55_spill]] (%p8223_p7)  ;;  %s8733_s0 = sld [smem:[#allocation56_spill]] (%p8223_p7) }
 0x620   : >> { %v4882_v44 = vld [vmem:[%s8040_s9 + $0x48] sm:$0xff]  ;;  %5166 = vmatpush1.bf16.msra.mxu1 (%p8223_p7), %v7888_v39  ;;  %v5851_v39 = vld [vmem:[#allocation11 + $0x34] ss:$8 sps:$4 sm:$0xff] (%p8223_p7)   ;;  %v5853_v23 = vld [vmem:[#allocation11 + $0x30] ss:$8 sps:$4 sm:$0xff] (%p8223_p7)   ;;  %s8734_s13 = sld [smem:[#allocation57_spill]] (%p8223_p7) }
 0x621   : >> { %v3230_v30 = vld [vmem:[%s3229_s11] sm:$0xff]  ;;  %5168 = vmatprep.subr.bf16.mxu1 (%p8223_p7), %v7900_v41  ;;  %s8585_s10 = sshll.u32 (%p8223_p7), %s6861_s26, 9  ;;  %s4234_s7 = sshll.u32 (%p8223_p7), %s7435_s16, 4  ;;  %s8420_s7 = int_to_ptr.vmem [resolvable:$true] %s4234_s7 }
 0x622   : >> { %v3244_v38 = vrot.slane %v3230_v30, %v8691_v58  ;;  %v3275_v51 = vrot.slane %v3230_v30, %v8692_v25  ;;  %v8056_v46 = vrot.slane %v3230_v30, %v8693_v28  ;;  %v8060_v62 = vrot.slane %v3230_v30, %v8694_v47  ;;  %v4883_v58 = vld [vmem:[%s8040_s9 + $0x50] sm:$0xff]  ;;  %v4884_v25 = vld [vmem:[%s8040_s9 + $0x58] sm:$0xff]  ;;  %v4885_v28 = vld [vmem:[%s8040_s9 + $0x60] sm:$0xff]  ;;  %s8735_s1 = sld [smem:[#allocation58_spill]] (%p8223_p7)  ;;  %p8736_p4 = scmp.ne.s32.totalorder (%p8223_p7), %s8628_s14, 0 }
 0x623   : >> { %v8064_v10 = vrot.slane %v3230_v30, %v8695_v61  ;;  %v8068_v35 = vrot.slane %v3230_v30, %v8696_v29  ;;  %v8072_v56 = vrot.slane %v3230_v30, %v8697_v22  ;;  %v8076_v33 = vrot.slane %v3230_v30, %v8698_v11  ;;  %v4886_v61 = vld [vmem:[%s8040_s9 + $0x68] sm:$0xff]  ;;  %s6706_s11 = smov (%p8223_p7), [#allocation24]  }
 0x624   : >> { %v3245_v53 = vmul.f32 %v3244_v38, %v3233_v31  ;;  %v3246_v1 = vmul.f32 %v3244_v38, %v3234_v5  ;;  %v3247_v59 = vmul.f32 %v3244_v38, %v3235_v3  ;;  %v3248_v36 = vmul.f32 %v3244_v38, %v3236_v2  ;;  %v4887_v3 = vld [vmem:[%s8040_s9 + $0x70] sm:$0xff]  ;;  %v4888_v2 = vld [vmem:[%s8040_s9 + $0x78] sm:$0xff]  ;;  %5170 = vmatpush1.bf16.msra.mxu1 (%p8223_p7), %v7897_v32  ;;  %v5850_v17 = vld [vmem:[#allocation11 + $0x20] ss:$8 sps:$4 sm:$0xff] (%p8223_p7)  }
 0x625   : >> { %v3249_v50 = vmul.f32 %v3244_v38, %v3237_v48  ;;  %v3250_v12 = vmul.f32 %v3244_v38, %v3238_v43  ;;  %v3251_v54 = vmul.f32 %v3244_v38, %v3239_v4  ;;  %v3252_v6 = vmul.f32 %v3244_v38, %v3240_v49  ;;  %v5856_v41 = vld [vmem:[#allocation11 + $0x40] ss:$8 sps:$4 sm:$0xff] (%p8223_p7)  }
 0x626   : >> { %v3253_v47 = vadd.f32 %v6678_v8, %v3245_v53  ;;  %v3254_v30 = vadd.f32 %v6674_v24, %v3246_v1  ;;  %v3255_v31 = vadd.f32 %v6670_v26, %v3247_v59  ;;  %v3256_v5 = vadd.f32 %v6666_v9, %v3248_v36  ;;  %v4891_v24 = vld [vmem:[%s8040_s9 + $0x80] sm:$0xff]  ;;  %v4892_v26 = vld [vmem:[%s8040_s9 + $0x88] sm:$0xff]  ;;  %v4893_v59 = vld [vmem:[%s8040_s9 + $0x90] sm:$0xff] }
 0x627   : >> { %v3257_v29 = vadd.f32 %v6662_v21, %v3249_v50  ;;  %v3258_v48 = vadd.f32 %v6658_v0, %v3250_v12  ;;  %v3259_v43 = vadd.f32 %v6654_v45, %v3251_v54  ;;  %v3260_v4 = vadd.f32 %v6650_v63, %v3252_v6  ;;  %v4894_v36 = vld [vmem:[%s8040_s9 + $0x98] sm:$0xff]  ;;  %v4895_v21 = vld [vmem:[%s8040_s9 + $0xa0] sm:$0xff]  ;;  %v4897_v50 = vld [vmem:[%s8040_s9 + $0xb0] sm:$0xff] }
 0x628   : >> { %v3276_v49 = vmul.f32 %v4881_v34, %v3275_v51  ;;  %v3277_v38 = vmul.f32 %v4882_v44, %v3275_v51  ;;  %v3278_v22 = vmul.f32 %v4883_v58, %v3275_v51  ;;  %v3279_v8 = vmul.f32 %v4884_v25, %v3275_v51  ;;  %v4896_v44 = vld [vmem:[%s8040_s9 + $0xa8] sm:$0xff]  ;;  %v4898_v12 = vld [vmem:[%s8040_s9 + $0xb8] sm:$0xff]  ;;  %v4901_v25 = vld [vmem:[%s8040_s9 + $0xc0] sm:$0xff]  ;;  %s8418_s23 = scalar_lea.hbm (%p8223_p7), %s8735_s1, %s8585_s10 }
 0x629   : >> { %v3280_v9 = vmul.f32 %v4885_v28, %v3275_v51  ;;  %v3281_v11 = vmul.f32 %v4886_v61, %v3275_v51  ;;  %v3282_v53 = vmul.f32 %v4887_v3, %v3275_v51  ;;  %v3283_v1 = vmul.f32 %v4888_v2, %v3275_v51  ;;  %v4903_v61 = vld [vmem:[%s8040_s9 + $0xd0] sm:$0xff]  ;;  %v4904_v3 = vld [vmem:[%s8040_s9 + $0xd8] sm:$0xff]  ;;  %v4905_v2 = vld [vmem:[%s8040_s9 + $0xe0] sm:$0xff] }
 0x62a   : >> { %v3284_v45 = vadd.f32 %v6646_v20, %v3276_v49  ;;  %v3285_v63 = vadd.f32 %v6642_v55, %v3277_v38  ;;  %v3286_v0 = vadd.f32 %v6638_v18, %v3278_v22  ;;  %v3287_v34 = vadd.f32 %v6634_v42, %v3279_v8  ;;  %v3789_v32 = vld [vmem:[#allocation18 + $0x8] sm:$0xff] (%p8223_p7) }
 0x62b   : >> { %v3288_v51 = vadd.f32 %v6630_v14, %v3280_v9  ;;  %v3289_v54 = vadd.f32 %v6626_v37, %v3281_v11  ;;  %v3290_v6 = vadd.f32 %v6622_v27, %v3282_v53  ;;  %v3291_v20 = vadd.f32 %v6618_v57, %v3283_v1  ;;  %v4902_v14 = vld [vmem:[%s8040_s9 + $0xc8] sm:$0xff]  ;;  %v4908_v9 = vld [vmem:[%s8040_s9 + $0xf8] sm:$0xff] }
 0x62c   : >> { %v3307_v55 = vmul.f32 %v4891_v24, %v8056_v46  ;;  %v3308_v18 = vmul.f32 %v4892_v26, %v8056_v46  ;;  %v3309_v42 = vmul.f32 %v4893_v59, %v8056_v46  ;;  %v3310_v58 = vmul.f32 %v4894_v36, %v8056_v46  ;;  %v4906_v24 = vld [vmem:[%s8040_s9 + $0xe8] sm:$0xff]  ;;  %v4907_v26 = vld [vmem:[%s8040_s9 + $0xf0] sm:$0xff] }
 0x62d   : >> { %v3311_v28 = vmul.f32 %v4895_v21, %v8056_v46  ;;  %v3312_v37 = vmul.f32 %v4896_v44, %v8056_v46  ;;  %v3313_v27 = vmul.f32 %v4897_v50, %v8056_v46  ;;  %v3314_v57 = vmul.f32 %v4898_v12, %v8056_v46  ;;  %v4914_v44 = vld [vmem:[%s8040_s9 + $0x118] sm:$0xff]  ;;  %v4915_v50 = vld [vmem:[%s8040_s9 + $0x120] sm:$0xff] }
 0x62e   : >> { %v3315_v49 = vadd.f32 %v3307_v55, %v3253_v47  ;;  %v3316_v38 = vadd.f32 %v3308_v18, %v3254_v30  ;;  %v3317_v22 = vadd.f32 %v3309_v42, %v3255_v31  ;;  %v3318_v8 = vadd.f32 %v3310_v58, %v3256_v5  ;;  %v4911_v31 = vld [vmem:[%s8040_s9 + $0x100] sm:$0xff]  ;;  %v4912_v5 = vld [vmem:[%s8040_s9 + $0x108] sm:$0xff] }
 0x62f   : >> { %v3319_v11 = vadd.f32 %v3311_v28, %v3257_v29  ;;  %v3320_v53 = vadd.f32 %v3312_v37, %v3258_v48  ;;  %v3321_v1 = vadd.f32 %v3313_v27, %v3259_v43  ;;  %v3322_v59 = vadd.f32 %v3314_v57, %v3260_v4  ;;  %v4913_v4 = vld [vmem:[%s8040_s9 + $0x110] sm:$0xff]  ;;  %v4916_v58 = vld [vmem:[%s8040_s9 + $0x128] sm:$0xff] }
 0x630   : >> { %v3338_v46 = vmul.f32 %v4901_v25, %v8060_v62  ;;  %v3339_v36 = vmul.f32 %v4902_v14, %v8060_v62  ;;  %v3340_v47 = vmul.f32 %v4903_v61, %v8060_v62  ;;  %v3341_v30 = vmul.f32 %v4904_v3, %v8060_v62  ;;  %v4917_v25 = vld [vmem:[%s8040_s9 + $0x130] sm:$0xff]  ;;  %v4918_v14 = vld [vmem:[%s8040_s9 + $0x138] sm:$0xff] }
 0x631   : >> { %v3342_v21 = vmul.f32 %v4905_v2, %v8060_v62  ;;  %v3343_v29 = vmul.f32 %v4906_v24, %v8060_v62  ;;  %v3344_v48 = vmul.f32 %v4907_v26, %v8060_v62  ;;  %v3345_v43 = vmul.f32 %v4908_v9, %v8060_v62  ;;  %v4924_v2 = vld [vmem:[%s8040_s9 + $0x158] sm:$0xff]  ;;  %v4925_v24 = vld [vmem:[%s8040_s9 + $0x160] sm:$0xff] }
 0x632   : >> { %v3346_v12 = vadd.f32 %v3338_v46, %v3284_v45  ;;  %v3347_v55 = vadd.f32 %v3339_v36, %v3285_v63  ;;  %v3348_v18 = vadd.f32 %v3340_v47, %v3286_v0  ;;  %v3349_v42 = vadd.f32 %v3341_v30, %v3287_v34  ;;  %v4921_v0 = vld [vmem:[%s8040_s9 + $0x140] sm:$0xff]  ;;  %v4922_v34 = vld [vmem:[%s8040_s9 + $0x148] sm:$0xff]  ;;  %v4927_v30 = vld [vmem:[%s8040_s9 + $0x170] sm:$0xff] }
 0x633   : >> { %v3350_v28 = vadd.f32 %v3342_v21, %v3288_v51  ;;  %v3351_v37 = vadd.f32 %v3343_v29, %v3289_v54  ;;  %v3352_v27 = vadd.f32 %v3344_v48, %v3290_v6  ;;  %v3353_v57 = vadd.f32 %v3345_v43, %v3291_v20  ;;  %v4923_v20 = vld [vmem:[%s8040_s9 + $0x150] sm:$0xff]  ;;  %v4926_v47 = vld [vmem:[%s8040_s9 + $0x168] sm:$0xff] }
 0x634   : >> { %v3369_v62 = vmul.f32 %v4911_v31, %v8064_v10  ;;  %v3370_v61 = vmul.f32 %v4912_v5, %v8064_v10  ;;  %v3371_v45 = vmul.f32 %v4913_v4, %v8064_v10  ;;  %v3372_v63 = vmul.f32 %v4914_v44, %v8064_v10  ;;  %v4928_v31 = vld [vmem:[%s8040_s9 + $0x178] sm:$0xff] }
 0x635   : >> { %v3373_v3 = vmul.f32 %v4915_v50, %v8064_v10  ;;  %v3374_v51 = vmul.f32 %v4916_v58, %v8064_v10  ;;  %v3375_v54 = vmul.f32 %v4917_v25, %v8064_v10  ;;  %v3376_v6 = vmul.f32 %v4918_v14, %v8064_v10  ;;  %v4934_v44 = vld [vmem:[%s8040_s9 + $0x198] sm:$0xff]  ;;  %v4935_v50 = vld [vmem:[%s8040_s9 + $0x1a0] sm:$0xff] }
 0x636   : >> { %v3377_v26 = vadd.f32 %v3369_v62, %v3315_v49  ;;  %v3378_v9 = vadd.f32 %v3370_v61, %v3316_v38  ;;  %v3379_v46 = vadd.f32 %v3371_v45, %v3317_v22  ;;  %v3380_v36 = vadd.f32 %v3372_v63, %v3318_v8  ;;  %v4931_v22 = vld [vmem:[%s8040_s9 + $0x180] sm:$0xff]  ;;  %v4932_v8 = vld [vmem:[%s8040_s9 + $0x188] sm:$0xff]  ;;  %v4937_v45 = vld [vmem:[%s8040_s9 + $0x1b0] sm:$0xff] }
 0x637   : >> { %v3381_v5 = vadd.f32 %v3373_v3, %v3319_v11  ;;  %v3382_v21 = vadd.f32 %v3374_v51, %v3320_v53  ;;  %v3383_v29 = vadd.f32 %v3375_v54, %v3321_v1  ;;  %v3384_v48 = vadd.f32 %v3376_v6, %v3322_v59  ;;  %v4933_v59 = vld [vmem:[%s8040_s9 + $0x190] sm:$0xff]  ;;  %v4936_v61 = vld [vmem:[%s8040_s9 + $0x1a8] sm:$0xff]  ;;  %v4938_v63 = vld [vmem:[%s8040_s9 + $0x1b8] sm:$0xff] }
 0x638   : >> { %v3400_v10 = vmul.f32 %v4921_v0, %v8068_v35  ;;  %v3401_v43 = vmul.f32 %v4922_v34, %v8068_v35  ;;  %v3402_v49 = vmul.f32 %v4923_v20, %v8068_v35  ;;  %v3403_v38 = vmul.f32 %v4924_v2, %v8068_v35  ;;  %v4944_v20 = vld [vmem:[%s8040_s9 + $0x1d8] sm:$0xff]  ;;  %v4945_v2 = vld [vmem:[%s8040_s9 + $0x1e0] sm:$0xff] }
 0x639   : >> { %v3404_v4 = vmul.f32 %v4925_v24, %v8068_v35  ;;  %v3405_v11 = vmul.f32 %v4926_v47, %v8068_v35  ;;  %v3406_v53 = vmul.f32 %v4927_v30, %v8068_v35  ;;  %v3407_v1 = vmul.f32 %v4928_v31, %v8068_v35 }
 0x63a   : >> { %v3408_v58 = vadd.f32 %v3400_v10, %v3346_v12  ;;  %v3409_v25 = vadd.f32 %v3401_v43, %v3347_v55  ;;  %v3410_v14 = vadd.f32 %v3402_v49, %v3348_v18  ;;  %v3411_v62 = vadd.f32 %v3403_v38, %v3349_v42  ;;  %v4941_v18 = vld [vmem:[%s8040_s9 + $0x1c0] sm:$0xff]  ;;  %v4942_v42 = vld [vmem:[%s8040_s9 + $0x1c8] sm:$0xff]  ;;  %v4947_v49 = vld [vmem:[%s8040_s9 + $0x1f0] sm:$0xff] }
 0x63b   : >> { %v3412_v0 = vadd.f32 %v3404_v4, %v3350_v28  ;;  %v3413_v34 = vadd.f32 %v3405_v11, %v3351_v37  ;;  %v3414_v3 = vadd.f32 %v3406_v53, %v3352_v27  ;;  %v3415_v51 = vadd.f32 %v3407_v1, %v3353_v57  ;;  %v4943_v57 = vld [vmem:[%s8040_s9 + $0x1d0] sm:$0xff]  ;;  %v4946_v43 = vld [vmem:[%s8040_s9 + $0x1e8] sm:$0xff]  ;;  %v4948_v38 = vld [vmem:[%s8040_s9 + $0x1f8] sm:$0xff]  ;;  %s6292_s9 = sshll.u32 (%p8223_p7), %s6706_s11, 4  ;;  %s6293_s9 = int_to_ptr.vmem [resolvable:$false] %s6292_s9 }
 0x63c   : >> { %v3431_v35 = vmul.f32 %v4931_v22, %v8072_v56  ;;  %v3432_v54 = vmul.f32 %v4932_v8, %v8072_v56  ;;  %v3433_v12 = vmul.f32 %v4933_v59, %v8072_v56  ;;  %v3434_v55 = vmul.f32 %v4934_v44, %v8072_v56  ;;  %s6294_s10 = scalar_lea.vmem (%p8223_p7), %s6293_s9, 1024  ;;  %p6295_p2 = scmp.lt.s32.totalorder (%p8223_p7), %s8420_s7, %s6293_s9 }
 0x63d   : >> { %v3435_v6 = vmul.f32 %v4935_v50, %v8072_v56  ;;  %v3436_v28 = vmul.f32 %v4936_v61, %v8072_v56  ;;  %v3437_v37 = vmul.f32 %v4937_v45, %v8072_v56  ;;  %v3438_v27 = vmul.f32 %v4938_v63, %v8072_v56 }
 0x63e   : >> { %v8179_v8 = vadd.f32 %v3431_v35, %v3377_v26   ;;  %v8181_v24 = vadd.f32 %v3432_v54, %v3378_v9   ;;  %v8183_v26 = vadd.f32 %v3433_v12, %v3379_v46   ;;  %v8185_v9 = vadd.f32 %v3434_v55, %v3380_v36   ;;  %v3792_v54 = vld [vmem:[%s8732_s4] sm:$0xff] (%p8223_p7) }
 0x63f   : >> { %v8190_v22 = vadd.f32 %v3435_v6, %v3381_v5   ;;  %v8192_v4 = vadd.f32 %v3436_v28, %v3382_v21   ;;  %v8194_v45 = vadd.f32 %v3437_v37, %v3383_v29   ;;  %v8196_v63 = vadd.f32 %v3438_v27, %v3384_v48   ;;  %v5862_v12 = vld [vmem:[#allocation11 + $0x60] ss:$8 sps:$4 sm:$0xff] (%p8223_p7)   ;;  %v3795_v6 = vld [vmem:[%s8732_s4 + $0x18] sm:$0xff] (%p8223_p7) }
 0x640   : >> { %v8699_v47 = vmov %v8179_v8  ;;  %v8700_v30 = vmov %v8181_v24  ;;  %v8701_v31 = vmov %v8183_v26  ;;  %v8702_v10 = vmov %v8185_v9 }
 0x641   : >> { %v8703_v56 = vmov %v8194_v45  ;;  %v8704_v11 = vmov %v8196_v63  ;;  %v3462_v53 = vmul.f32 %v4941_v18, %v8076_v33  ;;  %v3463_v8 = vmul.f32 %v4942_v42, %v8076_v33 }
 0x642   : >> { %v3464_v24 = vmul.f32 %v4943_v57, %v8076_v33  ;;  %v3465_v26 = vmul.f32 %v4944_v20, %v8076_v33  ;;  %v3466_v9 = vmul.f32 %v4945_v2, %v8076_v33  ;;  %v3467_v46 = vmul.f32 %v4946_v43, %v8076_v33  ;;  %v4015_v2 = vld [vmem:[%s8733_s0] sm:$0xff] (%p8223_p7)  ;;  %v4016_v43 = vld [vmem:[%s8733_s0 + $0x8] sm:$0xff] (%p8223_p7) }
 0x643   : >> { %v3468_v36 = vmul.f32 %v4947_v49, %v8076_v33  ;;  %v3469_v5 = vmul.f32 %v4948_v38, %v8076_v33  ;;  %v8206_v20 = vadd.f32 %v3462_v53, %v3408_v58   ;;  %v8208_v55 = vadd.f32 %v3463_v8, %v3409_v25   ;;  %v5842_v33 = vld [vmem:[#allocation11 + $0x4] ss:$8 sps:$4 sm:$0xff] (%p8223_p7)   ;;  %v5844_v25 = vld [vmem:[#allocation11] ss:$8 sps:$4 sm:$0xff] (%p8223_p7)   ;;  %v3791_v38 = vld [vmem:[#allocation18 + $0x18] sm:$0xff] (%p8223_p7) }
 0x644   : >> { %v8210_v18 = vadd.f32 %v3464_v24, %v3410_v14   ;;  %v8212_v42 = vadd.f32 %v3465_v26, %v3411_v62   ;;  %v8214_v14 = vadd.f32 %v3466_v9, %v3412_v0   ;;  %v8216_v37 = vadd.f32 %v3467_v46, %v3413_v34   ;;  %3602 = vmatprep.subr.bf16.mxu0 (%p8223_p7), %v5842_v33  ;;  %v5845_v34 = vld [vmem:[#allocation11 + $0x14] ss:$8 sps:$4 sm:$0xff] (%p8223_p7)   ;;  %v4116_v53 = vld [vmem:[%s8734_s13] sm:$0xff] (%p8223_p7) }
 0x645   : >> { %v8705_v29 = vmov %v8206_v20  ;;  %v8706_v48 = vmov %v8208_v55  ;;  %v8218_v27 = vadd.f32 %v3468_v36, %v3414_v3   ;;  %v8220_v57 = vadd.f32 %v3469_v5, %v3415_v51   ;;  %3210 = sbr.rel (!%p8223_p7) target bundleno = 1563 (0x61b), region = 272  ;;  %3603 = vmatpush1.bf16.msra.mxu0 (%p8223_p7), %v5844_v25  ;;  %v5847_v3 = vld [vmem:[#allocation11 + $0x10] ss:$8 sps:$4 sm:$0xff] (%p8223_p7)   ;;  %v5848_v51 = vld [vmem:[#allocation11 + $0x24] ss:$8 sps:$4 sm:$0xff] (%p8223_p7)  }
 0x646   : >> { %v8707_v1 = vmov %v8210_v18  ;;  %v8708_v59 = vmov %v8212_v42  ;;  %v8709_v44 = vmov %v8214_v14  ;;  %v8710_v50 = vmov %v8216_v37  ;;  %3604 = vmatprep.subr.bf16.mxu0 (%p8223_p7), %v5845_v34  ;;  %v5874_v46 = vld [vmem:[#allocation9 + $0x24] ss:$8 sps:$4 sm:$0xff] (%p8223_p7)   ;;  %v5877_v5 = vld [vmem:[#allocation9 + $0x34] ss:$8 sps:$4 sm:$0xff] (%p8223_p7)   ;;  %v5884_v25 = vld [vmem:[#allocation9 + $0x60] ss:$8 sps:$4 sm:$0xff] (%p8223_p7)  }
 0x647   : >> { %v8711_v61 = vmov %v8218_v27  ;;  %v8712_v35 = vmov %v8220_v57  ;;  %v8716_v37 = vmov %v8710_v50  ;;  %v8717_v14 = vmov %v8709_v44  ;;  %v5886_v33 = vld [vmem:[#allocation9 + $0x64] ss:$8 sps:$4 sm:$0xff] (%p8223_p7)   ;;  %v5889_v34 = vld [vmem:[#allocation9 + $0x74] ss:$8 sps:$4 sm:$0xff] (%p8223_p7)  }
 0x648   : >> { %v8714_v57 = vmov %v8712_v35  ;;  %v8715_v27 = vmov %v8711_v61  ;;  %v8718_v42 = vmov %v8708_v59  ;;  %v8719_v18 = vmov %v8707_v1  ;;  %v5857_v14 = vld [vmem:[#allocation11 + $0x54] ss:$8 sps:$4 sm:$0xff] (%p8223_p7)  }
 0x649   : >> { %v8720_v55 = vmov %v8706_v48  ;;  %v8721_v20 = vmov %v8705_v29  ;;  %v8722_v63 = vmov %v8704_v11  ;;  %v8723_v45 = vmov %v8703_v56  ;;  %3605 = vmatpush1.bf16.msra.mxu0 (%p8223_p7), %v5847_v3  ;;  %v5863_v18 = vld [vmem:[#allocation11 + $0x74] ss:$8 sps:$4 sm:$0xff] (%p8223_p7)   ;;  %v3793_v42 = vld [vmem:[%s8732_s4 + $0x8] sm:$0xff] (%p8223_p7)  ;;  %v5865_v57 = vld [vmem:[#allocation11 + $0x70] ss:$8 sps:$4 sm:$0xff] (%p8223_p7)  }
 0x64a   : >> { %v8724_v0 = vmov %v8192_v4  ;;  %v8725_v21 = vmov %v8190_v22  ;;  %v8726_v9 = vmov %v8702_v10  ;;  %v8727_v26 = vmov %v8701_v31  ;;  %3606 = vmatprep.subr.bf16.mxu0 (%p8223_p7), %v5848_v51  ;;  %v5859_v45 = vld [vmem:[#allocation11 + $0x50] ss:$8 sps:$4 sm:$0xff] (%p8223_p7)   ;;  %v5860_v63 = vld [vmem:[#allocation11 + $0x64] ss:$8 sps:$4 sm:$0xff] (%p8223_p7)  }
 0x64b   : >> { %v8728_v24 = vmov %v8700_v30  ;;  %v8729_v8 = vmov %v8699_v47  ;;  %v8730_v58 = vmov (%p8223_p7), 0   ;;  %v8731_v62 = vmov (%p8223_p7), 0.0   ;;  %v5854_v21 = vld [vmem:[#allocation11 + $0x44] ss:$8 sps:$4 sm:$0xff] (%p8223_p7)   ;;  %v3794_v55 = vld [vmem:[%s8732_s4 + $0x10] sm:$0xff] (%p8223_p7)  ;;  %s6288_s4 = scalar_lea.vmem (%p8223_p7), %s8420_s7, 512 }
 0x64c   : > { %3634 = vmatprep.mubr.bf16.mxu0 %v8730_v58  ;;  %3892 = vmatprep.mubr.f32.mxu1 %v8731_v62  ;;  %v3788_v0 = vld [vmem:[#allocation18] sm:$0xff]  ;;  %v3482_v28 = vadd.f32 %v8709_v44, %v8190_v22  ;;  %v3483_v37 = vadd.f32 %v8710_v50, %v8192_v4  ;;  %v3790_v27 = vld [vmem:[#allocation18 + $0x10] sm:$0xff]  ;;  %v3484_v8 = vadd.f32 %v8711_v61, %v8703_v56  ;;  %v4117_v26 = vld [vmem:[%s8734_s13 + $0x8] sm:$0xff]  ;;  %p6289_p9 = scmp.ne.s32.totalorder %s8420_s7, %s6288_s4  ;;  %p6296_p6 = scmp.lt.s32.totalorder %s6294_s10, %s6288_s4 }
 0x64d   : > { %5840 = vset.pattern.permute.xlu0 %v8730_v58  ;;  %5841 = vset.pattern.permute.xlu1 %v8730_v58  ;;  %v5868_v20 = vld [vmem:[#allocation9 + $0x4] ss:$8 sps:$4 sm:$0xff]   ;;  %v5866_v22 = vld [vmem:[#allocation9] ss:$8 sps:$4 sm:$0xff]   ;;  %v5871_v4 = vld [vmem:[#allocation9 + $0x14] ss:$8 sps:$4 sm:$0xff]   ;;  %v3485_v24 = vadd.f32 %v8712_v35, %v8704_v11  ;;  %v3478_v3 = vadd.f32 %v8705_v29, %v8699_v47  ;;  %v3479_v51 = vadd.f32 %v8706_v48, %v8700_v30 }
 0x64e   : > { %3607 = vmatpush1.bf16.msra.mxu0 %v5850_v17  ;;  %4981 = vmatmul.mubr.msk.f32.vlgmr.msra.gmra.mrb[36].mxu1 %vm1292_vm5, %v3788_v0  ;;  %v3504_v49 = vpack.c.bf16 %v3483_v37, %v3482_v28  ;;  %v5869_v9 = vld [vmem:[#allocation9 + $0x10] ss:$8 sps:$4 sm:$0xff]   ;;  %v5872_v56 = vld [vmem:[#allocation9 + $0x20] ss:$8 sps:$4 sm:$0xff]   ;;  %v5880_v44 = vld [vmem:[#allocation9 + $0x44] ss:$8 sps:$4 sm:$0xff]   ;;  %p6290_p3 = pnand %p6289_p9, %p8736_p4  ;;  %p6297_p5 = por %p6296_p6, %p6295_p2 }
 0x64f   : > { %3608 = vmatprep.subr.bf16.mxu0 %v5851_v39  ;;  %3898 = vmatprep.mubr.f32.mxu1 %v8731_v62  ;;  %v3505_v36 = vpack.c.bf16 %v3485_v24, %v3484_v8  ;;  %v5875_v11 = vld [vmem:[#allocation9 + $0x30] ss:$8 sps:$4 sm:$0xff]   ;;  %v5878_v50 = vld [vmem:[#allocation9 + $0x40] ss:$8 sps:$4 sm:$0xff]   ;;  %v5883_v61 = vld [vmem:[#allocation9 + $0x54] ss:$8 sps:$4 sm:$0xff]   ;;  %v3486_v39 = vpack.c.bf16 %v3479_v51, %v3478_v3 }
 0x650   : > { %3798 = vperm.xlu0 %5840, %v3792_v54   ;;  %3808 = vperm.xlu1 %5841, %v3794_v55   ;;  %v5881_v35 = vld [vmem:[#allocation9 + $0x50] ss:$8 sps:$4 sm:$0xff]   ;;  %p6291_p0 = pneg %p6290_p3 }
 0x651   : > { %v5887_v17 = vld [vmem:[#allocation9 + $0x70] ss:$8 sps:$4 sm:$0xff]  }
 0x652   : > { %3609 = vmatpush1.bf16.msra.mxu0 %v5853_v23  ;;  %4982 = vmatmul.mubr.msk.f32.gmra.mrb[38].mxu1 %vm1292_vm5, %v3789_v32  ;;  %v3480_v23 = vadd.f32 %v8707_v1, %v8701_v31  ;;  %p6298_p10 = pnand %p6297_p5, %p6291_p0 }
 0x653   : > { %3610 = vmatprep.subr.bf16.mxu0 %v5854_v21  ;;  %3904 = vmatprep.mubr.f32.mxu1 %v8731_v62  ;;  %v3481_v21 = vadd.f32 %v8708_v59, %v8702_v10 }
 0x654   : > { %3803 = vperm.xlu0 %5840, %v3793_v42   ;;  %3813 = vperm.xlu1 %5841, %v3795_v6  }
 0x656   : > { %3611 = vmatpush1.bf16.msra.mxu0 %v5856_v41  ;;  %4983 = vmatmul.mubr.msk.f32.gmra.mrb[40].mxu1 %vm1292_vm5, %v3790_v27  ;;  %v3487_v41 = vpack.c.bf16 %v3481_v21, %v3480_v23 }
 0x657   : > { %3612 = vmatprep.subr.bf16.mxu0 %v5857_v14  ;;  %3910 = vmatprep.mubr.f32.mxu1 %v8731_v62 }
 0x658   : > { %4019 = vperm.xlu0 %5840, %v4015_v2   ;;  %4024 = vperm.xlu1 %5841, %v4016_v43  }
 0x65a   : > { %3613 = vmatpush1.bf16.msra.mxu0 %v5859_v45  ;;  %4984 = vmatmul.mubr.msk.f32.gmra.mrb[42].mxu1 %vm1292_vm5, %v3791_v38 }
 0x65b   : > { %3614 = vmatprep.subr.bf16.mxu0 %v5860_v63  ;;  %4097 = vmatprep.mubr.f32.mxu1 %v8731_v62 }
 0x65c   : > { %4120 = vperm.xlu0 %5840, %v4116_v53   ;;  %4125 = vperm.xlu1 %5841, %v4117_v26  }
 0x65e   : > { %3615 = vmatpush1.bf16.msra.mxu0 %v5862_v12 }
 0x65f   : > { %3616 = vmatprep.subr.bf16.mxu0 %v5863_v18 }
 0x662   : > { %3617 = vmatpush1.bf16.msra.mxu0 %v5865_v57 }
 0x663   : > { %3735 = vmatprep.subr.bf16.mxu0 %v5868_v20 }
 0x665   : > { %3635 = vmatmul.mubr.bf16.vlgmr.msra.gmra.mrb[44].mxu0 %v3504_v49 }
 0x666   : > { %3736 = vmatpush1.bf16.msra.mxu0 %v5866_v22  ;;  %3644 = vmatprep.mubr.bf16.mxu0 %v8730_v58 }
 0x667   : > { %3737 = vmatprep.subr.bf16.mxu0 %v5871_v4 }
 0x66a   : > { %3738 = vmatpush1.bf16.msra.mxu0 %v5869_v9 }
 0x66b   : > { %3739 = vmatprep.subr.bf16.mxu0 %v5874_v46 }
 0x66d   : > { %3645 = vmatmul.mubr.bf16.gmra.mrb[48].mxu0 %v3505_v36 }
 0x66e   : > { %3740 = vmatpush1.bf16.msra.mxu0 %v5872_v56  ;;  %3767 = vmatprep.mubr.bf16.mxu0 %v8730_v58 }
 0x66f   : > { %3741 = vmatprep.subr.bf16.mxu0 %v5877_v5 }
 0x672   : > { %3742 = vmatpush1.bf16.msra.mxu0 %v5875_v11 }
 0x673   : > { %3743 = vmatprep.subr.bf16.mxu0 %v5880_v44 }
 0x676   : > { %3744 = vmatpush1.bf16.msra.mxu0 %v5878_v50 }
 0x677   : > { %3745 = vmatprep.subr.bf16.mxu0 %v5883_v61 }
 0x67a   : > { %3746 = vmatpush1.bf16.msra.mxu0 %v5881_v35 }
 0x67b   : > { %3747 = vmatprep.subr.bf16.mxu0 %v5886_v33 }
 0x67e   : > { %3748 = vmatpush1.bf16.msra.mxu0 %v5884_v25 }
 0x67f   : > { %3749 = vmatprep.subr.bf16.mxu0 %v5889_v34 }
 0x682   : > { %3750 = vmatpush1.bf16.msra.mxu0 %v5887_v17 }
 0x685   : > { %3768 = vmatmul.mubr.bf16.vlgmr.msra.gmra.mrb[44].mxu0 %v3486_v39 }
 0x686   : > { %3777 = vmatprep.mubr.bf16.mxu0 %v8730_v58 }
 0x68d   : > { %3778 = vmatmul.mubr.bf16.gmra.mrb[48].mxu0 %v3487_v41 }
 0x6cf   : > { %v3799_v32 = vpop.permute.xlu0 %3798  ;;  %v3809_v27 = vpop.permute.xlu1 %3808 }
 0x6d3   : > { %v3804_v54 = vpop.permute.xlu0 %3803  ;;  %v3814_v11 = vpop.permute.xlu1 %3813 }
 0x721   : > { %v3894_v47 = vpop.f32.mrb[36].mxu1 }
 0x722   : > { %v3896_v29 = vpop.f32.mrb[37].mxu1  ;;  %v3895_v12 = vadd.f32 %v3894_v47, %v3799_v32 }
 0x723   : > { %v3897_v31 = vadd.f32 %v3896_v29, %v3799_v32 }
 0x725   : > { %v3900_v14 = vpop.f32.mrb[38].mxu1 }
 0x726   : > { %v3902_v30 = vpop.f32.mrb[39].mxu1  ;;  %v3901_v55 = vadd.f32 %v3900_v14, %v3804_v54 }
 0x727   : > { %v3903_v1 = vadd.f32 %v3902_v30, %v3804_v54 }
 0x729   : > { %v3906_v48 = vpop.f32.mrb[40].mxu1 }
 0x72a   : > { %v3908_v45 = vpop.f32.mrb[41].mxu1  ;;  %v3907_v53 = vadd.f32 %v3906_v48, %v3809_v27 }
 0x72b   : > { %v3909_v26 = vadd.f32 %v3908_v45, %v3809_v27 }
 0x72d   : > { %v3912_v63 = vpop.f32.mrb[42].mxu1 }
 0x72e   : > { %v3914_v0 = vpop.f32.mrb[43].mxu1  ;;  %v3913_v34 = vadd.f32 %v3912_v63, %v3814_v11 }
 0x72f   : > { %v3915_v23 = vadd.f32 %v3914_v0, %v3814_v11 }
 0x758   : > { %v3769_v18 = vpop.f32.mrb[44].mxu0 }
 0x759   : > { %v8338_v10 = vadd.f32 %v3895_v12, %v3769_v18  ;;  %v3771_v59 = vpop.f32.mrb[45].mxu0 }
 0x75a   : > { %v8340_v58 = vadd.f32 %v3897_v31, %v3771_v59  ;;  %v3773_v42 = vpop.f32.mrb[46].mxu0 }
 0x75b   : > { %v3933_v6 = vmul.f32 %v8338_v10, %v8338_v10  ;;  %v8344_v28 = vadd.f32 %v3901_v55, %v3773_v42  ;;  %v3775_v37 = vpop.f32.mrb[47].mxu0 }
 0x75c   : > { %v3934_v57 = vmul.f32 %v8340_v58, %v8340_v58  ;;  %v8348_v20 = vadd.f32 %v3903_v1, %v3775_v37 }
 0x75d   : > { %v3941_v2 = vmul.f32 %v3933_v6, %v8338_v10  ;;  %v3935_v43 = vmul.f32 %v8344_v28, %v8344_v28 }
 0x75e   : > { %v3942_v49 = vmul.f32 %v3934_v57, %v8340_v58  ;;  %v3936_v38 = vmul.f32 %v8348_v20, %v8348_v20 }
 0x75f   : > { %v3949_v22 = vmul.f32 0.044715, %v3941_v2  ;;  %v3943_v4 = vmul.f32 %v3935_v43, %v8344_v28  ;;  %v3925_v43 = vmul.f32 0.5, %v8338_v10 }
 0x760   : > { %v3950_v8 = vmul.f32 0.044715, %v3942_v49  ;;  %v3944_v24 = vmul.f32 %v3936_v38, %v8348_v20  ;;  %v3779_v9 = vpop.f32.mrb[48].mxu0 }
 0x761   : > { %v3957_v46 = vadd.f32 %v3949_v22, %v8338_v10  ;;  %v3951_v36 = vmul.f32 0.044715, %v3943_v4  ;;  %v8359_v56 = vadd.f32 %v3907_v53, %v3779_v9  ;;  %v3781_v5 = vpop.f32.mrb[49].mxu0  ;;  %v3926_v4 = vmul.f32 0.5, %v8340_v58 }
 0x762   : > { %v3958_v44 = vadd.f32 %v3950_v8, %v8340_v58  ;;  %v3952_v50 = vmul.f32 0.044715, %v3944_v24  ;;  %v8362_v61 = vadd.f32 %v3909_v26, %v3781_v5  ;;  %v3783_v35 = vpop.f32.mrb[50].mxu0  ;;  %v3927_v26 = vmul.f32 0.5, %v8344_v28 }
 0x763   : > { %v3965_v33 = vmul.f32 0.7978846, %v3957_v46  ;;  %v3959_v25 = vadd.f32 %v3951_v36, %v8344_v28  ;;  %v3937_v3 = vmul.f32 %v8359_v56, %v8359_v56  ;;  %v3785_v51 = vpop.f32.mrb[51].mxu0  ;;  %v8371_v29 = vadd.f32 %v3913_v34, %v3783_v35 }
 0x764   : > { %v3966_v17 = vmul.f32 0.7978846, %v3958_v44  ;;  %v3960_v39 = vadd.f32 %v3952_v50, %v8348_v20  ;;  %v3938_v21 = vmul.f32 %v8362_v61, %v8362_v61  ;;  %v8374_v48 = vadd.f32 %v3915_v23, %v3785_v51 }
 0x765   : > { %5890 = vtanh.f32 %v3965_v33  ;;  %v3967_v41 = vmul.f32 0.7978846, %v3959_v25  ;;  %v3945_v47 = vmul.f32 %v3937_v3, %v8359_v56  ;;  %v3939_v63 = vmul.f32 %v8371_v29, %v8371_v29 }
 0x766   : > { %5892 = vtanh.f32 %v3966_v17  ;;  %v3968_v14 = vmul.f32 0.7978846, %v3960_v39  ;;  %v3946_v30 = vmul.f32 %v3938_v21, %v8362_v61  ;;  %v3940_v32 = vmul.f32 %v8374_v48, %v8374_v48 }
 0x767   : > { %5894 = vtanh.f32 %v3967_v41  ;;  %v3953_v45 = vmul.f32 0.044715, %v3945_v47  ;;  %v3947_v12 = vmul.f32 %v3939_v63, %v8371_v29  ;;  %v3928_v36 = vmul.f32 0.5, %v8348_v20 }
 0x768   : > { %5896 = vtanh.f32 %v3968_v14  ;;  %v3954_v0 = vmul.f32 0.044715, %v3946_v30  ;;  %v3948_v31 = vmul.f32 %v3940_v32, %v8374_v48  ;;  %v3929_v25 = vmul.f32 0.5, %v8359_v56 }
 0x769   : > { %v3961_v54 = vadd.f32 %v3953_v45, %v8359_v56  ;;  %v3955_v18 = vmul.f32 0.044715, %v3947_v12  ;;  %v3931_v21 = vmul.f32 0.5, %v8371_v29  ;;  %v3932_v56 = vmul.f32 0.5, %v8374_v48 }
 0x76a   : > { %v3962_v55 = vadd.f32 %v3954_v0, %v8362_v61  ;;  %v3956_v42 = vmul.f32 0.044715, %v3948_v31 }
 0x76b   : > { %v3969_v1 = vmul.f32 0.7978846, %v3961_v54  ;;  %v3963_v6 = vadd.f32 %v3955_v18, %v8371_v29 }
 0x76c   : > { %v3970_v59 = vmul.f32 0.7978846, %v3962_v55  ;;  %v3964_v37 = vadd.f32 %v3956_v42, %v8374_v48  ;;  %v4114_v42 = vld [vmem:[#allocation23] sm:$0xff] }
 0x76d   : > { %5898 = vtanh.f32 %v3969_v1  ;;  %v3971_v57 = vmul.f32 0.7978846, %v3963_v6  ;;  %v4115_v6 = vld [vmem:[#allocation23 + $0x8] sm:$0xff] }
 0x76e   : > { %5900 = vtanh.f32 %v3970_v59  ;;  %v3972_v38 = vmul.f32 0.7978846, %v3964_v37  ;;  %v4013_v59 = vld [vmem:[#allocation21] sm:$0xff]  ;;  %v4020_v37 = vpop.permute.xlu0 %4019 }
 0x76f   : > { %v5891_v27 = vpop.eup %5890  ;;  %5902 = vtanh.f32 %v3971_v57 }
 0x770   : > { %v5893_v2 = vpop.eup %5892  ;;  %v3981_v49 = vadd.f32 1.0, %v5891_v27  ;;  %5904 = vtanh.f32 %v3972_v38 }
 0x771   : > { %v5895_v22 = vpop.eup %5894  ;;  %v3982_v53 = vadd.f32 1.0, %v5893_v2 }
 0x772   : > { %v5897_v8 = vpop.eup %5896  ;;  %v3989_v24 = vmul.f32 %v3981_v49, %v3925_v43  ;;  %v3983_v9 = vadd.f32 1.0, %v5895_v22  ;;  %v4025_v49 = vpop.permute.xlu1 %4024 }
 0x773   : > { %v3990_v46 = vmul.f32 %v3982_v53, %v3926_v4  ;;  %v3984_v5 = vadd.f32 1.0, %v5897_v8  ;;  %v4121_v53 = vpop.permute.xlu0 %4120 }
 0x774   : > { %v3997_v11 = vadd.f32 %v3989_v24, %v7949_v60  ;;  %v3991_v10 = vmul.f32 %v3983_v9, %v3927_v26  ;;  %v3930_v60 = vmul.f32 0.5, %v8362_v61 }
 0x775   : > { %v3998_v44 = vadd.f32 %v3990_v46, %v7951_v15  ;;  %v3992_v50 = vmul.f32 %v3984_v5, %v3928_v36 }
 0x776   : > { %5906 = vtanh.f32 %v3997_v11  ;;  %v3999_v58 = vadd.f32 %v3991_v10, %v7955_v13 }
 0x777   : > { %v5899_v35 = vpop.eup %5898  ;;  %5908 = vtanh.f32 %v3998_v44  ;;  %v4000_v33 = vadd.f32 %v3992_v50, %v7957_v16 }
 0x778   : > { %v5901_v28 = vpop.eup %5900  ;;  %5910 = vtanh.f32 %v3999_v58  ;;  %v3985_v34 = vadd.f32 1.0, %v5899_v35  ;;  %v5181_v20 = vpack.c.bf16 %v3999_v58, %v3997_v11 }
 0x779   : > { %5912 = vtanh.f32 %v4000_v33  ;;  %v3986_v3 = vadd.f32 1.0, %v5901_v28  ;;  %v5179_v51 = vpack.c.bf16 %v4000_v33, %v3998_v44  ;;  %v5903_v17 = vpop.eup %5902 }
 0x77a   : > { %v3993_v15 = vmul.f32 %v3985_v34, %v3929_v25  ;;  %v5905_v23 = vpop.eup %5904  ;;  %v3987_v16 = vadd.f32 1.0, %v5903_v17 }
 0x77b   : > { %v3994_v39 = vmul.f32 %v3986_v3, %v3930_v60  ;;  %v3988_v47 = vadd.f32 1.0, %v5905_v23 }
 0x77c   : > { %v4001_v13 = vadd.f32 %v3993_v15, %v7961_v19  ;;  %v3995_v14 = vmul.f32 %v3987_v16, %v3931_v21 }
 0x77d   : > { %v4002_v41 = vadd.f32 %v3994_v39, %v7963_v7  ;;  %v3996_v30 = vmul.f32 %v3988_v47, %v3932_v56 }
 0x77e   : > { %5914 = vtanh.f32 %v4001_v13  ;;  %v4003_v61 = vadd.f32 %v3995_v14, %v7965_v52 }
 0x77f   : > { %5916 = vtanh.f32 %v4002_v41  ;;  %v4004_v0 = vadd.f32 %v3996_v30, %v7967_v40  ;;  %v4014_v40 = vld [vmem:[#allocation21 + $0x8] sm:$0xff] }
 0x780   : > { %v5907_v45 = vpop.eup %5906  ;;  %5918 = vtanh.f32 %v4003_v61  ;;  %v5185_v19 = vpack.c.bf16 %v4003_v61, %v4001_v13 }
 0x781   : > { %v5909_v63 = vpop.eup %5908  ;;  %5920 = vtanh.f32 %v4004_v0  ;;  %v5183_v7 = vpack.c.bf16 %v4004_v0, %v4002_v41 }
 0x782   : > { %v5911_v32 = vpop.eup %5910 }
 0x783   : > { %v5913_v29 = vpop.eup %5912  ;;  %v5173_v54 = vpack.c.bf16 %v5911_v32, %v5907_v45 }
 0x784   : > { %v5171_v12 = vpack.c.bf16 %v5913_v29, %v5909_v63 }
 0x786   : > { %5172 = vmatprep.subr.bf16.mxu1 %v5171_v12 }
 0x787   : > { %5174 = vmatpush1.bf16.msra.mxu1 %v5173_v54 }
 0x788   : > { %v5915_v48 = vpop.eup %5914 }
 0x789   : > { %v5917_v55 = vpop.eup %5916 }
 0x78a   : > { %v5919_v31 = vpop.eup %5918 }
 0x78b   : > { %v5921_v1 = vpop.eup %5920  ;;  %v5177_v18 = vpack.c.bf16 %v5919_v31, %v5915_v48 }
 0x78c   : > { %v5175_v52 = vpack.c.bf16 %v5921_v1, %v5917_v55 }
 0x78e   : > { %5176 = vmatprep.subr.bf16.mxu1 %v5175_v52 }
 0x78f   : > { %5178 = vmatpush1.bf16.msra.mxu1 %v5177_v18 }
 0x790   : > { %5180 = vmatprep.subr.bf16.mxu1 %v5179_v51 }
 0x792   : > { %4985 = vmatmul.mubr.msk.f32.vlgmr.msra.gmra.mrb[44].mxu1 %vm1292_vm5, %v4013_v59 }
 0x793   : > { %5182 = vmatpush1.bf16.msra.mxu1 %v5181_v20  ;;  %4103 = vmatprep.mubr.f32.mxu1 %v8731_v62 }
 0x794   : > { %5184 = vmatprep.subr.bf16.mxu1 %v5183_v7 }
 0x796   : > { %4986 = vmatmul.mubr.msk.f32.gmra.mrb[46].mxu1 %vm1292_vm5, %v4014_v40 }
 0x797   : > { %5186 = vmatpush1.bf16.msra.mxu1 %v5185_v19  ;;  %4198 = vmatprep.mubr.f32.mxu1 %v8731_v62 }
 0x79a   : > { %4987 = vmatmul.mubr.msk.f32.vlgmr.msra.gmra.mrb[48].mxu1 %vm1292_vm5, %v4114_v42 }
 0x79b   : > { %4204 = vmatprep.mubr.f32.mxu1 %v8731_v62 }
 0x79e   : > { %4988 = vmatmul.mubr.msk.f32.gmra.mrb[50].mxu1 %vm1292_vm5, %v4115_v6 }
 0x865   : > { %v4099_v27 = vpop.f32.mrb[44].mxu1 }
 0x866   : > { %v4100_v57 = vadd.f32 %v4099_v27, %v4020_v37  ;;  %v4101_v2 = vpop.f32.mrb[45].mxu1 }
 0x867   : > { %v4102_v43 = vadd.f32 %v4101_v2, %v4020_v37 }
 0x868   : > { %4110 = vst [vmem:[%s7435_s16] sm:$0xff] %v4100_v57 }
 0x869   : > { %4111 = vst [vmem:[%s7435_s16 + $0x8] sm:$0xff] %v4102_v43  ;;  %v4105_v38 = vpop.f32.mrb[46].mxu1 }
 0x86a   : > { %v4106_v62 = vadd.f32 %v4105_v38, %v4025_v49  ;;  %v4107_v22 = vpop.f32.mrb[47].mxu1 }
 0x86b   : > { %v4108_v4 = vadd.f32 %v4107_v22, %v4025_v49 }
 0x86c   : > { %4112 = vst [vmem:[%s7435_s16 + $0x10] sm:$0xff] %v4106_v62 }
 0x86d   : > { %4113 = vst [vmem:[%s7435_s16 + $0x18] sm:$0xff] %v4108_v4  ;;  %v4200_v8 = vpop.f32.mrb[48].mxu1 }
 0x86e   : > { %v4201_v24 = vadd.f32 %v4200_v8, %v4121_v53  ;;  %v4202_v26 = vpop.f32.mrb[49].mxu1 }
 0x86f   : > { %6301 = shalt.err (!%p6298_p10)
}
 0x870   : > { %s6302_s16 = scalar_lea.hbm %s8418_s23, 512  ;;  %s6306_s11 = scalar_lea.hbm %s8735_s1, 1024 }
 0x871   : > { %p6303_p1 = scmp.ne.s32.totalorder %s8418_s23, %s6302_s16  ;;  %p6307_p13 = scmp.lt.u32.totalorder %s8418_s23, %s8735_s1 }
 0x872   : > { %p6308_p8 = scmp.lt.u32.totalorder %s6306_s11, %s6302_s16  ;;  %p6310_p9 = scmp.lt.u32.totalorder %s6302_s16, %s8418_s23 }
 0x873   : > { %p6304_p11 = pnand %p6303_p1, %p8736_p4 }
 0x874   : > { %p6309_p7 = por %p6308_p8, %p6307_p13 }
 0x875   : > { %p6305_p12 = pneg %p6304_p11 }
 0x876   : > { %p6311_p3 = por %p6310_p9, %p6309_p7 }
 0x878   : > { %p6312_p0 = pnand %p6311_p3, %p6305_p12 }
 0x87a   : > { %6315 = shalt.err (!%p6312_p0)
}
 0x87b   : > { %s8588_s4 = smov 256   ;;  %s6708_s12 = smov 16   ;;  %v4203_v9 = vadd.f32 %v4202_v26, %v4121_v53  ;;  %4211 = vst [vmem:[%s7438_s25] sm:$0xff] %v4201_v24  ;;  %v4126_v46 = vpop.permute.xlu1 %4125  ;;  %v4206_v36 = vpop.f32.mrb[50].mxu1 }
 0x87c   : > { %s8737_s0 = scalar_lea.sflag [#allocation5], %s7235_s3  ;;  %s4250_s13 = sshll.u32 %s7438_s25, 4  ;;  %v4207_v5 = vadd.f32 %v4206_v36, %v4126_v46  ;;  %v4208_v11 = vpop.f32.mrb[51].mxu1  ;;  %s8461_s13 = int_to_ptr.vmem [resolvable:$true] %s4250_s13 }
 0x87d   : > { %5255 = dma.vmem_to_hbm [thread:$0]  (%p8736_p4), %s8420_s7, 512, %s8418_s23, %s8737_s0, %s8588_s4, %s8588_s4, %s6708_s12   ;;  %v4209_v10 = vadd.f32 %v4208_v11, %v4126_v46 }
 0x87e   : > { %4212 = vst [vmem:[%s7438_s25 + $0x8] sm:$0xff] %v4203_v9  ;;  %s8738_s10 = sshll.u32 %s6861_s26, 9  ;;  %s8739_s9 = sld [smem:[#allocation59_spill]]  ;;  %4213 = vst [vmem:[%s7438_s25 + $0x10] sm:$0xff] %v4207_v5 }
 0x87f   : > { %4214 = vst [vmem:[%s7438_s25 + $0x18] sm:$0xff] %v4209_v10  ;;  %s4221_s7 = scalar_lea.sflag [#allocation26], %s7235_s3  ;;  %s6316_s23 = scalar_lea.vmem %s8461_s13, 512 }
 0x880   : > { %p6317_p2 = scmp.ne.s32.totalorder %s8461_s13, %s6316_s23  ;;  %s6709_s0 = smov [#allocation25]  }
 0x881   : > { %s6320_s26 = sshll.u32 %s6709_s0, 4  ;;  %s6321_s26 = int_to_ptr.vmem [resolvable:$false] %s6320_s26 }
 0x882   : > { %p6318_p6 = pnand %p6317_p2, %p8736_p4  ;;  %s6322_s4 = scalar_lea.vmem %s6321_s26, 1024 }
 0x883   : > { %p6323_p10 = scmp.lt.s32.totalorder %s8461_s13, %s6321_s26  ;;  %p6324_p1 = scmp.lt.s32.totalorder %s6322_s4, %s6316_s23 }
 0x884   : > { %s8459_s1 = scalar_lea.hbm %s8739_s9, %s8738_s10  ;;  %p6319_p5 = pneg %p6318_p6 }
 0x885   : > { %p6325_p11 = por %p6324_p1, %p6323_p10 }
 0x887   : > { %p6326_p12 = pnand %p6325_p11, %p6319_p5 }
 0x889   : > { %6329 = shalt.err (!%p6326_p12)
}
 0x88a   : > { %s6330_s25 = scalar_lea.hbm %s8459_s1, 512  ;;  %s6334_s11 = scalar_lea.hbm %s8739_s9, 1024 }
 0x88b   : > { %p6331_p13 = scmp.ne.s32.totalorder %s8459_s1, %s6330_s25  ;;  %p6335_p9 = scmp.lt.u32.totalorder %s8459_s1, %s8739_s9 }
 0x88c   : > { %p6336_p3 = scmp.lt.u32.totalorder %s6334_s11, %s6330_s25  ;;  %p6338_p2 = scmp.lt.u32.totalorder %s6330_s25, %s8459_s1 }
 0x88d   : > { %p6332_p8 = pnand %p6331_p13, %p8736_p4 }
 0x88e   : > { %p6337_p0 = por %p6336_p3, %p6335_p9 }
 0x88f   : > { %p6333_p7 = pneg %p6332_p8 }
 0x890   : > { %p6339_p6 = por %p6338_p2, %p6337_p0 }
 0x892   : > { %p6340_p5 = pnand %p6339_p6, %p6333_p7 }
 0x894   : > { %6343 = shalt.err (!%p6340_p5)
}
 0x895   : > { %s8740_s4 = smov 256  }
 0x896   : > { %5256 = dma.vmem_to_hbm [thread:$0]  (%p8736_p4), %s8461_s13, 512, %s8459_s1, %s4221_s7, %s8740_s4, %s8740_s4, %s6708_s12  }
 0x897 PF: > { %s4265_s23 = sand.u32 1, %s6534_s29   ;;  %p8741_p10 = scmp.ne.s32.totalorder %s8629_s5, 0 }
 0x898   : > { %p8742_p1 = scmp.ge.s32.totalorder %s6546_s30, 2  ;;  %s4266_s25 = scalar_lea.sflag [#allocation5], %s4265_s23 }
 0x89a   : > { %p5301_p11 = pnand %p8742_p1, %p8741_p10 }
 0x89c   : > { %6525 = dma.done.wait (!%p5301_p11), %s4266_s25, 512  }
 0x89d   : > { %6527 = vsyncadd (!%p5301_p11), %s4266_s25, 4294966784  ;;  %s4275_s14 = scalar_lea.sflag [#allocation26], %s4265_s23 }
 0x89e   : > { %6529 = dma.done.wait (!%p5301_p11), %s4275_s14, 512  }
 0x89f   : > { %6531 = vsyncadd (!%p5301_p11), %s4275_s14, 4294966784  ;;  %p48_p4 = scmp.ge.s32.totalorder %s7156_s8, 4   ;;  %s8743_s29 = smov %s6538_s2 }
 0x8a0   : > { %s8744_s2 = smov %s6542_s6  ;;  %s8745_s6 = smov %s7167_s21 }
 0x8a1   : > { %s8746_s30 = smov %s7156_s8  ;;  %50 = sbr.rel (!%p48_p4) target bundleno = 35 (0x23), region = 283 }
 0x8a8   :  { %4280 = vsyncpa [#allocation4], 1 }
 0x8a9   :  { %4282 = vsyncpa [#allocation4 + $0x1], 1 }
 0x8aa   :  { %4283 = vsyncpa [#allocation7], 1 }
 0x8ab   :  { %4284 = vsyncpa [#allocation10], 1 }
 0x8ac   :  { %4285 = vsyncpa [#allocation13], 1 }
 0x8ad   :  { %4286 = vsyncpa [#allocation16], 1 }
 0x8ae   :  { %4287 = vsyncpa [#allocation19], 1 }
 0x8af   :  { %4288 = vsyncpa [#allocation22], 1 }
 0x8b0   :  { %4289 = vsyncpa [#allocation5], 1 }
 0x8b1   :  { %4291 = vsyncpa [#allocation5 + $0x1], 1 }
 0x8b2   :  { %4292 = vsyncpa [#allocation26], 1 }
 0x8b3   :  { %4294 = vsyncpa [#allocation26 + $0x1], 1 }

</bundles_post_ra>
